<compile_context>
chip_gen: v5e
topology: v5e:2x2
jax: 0.10.0
libtpu: 0.0.40
codegen_flags: <defaults>
</compile_context>

<pallas_src>
import functools

import jax
import jax.numpy as jnp
from jax.experimental import pallas as pl
from jax.experimental.pallas import tpu as pltpu


def _round_up(n, m):
    return ((n + m - 1) // m) * m


def _vmem_limit_and_tt(T):
    """Pick VMEM limit + recurrence chunk length from the chip's VMEM size."""
    try:
        cap = pltpu.get_tpu_info().vmem_capacity_bytes
    except Exception:  # info query unavailable -> conservative defaults
        cap = 64 * 1024 * 1024
    big = cap >= 96 * 1024 * 1024          # v5e / v6e have 128 MiB; v7x has 64 MiB
    vmem_limit = (64 if big else 32) * 1024 * 1024
    if T < 32:
        tt = _round_up(T, 8)               # tiny sequences: avoid T-padding blow-up
    elif big and T >= 64:
        tt = 64
    else:
        tt = 32
    return vmem_limit, tt


def _resident_spec(shape, single_buffer):
    """BlockSpec for a weight whose block index never changes across the grid."""
    index_map = lambda *_: (0,) * len(shape)
    if single_buffer and hasattr(pl, "Buffered"):
        try:
            # Constant block index -> no DMA is gained or lost, but the second
            # pipelining buffer is saved (matters at large Hp on v7x VMEM).
            return pl.BlockSpec(shape, index_map, pipeline_mode=pl.Buffered(1))
        except TypeError:
            pass
    return pl.BlockSpec(shape, index_map)


# ---------------------------------------------------------------------------
# Kernel 1: serial LSTM recurrence, TT timesteps per grid step.
# ---------------------------------------------------------------------------
def _lstm_recurrence_kernel(xg_ref, whh_ref, b_ref, hs_ref, h_scr, c_scr, hs_scr):
    """xg_ref : (TT, Bblk, 4*Hp) bf16  precomputed x @ W_ih^T (time-major, no bias)
       whh_ref: (Hp, 4*Hp)       bf16  hidden->gates weight (pre-transposed)
       b_ref  : (1, 4*Hp)        f32   b_ih + b_hh (gate order i, f, o, g)
       hs_ref : (TT, Bblk, Hp)   bf16  hidden states for this chunk (output)
       h_scr  : (Bblk, Hp)       f32   h carried across time chunks
       c_scr  : (Bblk, Hp)       f32   c carried across time chunks
       hs_scr : (TT, Bblk, Hp)   f32   chunk staging (one block store at the end)
    """
    @pl.when(pl.program_id(1) == 0)        # new batch block -> reset recurrent state
    def _():
        h_scr[...] = jnp.zeros_like(h_scr)
        c_scr[...] = jnp.zeros_like(c_scr)

    tt, bblk, hp = hs_scr.shape
    whh = whh_ref[...]                                         # resident bf16 weight
    bias = jnp.broadcast_to(b_ref[...], (bblk, 4 * hp))        # hoisted broadcast

    def step(s, carry):
        h = h_scr[...]
        c = c_scr[...]
        # Only the h-projection is on the serial path (x-projection hoisted).
        # bf16 MXU operands, f32 accumulation; gate math stays f32.
        gates = (jnp.dot(h.astype(jnp.bfloat16), whh,
                         preferred_element_type=jnp.float32)
                 + xg_ref[s].astype(jnp.float32) + bias)
        # Permuted gate order (i, f, o, g): one sigmoid over 3*Hp lanes,
        # one tanh over Hp lanes (fewer, larger EUP pushes).
        sg = jax.nn.sigmoid(gates[:, : 3 * hp])
        g_g = jnp.tanh(gates[:, 3 * hp:])
        i_g = sg[:, 0 * hp:1 * hp]
        f_g = sg[:, 1 * hp:2 * hp]
        o_g = sg[:, 2 * hp:3 * hp]
        c_new = f_g * c + i_g * g_g
        h_new = o_g * jnp.tanh(c_new)
        c_scr[...] = c_new
        h_scr[...] = h_new
        hs_scr[s] = h_new                                      # f32, tile-aligned
        return carry

    # Moderate unroll: scheduler overlap without overrunning the 64-vreg file.
    jax.lax.fori_loop(0, tt, step, 0, unroll=min(tt, 8))
    # Single unmasked, lane-dense block store (and the only bf16 pack) per chunk.
    hs_ref[...] = hs_scr[...].astype(hs_ref.dtype)


# ---------------------------------------------------------------------------
# Kernel 2: MLP head on a flattened (time-major) row view — pure 2D matmuls,
# unmasked full-block load/store, parallel grid over row chunks.
# ---------------------------------------------------------------------------
def _mlp_head_kernel(hs_ref, w1_ref, b1_ref, w2_ref, b2_ref, out_ref):
    """hs_ref : (TH*Bp, Hp) bf16   rows are flattened (t, b), time-major
       w1_ref : (Hp, Hp) bf16, b1_ref: (1, Hp) f32
       w2_ref : (Hp, Dp) bf16, b2_ref: (1, Dp) f32
       out_ref: (TH*Bp, Dp) f32    single unmasked full-block store
    """
    z = jnp.dot(hs_ref[...], w1_ref[...],
                preferred_element_type=jnp.float32) + b1_ref[...]
    z = jnp.maximum(z, 0.0)
    y = jnp.dot(z.astype(jnp.bfloat16), w2_ref[...],
                preferred_element_type=jnp.float32) + b2_ref[...]
    out_ref[...] = y.astype(out_ref.dtype)


# ---------------------------------------------------------------------------
# Wrapper
# ---------------------------------------------------------------------------
@functools.partial(jax.jit, static_argnames=("single_buffer_weights",))
def lstm_model_forward(x, params, single_buffer_weights=True):
    """x: (B, T, D_in) float32, batch-first.  Returns (B, T, D_out) float32."""
    B, T, D_in = x.shape
    H = params["w_hh"].shape[1]             # w_hh: (4H, H)
    D_out = params["fc2_w"].shape[0]        # fc2_w: (D_out, H)

    Bp = _round_up(max(B, 8), 8)            # sublane tile
    Hp = _round_up(max(H, 128), 128)        # lane tile
    Dp = _round_up(max(D_out, 128), 128)    # lane-dense head output
    vmem_limit, TT = _vmem_limit_and_tt(T)  # chip-aware chunking / VMEM limit
    TH = min(TT, 32)                        # head chunk: M = TH*Bp rows per matmul
    Tp = _round_up(T, TT)                   # pad T so TT/TH never degrade to 1

    # Optional batch-block split of the recurrence across TensorCores (v7x).
    nb = 2 if (Bp >= 16 and Bp % 16 == 0) else 1
    Bblk = Bp // nb

    f32, bf16 = jnp.float32, jnp.bfloat16

    # ---- gate-blocked padding of LSTM params to Hp; gate order -> (i, f, o, g) ----
    perm = jnp.array([0, 1, 3, 2])          # PyTorch order is (i, f, g, o)
    w_ih_p = jnp.pad(params["w_ih"].reshape(4, H, D_in)[perm],
                     ((0, 0), (0, Hp - H), (0, 0))).reshape(4 * Hp, D_in)
    w_hh_p = jnp.pad(params["w_hh"].reshape(4, H, H)[perm],
                     ((0, 0), (0, Hp - H), (0, Hp - H))).reshape(4 * Hp, Hp)
    b_p = jnp.pad((params["b_ih"] + params["b_hh"]).reshape(4, H)[perm],
                  ((0, 0), (0, Hp - H))).reshape(1, 4 * Hp)

    w1_p = jnp.pad(params["fc1_w"], ((0, Hp - H), (0, Hp - H)))      # (Hp, Hp)
    b1_p = jnp.pad(params["fc1_b"], (0, Hp - H)).reshape(1, Hp)
    w2_p = jnp.pad(params["fc2_w"], ((0, Dp - D_out), (0, Hp - H)))  # (Dp, Hp)
    b2_p = jnp.pad(params["fc2_b"], (0, Dp - D_out)).reshape(1, Dp)

    # ---- hoisted input projection: one big MXU matmul over all Tp*Bp rows,
    #      folding the batch-first -> time-major transpose.  Stored bf16 and
    #      bias-free (bias is added inside the recurrence kernel). ----
    x_p = jnp.pad(x, ((0, Bp - B), (0, Tp - T), (0, 0)))             # (Bp, Tp, D_in)
    xg = jnp.einsum("btd,dg->tbg", x_p.astype(bf16), w_ih_p.T.astype(bf16),
                    preferred_element_type=f32).astype(bf16)         # (Tp, Bp, 4Hp)

    # ---- serial recurrence kernel (only h @ W_hh^T + gate math per step) ----
    hs = pl.pallas_call(
        _lstm_recurrence_kernel,
        out_shape=jax.ShapeDtypeStruct((Tp, Bp, Hp), bf16),
        grid_spec=pltpu.PrefetchScalarGridSpec(
            num_scalar_prefetch=0,
            grid=(nb, Tp // TT),
            in_specs=[
                pl.BlockSpec((TT, Bblk, 4 * Hp), lambda b, t: (t, b, 0)),
                _resident_spec((Hp, 4 * Hp), single_buffer_weights),
                _resident_spec((1, 4 * Hp), single_buffer_weights),
            ],
            out_specs=pl.BlockSpec((TT, Bblk, Hp), lambda b, t: (t, b, 0)),
            scratch_shapes=[
                pltpu.VMEM((Bblk, Hp), f32),       # h carry
                pltpu.VMEM((Bblk, Hp), f32),       # c carry
                pltpu.VMEM((TT, Bblk, Hp), f32),   # chunk staging for hs
            ],
        ),
        compiler_params=pltpu.CompilerParams(
            # Batch blocks are independent (parallel, megacore on v7x); the T
            # axis carries the h/c recurrence and must stay sequential.
            dimension_semantics=("parallel", "arbitrary"),
            vmem_limit_bytes=vmem_limit,
        ),
    )(xg, w_hh_p.T.astype(bf16), b_p)

    # Dropout(p=0.5) is identity in eval/inference mode.
    # TODO(synk): training-mode dropout (Bernoulli mask via pltpu.prng_*) not implemented.

    # ---- parallel MLP head over flattened time-major rows ----
    hs2 = hs.reshape(Tp * Bp, Hp)           # free row-major collapse in XLA
    MB = TH * Bp
    out2 = pl.pallas_call(
        _mlp_head_kernel,
        out_shape=jax.ShapeDtypeStruct((Tp * Bp, Dp), f32),
        grid_spec=pltpu.PrefetchScalarGridSpec(
            num_scalar_prefetch=0,
            grid=(Tp // TH,),
            in_specs=[
                pl.BlockSpec((MB, Hp), lambda t: (t, 0)),
                _resident_spec((Hp, Hp), single_buffer_weights),
                _resident_spec((1, Hp), single_buffer_weights),
                _resident_spec((Hp, Dp), single_buffer_weights),
                _resident_spec((1, Dp), single_buffer_weights),
            ],
            out_specs=pl.BlockSpec((MB, Dp), lambda t: (t, 0)),
        ),
        compiler_params=pltpu.CompilerParams(
            dimension_semantics=("parallel",),   # no time dependence
            vmem_limit_bytes=vmem_limit,
        ),
    )(hs2, w1_p.T.astype(bf16), b1_p, w2_p.T.astype(bf16), b2_p)

    # Time-major -> batch-first on the small sliced result (tiny XLA transpose).
    out_tm = out2.reshape(Tp, Bp, Dp)
    return jnp.transpose(out_tm[:T, :B, :D_out], (1, 0, 2))


def init_params(key, input_dim, hidden_dim, output_dim):
    """Deterministic parameter init matching the PyTorch module's shapes."""
    ks = jax.random.split(key, 8)
    s = 1.0 / jnp.sqrt(hidden_dim)
    u = lambda k, shape: jax.random.uniform(k, shape, jnp.float32, -s, s)
    return {
        "w_ih": u(ks[0], (4 * hidden_dim, input_dim)),
        "w_hh": u(ks[1], (4 * hidden_dim, hidden_dim)),
        "b_ih": u(ks[2], (4 * hidden_dim,)),
        "b_hh": u(ks[3], (4 * hidden_dim,)),
        "fc1_w": u(ks[4], (hidden_dim, hidden_dim)),
        "fc1_b": u(ks[5], (hidden_dim,)),
        "fc2_w": u(ks[6], (output_dim, hidden_dim)),
        "fc2_b": u(ks[7], (output_dim,)),
    }


def _reference_forward(x, params, *, bf16_matmuls):
    """Pure-JAX reference (lax.scan) mirroring PyTorch nn.LSTM + MLP (eval).

    With bf16_matmuls=True it mirrors the kernel's precision choices exactly:
    bf16 matmul operands, f32 accumulation, bf16-rounded xg and hs."""
    B, T, D_in = x.shape
    H = params["w_hh"].shape[1]
    f32, bf16 = jnp.float32, jnp.bfloat16
    cast = (lambda a: a.astype(bf16)) if bf16_matmuls else (lambda a: a)
    rnd = (lambda a: a.astype(bf16).astype(f32)) if bf16_matmuls else (lambda a: a)
    mm = lambda a, w: jnp.dot(cast(a), cast(w), preferred_element_type=f32)

    b = params["b_ih"] + params["b_hh"]

    def step(carry, x_t):
        h, c = carry
        g = rnd(mm(x_t, params["w_ih"].T)) + mm(h, params["w_hh"].T) + b
        i = jax.nn.sigmoid(g[:, 0 * H:1 * H])
        f = jax.nn.sigmoid(g[:, 1 * H:2 * H])
        gg = jnp.tanh(g[:, 2 * H:3 * H])
        o = jax.nn.sigmoid(g[:, 3 * H:4 * H])
        c = f * c + i * gg
        h = o * jnp.tanh(c)
        return (h, c), h

    h0 = jnp.zeros((B, H), f32)
    (_, _), hs = jax.lax.scan(step, (h0, h0), jnp.transpose(x, (1, 0, 2)))
    hs = rnd(jnp.transpose(hs, (1, 0, 2)))                           # (B, T, H)
    z = jnp.maximum(mm(hs, params["fc1_w"].T) + params["fc1_b"], 0.0)
    return mm(z, params["fc2_w"].T) + params["fc2_b"]


if __name__ == "__main__":
    B, T, D_in, H, D_out = 2, 8, 16, 32, 8

    key = jax.random.PRNGKey(0)
    k_x, k_p = jax.random.split(key)
    x = jax.random.normal(k_x, (B, T, D_in), jnp.float32)
    params = init_params(k_p, D_in, H, D_out)

    try:
        out = jax.block_until_ready(lstm_model_forward(x, params))
    except Exception:
        # Fallback for Pallas builds that reject single-buffered weight specs.
        out = jax.block_until_ready(
            lstm_model_forward(x, params, single_buffer_weights=False))
    assert out.shape == (B, T, D_out), out.shape

    # Tight check against a reference with the kernel's exact precision choices.
    ref_bf16 = _reference_forward(x, params, bf16_matmuls=True)
    assert jnp.allclose(out, ref_bf16, atol=5e-3, rtol=5e-3), \
        float(jnp.max(jnp.abs(out - ref_bf16)))
    # Looser sanity check against the pure-f32 PyTorch-semantics reference.
    ref_f32 = _reference_forward(x, params, bf16_matmuls=False)
    assert jnp.allclose(out, ref_f32, atol=1e-1, rtol=1e-1), \
        float(jnp.max(jnp.abs(out - ref_f32)))

    print("KERNEL_OK")
</pallas_src>

<mosaic_0001>
module attributes {stable_mosaic.version = 11 : i64} {
  func.func @_lstm_recurrence_kernel(%arg0: i32, %arg1: i32, %arg2: memref<8x8x512xbf16, #tpu.memory_space<vmem>>, %arg3: memref<128x512xbf16, #tpu.memory_space<vmem>>, %arg4: memref<1x512xf32, #tpu.memory_space<vmem>>, %arg5: memref<8x8x128xbf16, #tpu.memory_space<vmem>>, %arg6: memref<8x128xf32, #tpu.memory_space<vmem>>, %arg7: memref<8x128xf32, #tpu.memory_space<vmem>>, %arg8: memref<8x8x128xf32, #tpu.memory_space<vmem>>) attributes {dimension_semantics = [#tpu.dimension_semantics<parallel>, #tpu.dimension_semantics<arbitrary>], iteration_bounds = array<i64: 1, 1>, scalar_prefetch = 0 : i64, scratch_operands = 3 : i64, tpu.core_type = #tpu.core_type<tc>, window_params = [{transform_indices = @transform_0, window_bounds = array<i64: 8, 8, 512>}, {pipeline_mode = #tpu.pipeline_mode<synchronous>, transform_indices = @transform_1, window_bounds = array<i64: 128, 512>}, {pipeline_mode = #tpu.pipeline_mode<synchronous>, transform_indices = @transform_2, window_bounds = array<i64: 1, 512>}, {transform_indices = @transform_3, window_bounds = array<i64: 8, 8, 128>}]} {
    %c0_i32 = arith.constant 0 : i32
    %0 = arith.cmpi eq, %arg1, %c0_i32 : i32
    %1 = arith.extui %0 : i1 to i32
    %c0_i32_0 = arith.constant 0 : i32
    %2 = arith.cmpi ne, %1, %c0_i32_0 : i32
    scf.if %2 {
      %cst_122 = arith.constant 0.000000e+00 : f32
      %266 = vector.broadcast %cst_122 : f32 to vector<8x128xf32>
      %c0_123 = arith.constant 0 : index
      %c0_124 = arith.constant 0 : index
      %267 = vector.load %arg6[%c0_123, %c0_124] : memref<8x128xf32, #tpu.memory_space<vmem>>, vector<8x128xf32>
      tpu.vector_store %arg6[%c0_123, %c0_124], %266 {strides = array<i32>} : memref<8x128xf32, #tpu.memory_space<vmem>>, vector<8x128xf32>,
      %cst_125 = arith.constant 0.000000e+00 : f32
      %268 = vector.broadcast %cst_125 : f32 to vector<8x128xf32>
      %c0_126 = arith.constant 0 : index
      %c0_127 = arith.constant 0 : index
      %269 = vector.load %arg7[%c0_126, %c0_127] : memref<8x128xf32, #tpu.memory_space<vmem>>, vector<8x128xf32>
      tpu.vector_store %arg7[%c0_126, %c0_127], %268 {strides = array<i32>} : memref<8x128xf32, #tpu.memory_space<vmem>>, vector<8x128xf32>,
    } else {
    }
    %c0 = arith.constant 0 : index
    %c0_1 = arith.constant 0 : index
    %3 = vector.load %arg3[%c0, %c0_1] : memref<128x512xbf16, #tpu.memory_space<vmem>>, vector<128x512xbf16>
    %c0_2 = arith.constant 0 : index
    %c0_3 = arith.constant 0 : index
    %4 = vector.load %arg4[%c0_2, %c0_3] : memref<1x512xf32, #tpu.memory_space<vmem>>, vector<1x512xf32>
    %5 = vector.shape_cast %4 : vector<1x512xf32> to vector<1x512xf32>
    %6 = vector.broadcast %5 : vector<1x512xf32> to vector<8x512xf32>
    %c0_i32_4 = arith.constant 0 : i32
    %c0_5 = arith.constant 0 : index
    %c0_6 = arith.constant 0 : index
    %7 = vector.load %arg6[%c0_5, %c0_6] : memref<8x128xf32, #tpu.memory_space<vmem>>, vector<8x128xf32>
    %c0_7 = arith.constant 0 : index
    %c0_8 = arith.constant 0 : index
    %8 = vector.load %arg7[%c0_7, %c0_8] : memref<8x128xf32, #tpu.memory_space<vmem>>, vector<8x128xf32>
    %9 = arith.truncf %7 : vector<8x128xf32> to vector<8x128xbf16>
    %cst = arith.constant dense<0.000000e+00> : vector<8x512xf32>
    %10 = tpu.matmul %9, %3, %cst {dimension_numbers = #tpu.dot_dimension_numbers<[1], [0], [0], [1], [0, 0, 1, 1], [], []>} : vector<8x128xbf16>, vector<128x512xbf16>, vector<8x512xf32> -> vector<8x512xf32>
    %11 = arith.index_cast %c0_i32_4 : i32 to index
    %c0_9 = arith.constant 0 : index
    %c0_10 = arith.constant 0 : index
    %12 = vector.load %arg2[%11, %c0_9, %c0_10] : memref<8x8x512xbf16, #tpu.memory_space<vmem>>, vector<1x8x512xbf16>
    %13 = vector.shape_cast %12 : vector<1x8x512xbf16> to vector<8x512xbf16>
    %14 = arith.extf %13 : vector<8x512xbf16> to vector<8x512xf32>
    %15 = arith.addf %10, %14 : vector<8x512xf32>
    %16 = arith.addf %15, %6 : vector<8x512xf32>
    %17 = vector.extract_strided_slice %16 {offsets = [0, 0], sizes = [8, 384], strides = [1, 1]} : vector<8x512xf32> to vector<8x384xf32>
    %18 = arith.negf %17 : vector<8x384xf32>
    %19 = math.exp %18 : vector<8x384xf32>
    %cst_11 = arith.constant 1.000000e+00 : f32
    %20 = vector.broadcast %cst_11 : f32 to vector<8x384xf32>
    %21 = arith.addf %20, %19 : vector<8x384xf32>
    %22 = arith.divf %20, %21 : vector<8x384xf32>
    %23 = vector.extract_strided_slice %16 {offsets = [0, 384], sizes = [8, 128], strides = [1, 1]} : vector<8x512xf32> to vector<8x128xf32>
    %24 = math.tanh %23 : vector<8x128xf32>
    %25 = vector.extract_strided_slice %22 {offsets = [0, 0], sizes = [8, 128], strides = [1, 1]} : vector<8x384xf32> to vector<8x128xf32>
    %26 = vector.extract_strided_slice %22 {offsets = [0, 128], sizes = [8, 128], strides = [1, 1]} : vector<8x384xf32> to vector<8x128xf32>
    %27 = vector.extract_strided_slice %22 {offsets = [0, 256], sizes = [8, 128], strides = [1, 1]} : vector<8x384xf32> to vector<8x128xf32>
    %28 = arith.mulf %26, %8 : vector<8x128xf32>
    %29 = arith.mulf %25, %24 : vector<8x128xf32>
    %30 = arith.addf %28, %29 : vector<8x128xf32>
    %31 = math.tanh %30 : vector<8x128xf32>
    %32 = arith.mulf %27, %31 : vector<8x128xf32>
    %c0_12 = arith.constant 0 : index
    %c0_13 = arith.constant 0 : index
    %33 = vector.load %arg7[%c0_12, %c0_13] : memref<8x128xf32, #tpu.memory_space<vmem>>, vector<8x128xf32>
    tpu.vector_store %arg7[%c0_12, %c0_13], %30 {strides = array<i32>} : memref<8x128xf32, #tpu.memory_space<vmem>>, vector<8x128xf32>,
    %c0_14 = arith.constant 0 : index
    %c0_15 = arith.constant 0 : index
    %34 = vector.load %arg6[%c0_14, %c0_15] : memref<8x128xf32, #tpu.memory_space<vmem>>, vector<8x128xf32>
    tpu.vector_store %arg6[%c0_14, %c0_15], %32 {strides = array<i32>} : memref<8x128xf32, #tpu.memory_space<vmem>>, vector<8x128xf32>,
    %35 = arith.index_cast %c0_i32_4 : i32 to index
    %c0_16 = arith.constant 0 : index
    %c0_17 = arith.constant 0 : index
    %36 = vector.load %arg8[%35, %c0_16, %c0_17] : memref<8x8x128xf32, #tpu.memory_space<vmem>>, vector<1x8x128xf32>
    %37 = vector.shape_cast %36 : vector<1x8x128xf32> to vector<8x128xf32>
    %38 = vector.shape_cast %32 : vector<8x128xf32> to vector<1x8x128xf32>
    tpu.vector_store %arg8[%35, %c0_16, %c0_17], %38 {strides = array<i32>} : memref<8x8x128xf32, #tpu.memory_space<vmem>>, vector<1x8x128xf32>,
    %c1_i32 = arith.constant 1 : i32
    %c0_18 = arith.constant 0 : index
    %c0_19 = arith.constant 0 : index
    %39 = vector.load %arg6[%c0_18, %c0_19] : memref<8x128xf32, #tpu.memory_space<vmem>>, vector<8x128xf32>
    %c0_20 = arith.constant 0 : index
    %c0_21 = arith.constant 0 : index
    %40 = vector.load %arg7[%c0_20, %c0_21] : memref<8x128xf32, #tpu.memory_space<vmem>>, vector<8x128xf32>
    %41 = arith.truncf %39 : vector<8x128xf32> to vector<8x128xbf16>
    %cst_22 = arith.constant dense<0.000000e+00> : vector<8x512xf32>
    %42 = tpu.matmul %41, %3, %cst_22 {dimension_numbers = #tpu.dot_dimension_numbers<[1], [0], [0], [1], [0, 0, 1, 1], [], []>} : vector<8x128xbf16>, vector<128x512xbf16>, vector<8x512xf32> -> vector<8x512xf32>
    %43 = arith.index_cast %c1_i32 : i32 to index
    %c0_23 = arith.constant 0 : index
    %c0_24 = arith.constant 0 : index
    %44 = vector.load %arg2[%43, %c0_23, %c0_24] : memref<8x8x512xbf16, #tpu.memory_space<vmem>>, vector<1x8x512xbf16>
    %45 = vector.shape_cast %44 : vector<1x8x512xbf16> to vector<8x512xbf16>
    %46 = arith.extf %45 : vector<8x512xbf16> to vector<8x512xf32>
    %47 = arith.addf %42, %46 : vector<8x512xf32>
    %48 = arith.addf %47, %6 : vector<8x512xf32>
    %49 = vector.extract_strided_slice %48 {offsets = [0, 0], sizes = [8, 384], strides = [1, 1]} : vector<8x512xf32> to vector<8x384xf32>
    %50 = arith.negf %49 : vector<8x384xf32>
    %51 = math.exp %50 : vector<8x384xf32>
    %cst_25 = arith.constant 1.000000e+00 : f32
    %52 = vector.broadcast %cst_25 : f32 to vector<8x384xf32>
    %53 = arith.addf %52, %51 : vector<8x384xf32>
    %54 = arith.divf %52, %53 : vector<8x384xf32>
    %55 = vector.extract_strided_slice %48 {offsets = [0, 384], sizes = [8, 128], strides = [1, 1]} : vector<8x512xf32> to vector<8x128xf32>
    %56 = math.tanh %55 : vector<8x128xf32>
    %57 = vector.extract_strided_slice %54 {offsets = [0, 0], sizes = [8, 128], strides = [1, 1]} : vector<8x384xf32> to vector<8x128xf32>
    %58 = vector.extract_strided_slice %54 {offsets = [0, 128], sizes = [8, 128], strides = [1, 1]} : vector<8x384xf32> to vector<8x128xf32>
    %59 = vector.extract_strided_slice %54 {offsets = [0, 256], sizes = [8, 128], strides = [1, 1]} : vector<8x384xf32> to vector<8x128xf32>
    %60 = arith.mulf %58, %40 : vector<8x128xf32>
    %61 = arith.mulf %57, %56 : vector<8x128xf32>
    %62 = arith.addf %60, %61 : vector<8x128xf32>
    %63 = math.tanh %62 : vector<8x128xf32>
    %64 = arith.mulf %59, %63 : vector<8x128xf32>
    %c0_26 = arith.constant 0 : index
    %c0_27 = arith.constant 0 : index
    %65 = vector.load %arg7[%c0_26, %c0_27] : memref<8x128xf32, #tpu.memory_space<vmem>>, vector<8x128xf32>
    tpu.vector_store %arg7[%c0_26, %c0_27], %62 {strides = array<i32>} : memref<8x128xf32, #tpu.memory_space<vmem>>, vector<8x128xf32>,
    %c0_28 = arith.constant 0 : index
    %c0_29 = arith.constant 0 : index
    %66 = vector.load %arg6[%c0_28, %c0_29] : memref<8x128xf32, #tpu.memory_space<vmem>>, vector<8x128xf32>
    tpu.vector_store %arg6[%c0_28, %c0_29], %64 {strides = array<i32>} : memref<8x128xf32, #tpu.memory_space<vmem>>, vector<8x128xf32>,
    %67 = arith.index_cast %c1_i32 : i32 to index
    %c0_30 = arith.constant 0 : index
    %c0_31 = arith.constant 0 : index
    %68 = vector.load %arg8[%67, %c0_30, %c0_31] : memref<8x8x128xf32, #tpu.memory_space<vmem>>, vector<1x8x128xf32>
    %69 = vector.shape_cast %68 : vector<1x8x128xf32> to vector<8x128xf32>
    %70 = vector.shape_cast %64 : vector<8x128xf32> to vector<1x8x128xf32>
    tpu.vector_store %arg8[%67, %c0_30, %c0_31], %70 {strides = array<i32>} : memref<8x8x128xf32, #tpu.memory_space<vmem>>, vector<1x8x128xf32>,
    %c2_i32 = arith.constant 2 : i32
    %c0_32 = arith.constant 0 : index
    %c0_33 = arith.constant 0 : index
    %71 = vector.load %arg6[%c0_32, %c0_33] : memref<8x128xf32, #tpu.memory_space<vmem>>, vector<8x128xf32>
    %c0_34 = arith.constant 0 : index
    %c0_35 = arith.constant 0 : index
    %72 = vector.load %arg7[%c0_34, %c0_35] : memref<8x128xf32, #tpu.memory_space<vmem>>, vector<8x128xf32>
    %73 = arith.truncf %71 : vector<8x128xf32> to vector<8x128xbf16>
    %cst_36 = arith.constant dense<0.000000e+00> : vector<8x512xf32>
    %74 = tpu.matmul %73, %3, %cst_36 {dimension_numbers = #tpu.dot_dimension_numbers<[1], [0], [0], [1], [0, 0, 1, 1], [], []>} : vector<8x128xbf16>, vector<128x512xbf16>, vector<8x512xf32> -> vector<8x512xf32>
    %75 = arith.index_cast %c2_i32 : i32 to index
    %c0_37 = arith.constant 0 : index
    %c0_38 = arith.constant 0 : index
    %76 = vector.load %arg2[%75, %c0_37, %c0_38] : memref<8x8x512xbf16, #tpu.memory_space<vmem>>, vector<1x8x512xbf16>
    %77 = vector.shape_cast %76 : vector<1x8x512xbf16> to vector<8x512xbf16>
    %78 = arith.extf %77 : vector<8x512xbf16> to vector<8x512xf32>
    %79 = arith.addf %74, %78 : vector<8x512xf32>
    %80 = arith.addf %79, %6 : vector<8x512xf32>
    %81 = vector.extract_strided_slice %80 {offsets = [0, 0], sizes = [8, 384], strides = [1, 1]} : vector<8x512xf32> to vector<8x384xf32>
    %82 = arith.negf %81 : vector<8x384xf32>
    %83 = math.exp %82 : vector<8x384xf32>
    %cst_39 = arith.constant 1.000000e+00 : f32
    %84 = vector.broadcast %cst_39 : f32 to vector<8x384xf32>
    %85 = arith.addf %84, %83 : vector<8x384xf32>
    %86 = arith.divf %84, %85 : vector<8x384xf32>
    %87 = vector.extract_strided_slice %80 {offsets = [0, 384], sizes = [8, 128], strides = [1, 1]} : vector<8x512xf32> to vector<8x128xf32>
    %88 = math.tanh %87 : vector<8x128xf32>
    %89 = vector.extract_strided_slice %86 {offsets = [0, 0], sizes = [8, 128], strides = [1, 1]} : vector<8x384xf32> to vector<8x128xf32>
    %90 = vector.extract_strided_slice %86 {offsets = [0, 128], sizes = [8, 128], strides = [1, 1]} : vector<8x384xf32> to vector<8x128xf32>
    %91 = vector.extract_strided_slice %86 {offsets = [0, 256], sizes = [8, 128], strides = [1, 1]} : vector<8x384xf32> to vector<8x128xf32>
    %92 = arith.mulf %90, %72 : vector<8x128xf32>
    %93 = arith.mulf %89, %88 : vector<8x128xf32>
    %94 = arith.addf %92, %93 : vector<8x128xf32>
    %95 = math.tanh %94 : vector<8x128xf32>
    %96 = arith.mulf %91, %95 : vector<8x128xf32>
    %c0_40 = arith.constant 0 : index
    %c0_41 = arith.constant 0 : index
    %97 = vector.load %arg7[%c0_40, %c0_41] : memref<8x128xf32, #tpu.memory_space<vmem>>, vector<8x128xf32>
    tpu.vector_store %arg7[%c0_40, %c0_41], %94 {strides = array<i32>} : memref<8x128xf32, #tpu.memory_space<vmem>>, vector<8x128xf32>,
    %c0_42 = arith.constant 0 : index
    %c0_43 = arith.constant 0 : index
    %98 = vector.load %arg6[%c0_42, %c0_43] : memref<8x128xf32, #tpu.memory_space<vmem>>, vector<8x128xf32>
    tpu.vector_store %arg6[%c0_42, %c0_43], %96 {strides = array<i32>} : memref<8x128xf32, #tpu.memory_space<vmem>>, vector<8x128xf32>,
    %99 = arith.index_cast %c2_i32 : i32 to index
    %c0_44 = arith.constant 0 : index
    %c0_45 = arith.constant 0 : index
    %100 = vector.load %arg8[%99, %c0_44, %c0_45] : memref<8x8x128xf32, #tpu.memory_space<vmem>>, vector<1x8x128xf32>
    %101 = vector.shape_cast %100 : vector<1x8x128xf32> to vector<8x128xf32>
    %102 = vector.shape_cast %96 : vector<8x128xf32> to vector<1x8x128xf32>
    tpu.vector_store %arg8[%99, %c0_44, %c0_45], %102 {strides = array<i32>} : memref<8x8x128xf32, #tpu.memory_space<vmem>>, vector<1x8x128xf32>,
    %c3_i32 = arith.constant 3 : i32
    %c0_46 = arith.constant 0 : index
    %c0_47 = arith.constant 0 : index
    %103 = vector.load %arg6[%c0_46, %c0_47] : memref<8x128xf32, #tpu.memory_space<vmem>>, vector<8x128xf32>
    %c0_48 = arith.constant 0 : index
    %c0_49 = arith.constant 0 : index
    %104 = vector.load %arg7[%c0_48, %c0_49] : memref<8x128xf32, #tpu.memory_space<vmem>>, vector<8x128xf32>
    %105 = arith.truncf %103 : vector<8x128xf32> to vector<8x128xbf16>
    %cst_50 = arith.constant dense<0.000000e+00> : vector<8x512xf32>
    %106 = tpu.matmul %105, %3, %cst_50 {dimension_numbers = #tpu.dot_dimension_numbers<[1], [0], [0], [1], [0, 0, 1, 1], [], []>} : vector<8x128xbf16>, vector<128x512xbf16>, vector<8x512xf32> -> vector<8x512xf32>
    %107 = arith.index_cast %c3_i32 : i32 to index
    %c0_51 = arith.constant 0 : index
    %c0_52 = arith.constant 0 : index
    %108 = vector.load %arg2[%107, %c0_51, %c0_52] : memref<8x8x512xbf16, #tpu.memory_space<vmem>>, vector<1x8x512xbf16>
    %109 = vector.shape_cast %108 : vector<1x8x512xbf16> to vector<8x512xbf16>
    %110 = arith.extf %109 : vector<8x512xbf16> to vector<8x512xf32>
    %111 = arith.addf %106, %110 : vector<8x512xf32>
    %112 = arith.addf %111, %6 : vector<8x512xf32>
    %113 = vector.extract_strided_slice %112 {offsets = [0, 0], sizes = [8, 384], strides = [1, 1]} : vector<8x512xf32> to vector<8x384xf32>
    %114 = arith.negf %113 : vector<8x384xf32>
    %115 = math.exp %114 : vector<8x384xf32>
    %cst_53 = arith.constant 1.000000e+00 : f32
    %116 = vector.broadcast %cst_53 : f32 to vector<8x384xf32>
    %117 = arith.addf %116, %115 : vector<8x384xf32>
    %118 = arith.divf %116, %117 : vector<8x384xf32>
    %119 = vector.extract_strided_slice %112 {offsets = [0, 384], sizes = [8, 128], strides = [1, 1]} : vector<8x512xf32> to vector<8x128xf32>
    %120 = math.tanh %119 : vector<8x128xf32>
    %121 = vector.extract_strided_slice %118 {offsets = [0, 0], sizes = [8, 128], strides = [1, 1]} : vector<8x384xf32> to vector<8x128xf32>
    %122 = vector.extract_strided_slice %118 {offsets = [0, 128], sizes = [8, 128], strides = [1, 1]} : vector<8x384xf32> to vector<8x128xf32>
    %123 = vector.extract_strided_slice %118 {offsets = [0, 256], sizes = [8, 128], strides = [1, 1]} : vector<8x384xf32> to vector<8x128xf32>
    %124 = arith.mulf %122, %104 : vector<8x128xf32>
    %125 = arith.mulf %121, %120 : vector<8x128xf32>
    %126 = arith.addf %124, %125 : vector<8x128xf32>
    %127 = math.tanh %126 : vector<8x128xf32>
    %128 = arith.mulf %123, %127 : vector<8x128xf32>
    %c0_54 = arith.constant 0 : index
    %c0_55 = arith.constant 0 : index
    %129 = vector.load %arg7[%c0_54, %c0_55] : memref<8x128xf32, #tpu.memory_space<vmem>>, vector<8x128xf32>
    tpu.vector_store %arg7[%c0_54, %c0_55], %126 {strides = array<i32>} : memref<8x128xf32, #tpu.memory_space<vmem>>, vector<8x128xf32>,
    %c0_56 = arith.constant 0 : index
    %c0_57 = arith.constant 0 : index
    %130 = vector.load %arg6[%c0_56, %c0_57] : memref<8x128xf32, #tpu.memory_space<vmem>>, vector<8x128xf32>
    tpu.vector_store %arg6[%c0_56, %c0_57], %128 {strides = array<i32>} : memref<8x128xf32, #tpu.memory_space<vmem>>, vector<8x128xf32>,
    %131 = arith.index_cast %c3_i32 : i32 to index
    %c0_58 = arith.constant 0 : index
    %c0_59 = arith.constant 0 : index
    %132 = vector.load %arg8[%131, %c0_58, %c0_59] : memref<8x8x128xf32, #tpu.memory_space<vmem>>, vector<1x8x128xf32>
    %133 = vector.shape_cast %132 : vector<1x8x128xf32> to vector<8x128xf32>
    %134 = vector.shape_cast %128 : vector<8x128xf32> to vector<1x8x128xf32>
    tpu.vector_store %arg8[%131, %c0_58, %c0_59], %134 {strides = array<i32>} : memref<8x8x128xf32, #tpu.memory_space<vmem>>, vector<1x8x128xf32>,
    %c4_i32 = arith.constant 4 : i32
    %c0_60 = arith.constant 0 : index
    %c0_61 = arith.constant 0 : index
    %135 = vector.load %arg6[%c0_60, %c0_61] : memref<8x128xf32, #tpu.memory_space<vmem>>, vector<8x128xf32>
    %c0_62 = arith.constant 0 : index
    %c0_63 = arith.constant 0 : index
    %136 = vector.load %arg7[%c0_62, %c0_63] : memref<8x128xf32, #tpu.memory_space<vmem>>, vector<8x128xf32>
    %137 = arith.truncf %135 : vector<8x128xf32> to vector<8x128xbf16>
    %cst_64 = arith.constant dense<0.000000e+00> : vector<8x512xf32>
    %138 = tpu.matmul %137, %3, %cst_64 {dimension_numbers = #tpu.dot_dimension_numbers<[1], [0], [0], [1], [0, 0, 1, 1], [], []>} : vector<8x128xbf16>, vector<128x512xbf16>, vector<8x512xf32> -> vector<8x512xf32>
    %139 = arith.index_cast %c4_i32 : i32 to index
    %c0_65 = arith.constant 0 : index
    %c0_66 = arith.constant 0 : index
    %140 = vector.load %arg2[%139, %c0_65, %c0_66] : memref<8x8x512xbf16, #tpu.memory_space<vmem>>, vector<1x8x512xbf16>
    %141 = vector.shape_cast %140 : vector<1x8x512xbf16> to vector<8x512xbf16>
    %142 = arith.extf %141 : vector<8x512xbf16> to vector<8x512xf32>
    %143 = arith.addf %138, %142 : vector<8x512xf32>
    %144 = arith.addf %143, %6 : vector<8x512xf32>
    %145 = vector.extract_strided_slice %144 {offsets = [0, 0], sizes = [8, 384], strides = [1, 1]} : vector<8x512xf32> to vector<8x384xf32>
    %146 = arith.negf %145 : vector<8x384xf32>
    %147 = math.exp %146 : vector<8x384xf32>
    %cst_67 = arith.constant 1.000000e+00 : f32
    %148 = vector.broadcast %cst_67 : f32 to vector<8x384xf32>
    %149 = arith.addf %148, %147 : vector<8x384xf32>
    %150 = arith.divf %148, %149 : vector<8x384xf32>
    %151 = vector.extract_strided_slice %144 {offsets = [0, 384], sizes = [8, 128], strides = [1, 1]} : vector<8x512xf32> to vector<8x128xf32>
    %152 = math.tanh %151 : vector<8x128xf32>
    %153 = vector.extract_strided_slice %150 {offsets = [0, 0], sizes = [8, 128], strides = [1, 1]} : vector<8x384xf32> to vector<8x128xf32>
    %154 = vector.extract_strided_slice %150 {offsets = [0, 128], sizes = [8, 128], strides = [1, 1]} : vector<8x384xf32> to vector<8x128xf32>
    %155 = vector.extract_strided_slice %150 {offsets = [0, 256], sizes = [8, 128], strides = [1, 1]} : vector<8x384xf32> to vector<8x128xf32>
    %156 = arith.mulf %154, %136 : vector<8x128xf32>
    %157 = arith.mulf %153, %152 : vector<8x128xf32>
    %158 = arith.addf %156, %157 : vector<8x128xf32>
    %159 = math.tanh %158 : vector<8x128xf32>
    %160 = arith.mulf %155, %159 : vector<8x128xf32>
    %c0_68 = arith.constant 0 : index
    %c0_69 = arith.constant 0 : index
    %161 = vector.load %arg7[%c0_68, %c0_69] : memref<8x128xf32, #tpu.memory_space<vmem>>, vector<8x128xf32>
    tpu.vector_store %arg7[%c0_68, %c0_69], %158 {strides = array<i32>} : memref<8x128xf32, #tpu.memory_space<vmem>>, vector<8x128xf32>,
    %c0_70 = arith.constant 0 : index
    %c0_71 = arith.constant 0 : index
    %162 = vector.load %arg6[%c0_70, %c0_71] : memref<8x128xf32, #tpu.memory_space<vmem>>, vector<8x128xf32>
    tpu.vector_store %arg6[%c0_70, %c0_71], %160 {strides = array<i32>} : memref<8x128xf32, #tpu.memory_space<vmem>>, vector<8x128xf32>,
    %163 = arith.index_cast %c4_i32 : i32 to index
    %c0_72 = arith.constant 0 : index
    %c0_73 = arith.constant 0 : index
    %164 = vector.load %arg8[%163, %c0_72, %c0_73] : memref<8x8x128xf32, #tpu.memory_space<vmem>>, vector<1x8x128xf32>
    %165 = vector.shape_cast %164 : vector<1x8x128xf32> to vector<8x128xf32>
    %166 = vector.shape_cast %160 : vector<8x128xf32> to vector<1x8x128xf32>
    tpu.vector_store %arg8[%163, %c0_72, %c0_73], %166 {strides = array<i32>} : memref<8x8x128xf32, #tpu.memory_space<vmem>>, vector<1x8x128xf32>,
    %c5_i32 = arith.constant 5 : i32
    %c0_74 = arith.constant 0 : index
    %c0_75 = arith.constant 0 : index
    %167 = vector.load %arg6[%c0_74, %c0_75] : memref<8x128xf32, #tpu.memory_space<vmem>>, vector<8x128xf32>
    %c0_76 = arith.constant 0 : index
    %c0_77 = arith.constant 0 : index
    %168 = vector.load %arg7[%c0_76, %c0_77] : memref<8x128xf32, #tpu.memory_space<vmem>>, vector<8x128xf32>
    %169 = arith.truncf %167 : vector<8x128xf32> to vector<8x128xbf16>
    %cst_78 = arith.constant dense<0.000000e+00> : vector<8x512xf32>
    %170 = tpu.matmul %169, %3, %cst_78 {dimension_numbers = #tpu.dot_dimension_numbers<[1], [0], [0], [1], [0, 0, 1, 1], [], []>} : vector<8x128xbf16>, vector<128x512xbf16>, vector<8x512xf32> -> vector<8x512xf32>
    %171 = arith.index_cast %c5_i32 : i32 to index
    %c0_79 = arith.constant 0 : index
    %c0_80 = arith.constant 0 : index
    %172 = vector.load %arg2[%171, %c0_79, %c0_80] : memref<8x8x512xbf16, #tpu.memory_space<vmem>>, vector<1x8x512xbf16>
    %173 = vector.shape_cast %172 : vector<1x8x512xbf16> to vector<8x512xbf16>
    %174 = arith.extf %173 : vector<8x512xbf16> to vector<8x512xf32>
    %175 = arith.addf %170, %174 : vector<8x512xf32>
    %176 = arith.addf %175, %6 : vector<8x512xf32>
    %177 = vector.extract_strided_slice %176 {offsets = [0, 0], sizes = [8, 384], strides = [1, 1]} : vector<8x512xf32> to vector<8x384xf32>
    %178 = arith.negf %177 : vector<8x384xf32>
    %179 = math.exp %178 : vector<8x384xf32>
    %cst_81 = arith.constant 1.000000e+00 : f32
    %180 = vector.broadcast %cst_81 : f32 to vector<8x384xf32>
    %181 = arith.addf %180, %179 : vector<8x384xf32>
    %182 = arith.divf %180, %181 : vector<8x384xf32>
    %183 = vector.extract_strided_slice %176 {offsets = [0, 384], sizes = [8, 128], strides = [1, 1]} : vector<8x512xf32> to vector<8x128xf32>
    %184 = math.tanh %183 : vector<8x128xf32>
    %185 = vector.extract_strided_slice %182 {offsets = [0, 0], sizes = [8, 128], strides = [1, 1]} : vector<8x384xf32> to vector<8x128xf32>
    %186 = vector.extract_strided_slice %182 {offsets = [0, 128], sizes = [8, 128], strides = [1, 1]} : vector<8x384xf32> to vector<8x128xf32>
    %187 = vector.extract_strided_slice %182 {offsets = [0, 256], sizes = [8, 128], strides = [1, 1]} : vector<8x384xf32> to vector<8x128xf32>
    %188 = arith.mulf %186, %168 : vector<8x128xf32>
    %189 = arith.mulf %185, %184 : vector<8x128xf32>
    %190 = arith.addf %188, %189 : vector<8x128xf32>
    %191 = math.tanh %190 : vector<8x128xf32>
    %192 = arith.mulf %187, %191 : vector<8x128xf32>
    %c0_82 = arith.constant 0 : index
    %c0_83 = arith.constant 0 : index
    %193 = vector.load %arg7[%c0_82, %c0_83] : memref<8x128xf32, #tpu.memory_space<vmem>>, vector<8x128xf32>
    tpu.vector_store %arg7[%c0_82, %c0_83], %190 {strides = array<i32>} : memref<8x128xf32, #tpu.memory_space<vmem>>, vector<8x128xf32>,
    %c0_84 = arith.constant 0 : index
    %c0_85 = arith.constant 0 : index
    %194 = vector.load %arg6[%c0_84, %c0_85] : memref<8x128xf32, #tpu.memory_space<vmem>>, vector<8x128xf32>
    tpu.vector_store %arg6[%c0_84, %c0_85], %192 {strides = array<i32>} : memref<8x128xf32, #tpu.memory_space<vmem>>, vector<8x128xf32>,
    %195 = arith.index_cast %c5_i32 : i32 to index
    %c0_86 = arith.constant 0 : index
    %c0_87 = arith.constant 0 : index
    %196 = vector.load %arg8[%195, %c0_86, %c0_87] : memref<8x8x128xf32, #tpu.memory_space<vmem>>, vector<1x8x128xf32>
    %197 = vector.shape_cast %196 : vector<1x8x128xf32> to vector<8x128xf32>
    %198 = vector.shape_cast %192 : vector<8x128xf32> to vector<1x8x128xf32>
    tpu.vector_store %arg8[%195, %c0_86, %c0_87], %198 {strides = array<i32>} : memref<8x8x128xf32, #tpu.memory_space<vmem>>, vector<1x8x128xf32>,
    %c6_i32 = arith.constant 6 : i32
    %c0_88 = arith.constant 0 : index
    %c0_89 = arith.constant 0 : index
    %199 = vector.load %arg6[%c0_88, %c0_89] : memref<8x128xf32, #tpu.memory_space<vmem>>, vector<8x128xf32>
    %c0_90 = arith.constant 0 : index
    %c0_91 = arith.constant 0 : index
    %200 = vector.load %arg7[%c0_90, %c0_91] : memref<8x128xf32, #tpu.memory_space<vmem>>, vector<8x128xf32>
    %201 = arith.truncf %199 : vector<8x128xf32> to vector<8x128xbf16>
    %cst_92 = arith.constant dense<0.000000e+00> : vector<8x512xf32>
    %202 = tpu.matmul %201, %3, %cst_92 {dimension_numbers = #tpu.dot_dimension_numbers<[1], [0], [0], [1], [0, 0, 1, 1], [], []>} : vector<8x128xbf16>, vector<128x512xbf16>, vector<8x512xf32> -> vector<8x512xf32>
    %203 = arith.index_cast %c6_i32 : i32 to index
    %c0_93 = arith.constant 0 : index
    %c0_94 = arith.constant 0 : index
    %204 = vector.load %arg2[%203, %c0_93, %c0_94] : memref<8x8x512xbf16, #tpu.memory_space<vmem>>, vector<1x8x512xbf16>
    %205 = vector.shape_cast %204 : vector<1x8x512xbf16> to vector<8x512xbf16>
    %206 = arith.extf %205 : vector<8x512xbf16> to vector<8x512xf32>
    %207 = arith.addf %202, %206 : vector<8x512xf32>
    %208 = arith.addf %207, %6 : vector<8x512xf32>
    %209 = vector.extract_strided_slice %208 {offsets = [0, 0], sizes = [8, 384], strides = [1, 1]} : vector<8x512xf32> to vector<8x384xf32>
    %210 = arith.negf %209 : vector<8x384xf32>
    %211 = math.exp %210 : vector<8x384xf32>
    %cst_95 = arith.constant 1.000000e+00 : f32
    %212 = vector.broadcast %cst_95 : f32 to vector<8x384xf32>
    %213 = arith.addf %212, %211 : vector<8x384xf32>
    %214 = arith.divf %212, %213 : vector<8x384xf32>
    %215 = vector.extract_strided_slice %208 {offsets = [0, 384], sizes = [8, 128], strides = [1, 1]} : vector<8x512xf32> to vector<8x128xf32>
    %216 = math.tanh %215 : vector<8x128xf32>
    %217 = vector.extract_strided_slice %214 {offsets = [0, 0], sizes = [8, 128], strides = [1, 1]} : vector<8x384xf32> to vector<8x128xf32>
    %218 = vector.extract_strided_slice %214 {offsets = [0, 128], sizes = [8, 128], strides = [1, 1]} : vector<8x384xf32> to vector<8x128xf32>
    %219 = vector.extract_strided_slice %214 {offsets = [0, 256], sizes = [8, 128], strides = [1, 1]} : vector<8x384xf32> to vector<8x128xf32>
    %220 = arith.mulf %218, %200 : vector<8x128xf32>
    %221 = arith.mulf %217, %216 : vector<8x128xf32>
    %222 = arith.addf %220, %221 : vector<8x128xf32>
    %223 = math.tanh %222 : vector<8x128xf32>
    %224 = arith.mulf %219, %223 : vector<8x128xf32>
    %c0_96 = arith.constant 0 : index
    %c0_97 = arith.constant 0 : index
    %225 = vector.load %arg7[%c0_96, %c0_97] : memref<8x128xf32, #tpu.memory_space<vmem>>, vector<8x128xf32>
    tpu.vector_store %arg7[%c0_96, %c0_97], %222 {strides = array<i32>} : memref<8x128xf32, #tpu.memory_space<vmem>>, vector<8x128xf32>,
    %c0_98 = arith.constant 0 : index
    %c0_99 = arith.constant 0 : index
    %226 = vector.load %arg6[%c0_98, %c0_99] : memref<8x128xf32, #tpu.memory_space<vmem>>, vector<8x128xf32>
    tpu.vector_store %arg6[%c0_98, %c0_99], %224 {strides = array<i32>} : memref<8x128xf32, #tpu.memory_space<vmem>>, vector<8x128xf32>,
    %227 = arith.index_cast %c6_i32 : i32 to index
    %c0_100 = arith.constant 0 : index
    %c0_101 = arith.constant 0 : index
    %228 = vector.load %arg8[%227, %c0_100, %c0_101] : memref<8x8x128xf32, #tpu.memory_space<vmem>>, vector<1x8x128xf32>
    %229 = vector.shape_cast %228 : vector<1x8x128xf32> to vector<8x128xf32>
    %230 = vector.shape_cast %224 : vector<8x128xf32> to vector<1x8x128xf32>
    tpu.vector_store %arg8[%227, %c0_100, %c0_101], %230 {strides = array<i32>} : memref<8x8x128xf32, #tpu.memory_space<vmem>>, vector<1x8x128xf32>,
    %c7_i32 = arith.constant 7 : i32
    %c0_102 = arith.constant 0 : index
    %c0_103 = arith.constant 0 : index
    %231 = vector.load %arg6[%c0_102, %c0_103] : memref<8x128xf32, #tpu.memory_space<vmem>>, vector<8x128xf32>
    %c0_104 = arith.constant 0 : index
    %c0_105 = arith.constant 0 : index
    %232 = vector.load %arg7[%c0_104, %c0_105] : memref<8x128xf32, #tpu.memory_space<vmem>>, vector<8x128xf32>
    %233 = arith.truncf %231 : vector<8x128xf32> to vector<8x128xbf16>
    %cst_106 = arith.constant dense<0.000000e+00> : vector<8x512xf32>
    %234 = tpu.matmul %233, %3, %cst_106 {dimension_numbers = #tpu.dot_dimension_numbers<[1], [0], [0], [1], [0, 0, 1, 1], [], []>} : vector<8x128xbf16>, vector<128x512xbf16>, vector<8x512xf32> -> vector<8x512xf32>
    %235 = arith.index_cast %c7_i32 : i32 to index
    %c0_107 = arith.constant 0 : index
    %c0_108 = arith.constant 0 : index
    %236 = vector.load %arg2[%235, %c0_107, %c0_108] : memref<8x8x512xbf16, #tpu.memory_space<vmem>>, vector<1x8x512xbf16>
    %237 = vector.shape_cast %236 : vector<1x8x512xbf16> to vector<8x512xbf16>
    %238 = arith.extf %237 : vector<8x512xbf16> to vector<8x512xf32>
    %239 = arith.addf %234, %238 : vector<8x512xf32>
    %240 = arith.addf %239, %6 : vector<8x512xf32>
    %241 = vector.extract_strided_slice %240 {offsets = [0, 0], sizes = [8, 384], strides = [1, 1]} : vector<8x512xf32> to vector<8x384xf32>
    %242 = arith.negf %241 : vector<8x384xf32>
    %243 = math.exp %242 : vector<8x384xf32>
    %cst_109 = arith.constant 1.000000e+00 : f32
    %244 = vector.broadcast %cst_109 : f32 to vector<8x384xf32>
    %245 = arith.addf %244, %243 : vector<8x384xf32>
    %246 = arith.divf %244, %245 : vector<8x384xf32>
    %247 = vector.extract_strided_slice %240 {offsets = [0, 384], sizes = [8, 128], strides = [1, 1]} : vector<8x512xf32> to vector<8x128xf32>
    %248 = math.tanh %247 : vector<8x128xf32>
    %249 = vector.extract_strided_slice %246 {offsets = [0, 0], sizes = [8, 128], strides = [1, 1]} : vector<8x384xf32> to vector<8x128xf32>
    %250 = vector.extract_strided_slice %246 {offsets = [0, 128], sizes = [8, 128], strides = [1, 1]} : vector<8x384xf32> to vector<8x128xf32>
    %251 = vector.extract_strided_slice %246 {offsets = [0, 256], sizes = [8, 128], strides = [1, 1]} : vector<8x384xf32> to vector<8x128xf32>
    %252 = arith.mulf %250, %232 : vector<8x128xf32>
    %253 = arith.mulf %249, %248 : vector<8x128xf32>
    %254 = arith.addf %252, %253 : vector<8x128xf32>
    %255 = math.tanh %254 : vector<8x128xf32>
    %256 = arith.mulf %251, %255 : vector<8x128xf32>
    %c0_110 = arith.constant 0 : index
    %c0_111 = arith.constant 0 : index
    %257 = vector.load %arg7[%c0_110, %c0_111] : memref<8x128xf32, #tpu.memory_space<vmem>>, vector<8x128xf32>
    tpu.vector_store %arg7[%c0_110, %c0_111], %254 {strides = array<i32>} : memref<8x128xf32, #tpu.memory_space<vmem>>, vector<8x128xf32>,
    %c0_112 = arith.constant 0 : index
    %c0_113 = arith.constant 0 : index
    %258 = vector.load %arg6[%c0_112, %c0_113] : memref<8x128xf32, #tpu.memory_space<vmem>>, vector<8x128xf32>
    tpu.vector_store %arg6[%c0_112, %c0_113], %256 {strides = array<i32>} : memref<8x128xf32, #tpu.memory_space<vmem>>, vector<8x128xf32>,
    %259 = arith.index_cast %c7_i32 : i32 to index
    %c0_114 = arith.constant 0 : index
    %c0_115 = arith.constant 0 : index
    %260 = vector.load %arg8[%259, %c0_114, %c0_115] : memref<8x8x128xf32, #tpu.memory_space<vmem>>, vector<1x8x128xf32>
    %261 = vector.shape_cast %260 : vector<1x8x128xf32> to vector<8x128xf32>
    %262 = vector.shape_cast %256 : vector<8x128xf32> to vector<1x8x128xf32>
    tpu.vector_store %arg8[%259, %c0_114, %c0_115], %262 {strides = array<i32>} : memref<8x8x128xf32, #tpu.memory_space<vmem>>, vector<1x8x128xf32>,
    %c8_i32 = arith.constant 8 : i32
    %c0_116 = arith.constant 0 : index
    %c0_117 = arith.constant 0 : index
    %c0_118 = arith.constant 0 : index
    %263 = vector.load %arg8[%c0_116, %c0_117, %c0_118] : memref<8x8x128xf32, #tpu.memory_space<vmem>>, vector<8x8x128xf32>
    %264 = arith.truncf %263 : vector<8x8x128xf32> to vector<8x8x128xbf16>
    %c0_119 = arith.constant 0 : index
    %c0_120 = arith.constant 0 : index
    %c0_121 = arith.constant 0 : index
    %265 = vector.load %arg5[%c0_119, %c0_120, %c0_121] : memref<8x8x128xbf16, #tpu.memory_space<vmem>>, vector<8x8x128xbf16>
    tpu.vector_store %arg5[%c0_119, %c0_120, %c0_121], %264 {strides = array<i32>} : memref<8x8x128xbf16, #tpu.memory_space<vmem>>, vector<8x8x128xbf16>,
    return
  }
  func.func @transform_0(%arg0: i32, %arg1: i32) -> (i32, i32, i32) {
    %c0_i32 = arith.constant 0 : i32
    %c0_i32_0 = arith.constant 0 : i32
    return %arg1, %arg0, %c0_i32 : i32, i32, i32
  }
  func.func @transform_1(%arg0: i32, %arg1: i32) -> (i32, i32) {
    %c0_i32 = arith.constant 0 : i32
    %c0_i32_0 = arith.constant 0 : i32
    %c0_i32_1 = arith.constant 0 : i32
    return %c0_i32, %c0_i32_0 : i32, i32
  }
  func.func @transform_2(%arg0: i32, %arg1: i32) -> (i32, i32) {
    %c0_i32 = arith.constant 0 : i32
    %c0_i32_0 = arith.constant 0 : i32
    %c0_i32_1 = arith.constant 0 : i32
    return %c0_i32, %c0_i32_0 : i32, i32
  }
  func.func @transform_3(%arg0: i32, %arg1: i32) -> (i32, i32, i32) {
    %c0_i32 = arith.constant 0 : i32
    %c0_i32_0 = arith.constant 0 : i32
    return %arg1, %arg0, %c0_i32 : i32, i32, i32
  }
}

module attributes {stable_mosaic.version = 11 : i64} {
  func.func @_mlp_head_kernel(%arg0: i32, %arg1: memref<64x128xbf16, #tpu.memory_space<vmem>>, %arg2: memref<128x128xbf16, #tpu.memory_space<vmem>>, %arg3: memref<1x128xf32, #tpu.memory_space<vmem>>, %arg4: memref<128x128xbf16, #tpu.memory_space<vmem>>, %arg5: memref<1x128xf32, #tpu.memory_space<vmem>>, %arg6: memref<64x128xf32, #tpu.memory_space<vmem>>) attributes {dimension_semantics = [#tpu.dimension_semantics<parallel>], iteration_bounds = array<i64: 1>, scalar_prefetch = 0 : i64, scratch_operands = 0 : i64, tpu.core_type = #tpu.core_type<tc>, window_params = [{transform_indices = @transform_0, window_bounds = array<i64: 64, 128>}, {pipeline_mode = #tpu.pipeline_mode<synchronous>, transform_indices = @transform_1, window_bounds = array<i64: 128, 128>}, {pipeline_mode = #tpu.pipeline_mode<synchronous>, transform_indices = @transform_2, window_bounds = array<i64: 1, 128>}, {pipeline_mode = #tpu.pipeline_mode<synchronous>, transform_indices = @transform_3, window_bounds = array<i64: 128, 128>}, {pipeline_mode = #tpu.pipeline_mode<synchronous>, transform_indices = @transform_4, window_bounds = array<i64: 1, 128>}, {transform_indices = @transform_5, window_bounds = array<i64: 64, 128>}]} {
    %c0 = arith.constant 0 : index
    %c0_0 = arith.constant 0 : index
    %0 = vector.load %arg1[%c0, %c0_0] : memref<64x128xbf16, #tpu.memory_space<vmem>>, vector<64x128xbf16>
    %c0_1 = arith.constant 0 : index
    %c0_2 = arith.constant 0 : index
    %1 = vector.load %arg2[%c0_1, %c0_2] : memref<128x128xbf16, #tpu.memory_space<vmem>>, vector<128x128xbf16>
    %cst = arith.constant dense<0.000000e+00> : vector<64x128xf32>
    %2 = tpu.matmul %0, %1, %cst {dimension_numbers = #tpu.dot_dimension_numbers<[1], [0], [0], [1], [0, 0, 1, 1], [], []>} : vector<64x128xbf16>, vector<128x128xbf16>, vector<64x128xf32> -> vector<64x128xf32>
    %c0_3 = arith.constant 0 : index
    %c0_4 = arith.constant 0 : index
    %3 = vector.load %arg3[%c0_3, %c0_4] : memref<1x128xf32, #tpu.memory_space<vmem>>, vector<1x128xf32>
    %4 = vector.broadcast %3 : vector<1x128xf32> to vector<64x128xf32>
    %5 = arith.addf %2, %4 : vector<64x128xf32>
    %cst_5 = arith.constant 0.000000e+00 : f32
    %6 = vector.broadcast %cst_5 : f32 to vector<64x128xf32>
    %7 = arith.maximumf %5, %6 : vector<64x128xf32>
    %8 = arith.truncf %7 : vector<64x128xf32> to vector<64x128xbf16>
    %c0_6 = arith.constant 0 : index
    %c0_7 = arith.constant 0 : index
    %9 = vector.load %arg4[%c0_6, %c0_7] : memref<128x128xbf16, #tpu.memory_space<vmem>>, vector<128x128xbf16>
    %cst_8 = arith.constant dense<0.000000e+00> : vector<64x128xf32>
    %10 = tpu.matmul %8, %9, %cst_8 {dimension_numbers = #tpu.dot_dimension_numbers<[1], [0], [0], [1], [0, 0, 1, 1], [], []>} : vector<64x128xbf16>, vector<128x128xbf16>, vector<64x128xf32> -> vector<64x128xf32>
    %c0_9 = arith.constant 0 : index
    %c0_10 = arith.constant 0 : index
    %11 = vector.load %arg5[%c0_9, %c0_10] : memref<1x128xf32, #tpu.memory_space<vmem>>, vector<1x128xf32>
    %12 = vector.broadcast %11 : vector<1x128xf32> to vector<64x128xf32>
    %13 = arith.addf %10, %12 : vector<64x128xf32>
    %c0_11 = arith.constant 0 : index
    %c0_12 = arith.constant 0 : index
    %14 = vector.load %arg6[%c0_11, %c0_12] : memref<64x128xf32, #tpu.memory_space<vmem>>, vector<64x128xf32>
    tpu.vector_store %arg6[%c0_11, %c0_12], %13 {strides = array<i32>} : memref<64x128xf32, #tpu.memory_space<vmem>>, vector<64x128xf32>,
    return
  }
  func.func @transform_0(%arg0: i32) -> (i32, i32) {
    %c0_i32 = arith.constant 0 : i32
    %c0_i32_0 = arith.constant 0 : i32
    return %arg0, %c0_i32 : i32, i32
  }
  func.func @transform_1(%arg0: i32) -> (i32, i32) {
    %c0_i32 = arith.constant 0 : i32
    %c0_i32_0 = arith.constant 0 : i32
    %c0_i32_1 = arith.constant 0 : i32
    return %c0_i32, %c0_i32_0 : i32, i32
  }
  func.func @transform_2(%arg0: i32) -> (i32, i32) {
    %c0_i32 = arith.constant 0 : i32
    %c0_i32_0 = arith.constant 0 : i32
    %c0_i32_1 = arith.constant 0 : i32
    return %c0_i32, %c0_i32_0 : i32, i32
  }
  func.func @transform_3(%arg0: i32) -> (i32, i32) {
    %c0_i32 = arith.constant 0 : i32
    %c0_i32_0 = arith.constant 0 : i32
    %c0_i32_1 = arith.constant 0 : i32
    return %c0_i32, %c0_i32_0 : i32, i32
  }
  func.func @transform_4(%arg0: i32) -> (i32, i32) {
    %c0_i32 = arith.constant 0 : i32
    %c0_i32_0 = arith.constant 0 : i32
    %c0_i32_1 = arith.constant 0 : i32
    return %c0_i32, %c0_i32_0 : i32, i32
  }
  func.func @transform_5(%arg0: i32) -> (i32, i32) {
    %c0_i32 = arith.constant 0 : i32
    %c0_i32_0 = arith.constant 0 : i32
    return %arg0, %c0_i32 : i32, i32
  }
}

module attributes {stable_mosaic.version = 11 : i64} {
  func.func @_lstm_recurrence_kernel(%arg0: i32, %arg1: i32, %arg2: memref<8x8x512xbf16, #tpu.memory_space<vmem>>, %arg3: memref<128x512xbf16, #tpu.memory_space<vmem>>, %arg4: memref<1x512xf32, #tpu.memory_space<vmem>>, %arg5: memref<8x8x128xbf16, #tpu.memory_space<vmem>>, %arg6: memref<8x128xf32, #tpu.memory_space<vmem>>, %arg7: memref<8x128xf32, #tpu.memory_space<vmem>>, %arg8: memref<8x8x128xf32, #tpu.memory_space<vmem>>) attributes {dimension_semantics = [#tpu.dimension_semantics<parallel>, #tpu.dimension_semantics<arbitrary>], iteration_bounds = array<i64: 1, 1>, scalar_prefetch = 0 : i64, scratch_operands = 3 : i64, tpu.core_type = #tpu.core_type<tc>, window_params = [{transform_indices = @transform_0, window_bounds = array<i64: 8, 8, 512>}, {pipeline_mode = #tpu.pipeline_mode<synchronous>, transform_indices = @transform_1, window_bounds = array<i64: 128, 512>}, {pipeline_mode = #tpu.pipeline_mode<synchronous>, transform_indices = @transform_2, window_bounds = array<i64: 1, 512>}, {transform_indices = @transform_3, window_bounds = array<i64: 8, 8, 128>}]} {
    %c0_i32 = arith.constant 0 : i32
    %0 = arith.cmpi eq, %arg1, %c0_i32 : i32
    %1 = arith.extui %0 : i1 to i32
    %c0_i32_0 = arith.constant 0 : i32
    %2 = arith.cmpi ne, %1, %c0_i32_0 : i32
    scf.if %2 {
      %cst_122 = arith.constant 0.000000e+00 : f32
      %266 = vector.broadcast %cst_122 : f32 to vector<8x128xf32>
      %c0_123 = arith.constant 0 : index
      %c0_124 = arith.constant 0 : index
      %267 = vector.load %arg6[%c0_123, %c0_124] : memref<8x128xf32, #tpu.memory_space<vmem>>, vector<8x128xf32>
      tpu.vector_store %arg6[%c0_123, %c0_124], %266 {strides = array<i32>} : memref<8x128xf32, #tpu.memory_space<vmem>>, vector<8x128xf32>,
      %cst_125 = arith.constant 0.000000e+00 : f32
      %268 = vector.broadcast %cst_125 : f32 to vector<8x128xf32>
      %c0_126 = arith.constant 0 : index
      %c0_127 = arith.constant 0 : index
      %269 = vector.load %arg7[%c0_126, %c0_127] : memref<8x128xf32, #tpu.memory_space<vmem>>, vector<8x128xf32>
      tpu.vector_store %arg7[%c0_126, %c0_127], %268 {strides = array<i32>} : memref<8x128xf32, #tpu.memory_space<vmem>>, vector<8x128xf32>,
    } else {
    }
    %c0 = arith.constant 0 : index
    %c0_1 = arith.constant 0 : index
    %3 = vector.load %arg3[%c0, %c0_1] : memref<128x512xbf16, #tpu.memory_space<vmem>>, vector<128x512xbf16>
    %c0_2 = arith.constant 0 : index
    %c0_3 = arith.constant 0 : index
    %4 = vector.load %arg4[%c0_2, %c0_3] : memref<1x512xf32, #tpu.memory_space<vmem>>, vector<1x512xf32>
    %5 = vector.shape_cast %4 : vector<1x512xf32> to vector<1x512xf32>
    %6 = vector.broadcast %5 : vector<1x512xf32> to vector<8x512xf32>
    %c0_i32_4 = arith.constant 0 : i32
    %c0_5 = arith.constant 0 : index
    %c0_6 = arith.constant 0 : index
    %7 = vector.load %arg6[%c0_5, %c0_6] : memref<8x128xf32, #tpu.memory_space<vmem>>, vector<8x128xf32>
    %c0_7 = arith.constant 0 : index
    %c0_8 = arith.constant 0 : index
    %8 = vector.load %arg7[%c0_7, %c0_8] : memref<8x128xf32, #tpu.memory_space<vmem>>, vector<8x128xf32>
    %9 = arith.truncf %7 : vector<8x128xf32> to vector<8x128xbf16>
    %cst = arith.constant dense<0.000000e+00> : vector<8x512xf32>
    %10 = tpu.matmul %9, %3, %cst {dimension_numbers = #tpu.dot_dimension_numbers<[1], [0], [0], [1], [0, 0, 1, 1], [], []>} : vector<8x128xbf16>, vector<128x512xbf16>, vector<8x512xf32> -> vector<8x512xf32>
    %11 = arith.index_cast %c0_i32_4 : i32 to index
    %c0_9 = arith.constant 0 : index
    %c0_10 = arith.constant 0 : index
    %12 = vector.load %arg2[%11, %c0_9, %c0_10] : memref<8x8x512xbf16, #tpu.memory_space<vmem>>, vector<1x8x512xbf16>
    %13 = vector.shape_cast %12 : vector<1x8x512xbf16> to vector<8x512xbf16>
    %14 = arith.extf %13 : vector<8x512xbf16> to vector<8x512xf32>
    %15 = arith.addf %10, %14 : vector<8x512xf32>
    %16 = arith.addf %15, %6 : vector<8x512xf32>
    %17 = vector.extract_strided_slice %16 {offsets = [0, 0], sizes = [8, 384], strides = [1, 1]} : vector<8x512xf32> to vector<8x384xf32>
    %18 = arith.negf %17 : vector<8x384xf32>
    %19 = math.exp %18 : vector<8x384xf32>
    %cst_11 = arith.constant 1.000000e+00 : f32
    %20 = vector.broadcast %cst_11 : f32 to vector<8x384xf32>
    %21 = arith.addf %20, %19 : vector<8x384xf32>
    %22 = arith.divf %20, %21 : vector<8x384xf32>
    %23 = vector.extract_strided_slice %16 {offsets = [0, 384], sizes = [8, 128], strides = [1, 1]} : vector<8x512xf32> to vector<8x128xf32>
    %24 = math.tanh %23 : vector<8x128xf32>
    %25 = vector.extract_strided_slice %22 {offsets = [0, 0], sizes = [8, 128], strides = [1, 1]} : vector<8x384xf32> to vector<8x128xf32>
    %26 = vector.extract_strided_slice %22 {offsets = [0, 128], sizes = [8, 128], strides = [1, 1]} : vector<8x384xf32> to vector<8x128xf32>
    %27 = vector.extract_strided_slice %22 {offsets = [0, 256], sizes = [8, 128], strides = [1, 1]} : vector<8x384xf32> to vector<8x128xf32>
    %28 = arith.mulf %26, %8 : vector<8x128xf32>
    %29 = arith.mulf %25, %24 : vector<8x128xf32>
    %30 = arith.addf %28, %29 : vector<8x128xf32>
    %31 = math.tanh %30 : vector<8x128xf32>
    %32 = arith.mulf %27, %31 : vector<8x128xf32>
    %c0_12 = arith.constant 0 : index
    %c0_13 = arith.constant 0 : index
    %33 = vector.load %arg7[%c0_12, %c0_13] : memref<8x128xf32, #tpu.memory_space<vmem>>, vector<8x128xf32>
    tpu.vector_store %arg7[%c0_12, %c0_13], %30 {strides = array<i32>} : memref<8x128xf32, #tpu.memory_space<vmem>>, vector<8x128xf32>,
    %c0_14 = arith.constant 0 : index
    %c0_15 = arith.constant 0 : index
    %34 = vector.load %arg6[%c0_14, %c0_15] : memref<8x128xf32, #tpu.memory_space<vmem>>, vector<8x128xf32>
    tpu.vector_store %arg6[%c0_14, %c0_15], %32 {strides = array<i32>} : memref<8x128xf32, #tpu.memory_space<vmem>>, vector<8x128xf32>,
    %35 = arith.index_cast %c0_i32_4 : i32 to index
    %c0_16 = arith.constant 0 : index
    %c0_17 = arith.constant 0 : index
    %36 = vector.load %arg8[%35, %c0_16, %c0_17] : memref<8x8x128xf32, #tpu.memory_space<vmem>>, vector<1x8x128xf32>
    %37 = vector.shape_cast %36 : vector<1x8x128xf32> to vector<8x128xf32>
    %38 = vector.shape_cast %32 : vector<8x128xf32> to vector<1x8x128xf32>
    tpu.vector_store %arg8[%35, %c0_16, %c0_17], %38 {strides = array<i32>} : memref<8x8x128xf32, #tpu.memory_space<vmem>>, vector<1x8x128xf32>,
    %c1_i32 = arith.constant 1 : i32
    %c0_18 = arith.constant 0 : index
    %c0_19 = arith.constant 0 : index
    %39 = vector.load %arg6[%c0_18, %c0_19] : memref<8x128xf32, #tpu.memory_space<vmem>>, vector<8x128xf32>
    %c0_20 = arith.constant 0 : index
    %c0_21 = arith.constant 0 : index
    %40 = vector.load %arg7[%c0_20, %c0_21] : memref<8x128xf32, #tpu.memory_space<vmem>>, vector<8x128xf32>
    %41 = arith.truncf %39 : vector<8x128xf32> to vector<8x128xbf16>
    %cst_22 = arith.constant dense<0.000000e+00> : vector<8x512xf32>
    %42 = tpu.matmul %41, %3, %cst_22 {dimension_numbers = #tpu.dot_dimension_numbers<[1], [0], [0], [1], [0, 0, 1, 1], [], []>} : vector<8x128xbf16>, vector<128x512xbf16>, vector<8x512xf32> -> vector<8x512xf32>
    %43 = arith.index_cast %c1_i32 : i32 to index
    %c0_23 = arith.constant 0 : index
    %c0_24 = arith.constant 0 : index
    %44 = vector.load %arg2[%43, %c0_23, %c0_24] : memref<8x8x512xbf16, #tpu.memory_space<vmem>>, vector<1x8x512xbf16>
    %45 = vector.shape_cast %44 : vector<1x8x512xbf16> to vector<8x512xbf16>
    %46 = arith.extf %45 : vector<8x512xbf16> to vector<8x512xf32>
    %47 = arith.addf %42, %46 : vector<8x512xf32>
    %48 = arith.addf %47, %6 : vector<8x512xf32>
    %49 = vector.extract_strided_slice %48 {offsets = [0, 0], sizes = [8, 384], strides = [1, 1]} : vector<8x512xf32> to vector<8x384xf32>
    %50 = arith.negf %49 : vector<8x384xf32>
    %51 = math.exp %50 : vector<8x384xf32>
    %cst_25 = arith.constant 1.000000e+00 : f32
    %52 = vector.broadcast %cst_25 : f32 to vector<8x384xf32>
    %53 = arith.addf %52, %51 : vector<8x384xf32>
    %54 = arith.divf %52, %53 : vector<8x384xf32>
    %55 = vector.extract_strided_slice %48 {offsets = [0, 384], sizes = [8, 128], strides = [1, 1]} : vector<8x512xf32> to vector<8x128xf32>
    %56 = math.tanh %55 : vector<8x128xf32>
    %57 = vector.extract_strided_slice %54 {offsets = [0, 0], sizes = [8, 128], strides = [1, 1]} : vector<8x384xf32> to vector<8x128xf32>
    %58 = vector.extract_strided_slice %54 {offsets = [0, 128], sizes = [8, 128], strides = [1, 1]} : vector<8x384xf32> to vector<8x128xf32>
    %59 = vector.extract_strided_slice %54 {offsets = [0, 256], sizes = [8, 128], strides = [1, 1]} : vector<8x384xf32> to vector<8x128xf32>
    %60 = arith.mulf %58, %40 : vector<8x128xf32>
    %61 = arith.mulf %57, %56 : vector<8x128xf32>
    %62 = arith.addf %60, %61 : vector<8x128xf32>
    %63 = math.tanh %62 : vector<8x128xf32>
    %64 = arith.mulf %59, %63 : vector<8x128xf32>
    %c0_26 = arith.constant 0 : index
    %c0_27 = arith.constant 0 : index
    %65 = vector.load %arg7[%c0_26, %c0_27] : memref<8x128xf32, #tpu.memory_space<vmem>>, vector<8x128xf32>
    tpu.vector_store %arg7[%c0_26, %c0_27], %62 {strides = array<i32>} : memref<8x128xf32, #tpu.memory_space<vmem>>, vector<8x128xf32>,
    %c0_28 = arith.constant 0 : index
    %c0_29 = arith.constant 0 : index
    %66 = vector.load %arg6[%c0_28, %c0_29] : memref<8x128xf32, #tpu.memory_space<vmem>>, vector<8x128xf32>
    tpu.vector_store %arg6[%c0_28, %c0_29], %64 {strides = array<i32>} : memref<8x128xf32, #tpu.memory_space<vmem>>, vector<8x128xf32>,
    %67 = arith.index_cast %c1_i32 : i32 to index
    %c0_30 = arith.constant 0 : index
    %c0_31 = arith.constant 0 : index
    %68 = vector.load %arg8[%67, %c0_30, %c0_31] : memref<8x8x128xf32, #tpu.memory_space<vmem>>, vector<1x8x128xf32>
    %69 = vector.shape_cast %68 : vector<1x8x128xf32> to vector<8x128xf32>
    %70 = vector.shape_cast %64 : vector<8x128xf32> to vector<1x8x128xf32>
    tpu.vector_store %arg8[%67, %c0_30, %c0_31], %70 {strides = array<i32>} : memref<8x8x128xf32, #tpu.memory_space<vmem>>, vector<1x8x128xf32>,
    %c2_i32 = arith.constant 2 : i32
    %c0_32 = arith.constant 0 : index
    %c0_33 = arith.constant 0 : index
    %71 = vector.load %arg6[%c0_32, %c0_33] : memref<8x128xf32, #tpu.memory_space<vmem>>, vector<8x128xf32>
    %c0_34 = arith.constant 0 : index
    %c0_35 = arith.constant 0 : index
    %72 = vector.load %arg7[%c0_34, %c0_35] : memref<8x128xf32, #tpu.memory_space<vmem>>, vector<8x128xf32>
    %73 = arith.truncf %71 : vector<8x128xf32> to vector<8x128xbf16>
    %cst_36 = arith.constant dense<0.000000e+00> : vector<8x512xf32>
    %74 = tpu.matmul %73, %3, %cst_36 {dimension_numbers = #tpu.dot_dimension_numbers<[1], [0], [0], [1], [0, 0, 1, 1], [], []>} : vector<8x128xbf16>, vector<128x512xbf16>, vector<8x512xf32> -> vector<8x512xf32>
    %75 = arith.index_cast %c2_i32 : i32 to index
    %c0_37 = arith.constant 0 : index
    %c0_38 = arith.constant 0 : index
    %76 = vector.load %arg2[%75, %c0_37, %c0_38] : memref<8x8x512xbf16, #tpu.memory_space<vmem>>, vector<1x8x512xbf16>
    %77 = vector.shape_cast %76 : vector<1x8x512xbf16> to vector<8x512xbf16>
    %78 = arith.extf %77 : vector<8x512xbf16> to vector<8x512xf32>
    %79 = arith.addf %74, %78 : vector<8x512xf32>
    %80 = arith.addf %79, %6 : vector<8x512xf32>
    %81 = vector.extract_strided_slice %80 {offsets = [0, 0], sizes = [8, 384], strides = [1, 1]} : vector<8x512xf32> to vector<8x384xf32>
    %82 = arith.negf %81 : vector<8x384xf32>
    %83 = math.exp %82 : vector<8x384xf32>
    %cst_39 = arith.constant 1.000000e+00 : f32
    %84 = vector.broadcast %cst_39 : f32 to vector<8x384xf32>
    %85 = arith.addf %84, %83 : vector<8x384xf32>
    %86 = arith.divf %84, %85 : vector<8x384xf32>
    %87 = vector.extract_strided_slice %80 {offsets = [0, 384], sizes = [8, 128], strides = [1, 1]} : vector<8x512xf32> to vector<8x128xf32>
    %88 = math.tanh %87 : vector<8x128xf32>
    %89 = vector.extract_strided_slice %86 {offsets = [0, 0], sizes = [8, 128], strides = [1, 1]} : vector<8x384xf32> to vector<8x128xf32>
    %90 = vector.extract_strided_slice %86 {offsets = [0, 128], sizes = [8, 128], strides = [1, 1]} : vector<8x384xf32> to vector<8x128xf32>
    %91 = vector.extract_strided_slice %86 {offsets = [0, 256], sizes = [8, 128], strides = [1, 1]} : vector<8x384xf32> to vector<8x128xf32>
    %92 = arith.mulf %90, %72 : vector<8x128xf32>
    %93 = arith.mulf %89, %88 : vector<8x128xf32>
    %94 = arith.addf %92, %93 : vector<8x128xf32>
    %95 = math.tanh %94 : vector<8x128xf32>
    %96 = arith.mulf %91, %95 : vector<8x128xf32>
    %c0_40 = arith.constant 0 : index
    %c0_41 = arith.constant 0 : index
    %97 = vector.load %arg7[%c0_40, %c0_41] : memref<8x128xf32, #tpu.memory_space<vmem>>, vector<8x128xf32>
    tpu.vector_store %arg7[%c0_40, %c0_41], %94 {strides = array<i32>} : memref<8x128xf32, #tpu.memory_space<vmem>>, vector<8x128xf32>,
    %c0_42 = arith.constant 0 : index
    %c0_43 = arith.constant 0 : index
    %98 = vector.load %arg6[%c0_42, %c0_43] : memref<8x128xf32, #tpu.memory_space<vmem>>, vector<8x128xf32>
    tpu.vector_store %arg6[%c0_42, %c0_43], %96 {strides = array<i32>} : memref<8x128xf32, #tpu.memory_space<vmem>>, vector<8x128xf32>,
    %99 = arith.index_cast %c2_i32 : i32 to index
    %c0_44 = arith.constant 0 : index
    %c0_45 = arith.constant 0 : index
    %100 = vector.load %arg8[%99, %c0_44, %c0_45] : memref<8x8x128xf32, #tpu.memory_space<vmem>>, vector<1x8x128xf32>
    %101 = vector.shape_cast %100 : vector<1x8x128xf32> to vector<8x128xf32>
    %102 = vector.shape_cast %96 : vector<8x128xf32> to vector<1x8x128xf32>
    tpu.vector_store %arg8[%99, %c0_44, %c0_45], %102 {strides = array<i32>} : memref<8x8x128xf32, #tpu.memory_space<vmem>>, vector<1x8x128xf32>,
    %c3_i32 = arith.constant 3 : i32
    %c0_46 = arith.constant 0 : index
    %c0_47 = arith.constant 0 : index
    %103 = vector.load %arg6[%c0_46, %c0_47] : memref<8x128xf32, #tpu.memory_space<vmem>>, vector<8x128xf32>
    %c0_48 = arith.constant 0 : index
    %c0_49 = arith.constant 0 : index
    %104 = vector.load %arg7[%c0_48, %c0_49] : memref<8x128xf32, #tpu.memory_space<vmem>>, vector<8x128xf32>
    %105 = arith.truncf %103 : vector<8x128xf32> to vector<8x128xbf16>
    %cst_50 = arith.constant dense<0.000000e+00> : vector<8x512xf32>
    %106 = tpu.matmul %105, %3, %cst_50 {dimension_numbers = #tpu.dot_dimension_numbers<[1], [0], [0], [1], [0, 0, 1, 1], [], []>} : vector<8x128xbf16>, vector<128x512xbf16>, vector<8x512xf32> -> vector<8x512xf32>
    %107 = arith.index_cast %c3_i32 : i32 to index
    %c0_51 = arith.constant 0 : index
    %c0_52 = arith.constant 0 : index
    %108 = vector.load %arg2[%107, %c0_51, %c0_52] : memref<8x8x512xbf16, #tpu.memory_space<vmem>>, vector<1x8x512xbf16>
    %109 = vector.shape_cast %108 : vector<1x8x512xbf16> to vector<8x512xbf16>
    %110 = arith.extf %109 : vector<8x512xbf16> to vector<8x512xf32>
    %111 = arith.addf %106, %110 : vector<8x512xf32>
    %112 = arith.addf %111, %6 : vector<8x512xf32>
    %113 = vector.extract_strided_slice %112 {offsets = [0, 0], sizes = [8, 384], strides = [1, 1]} : vector<8x512xf32> to vector<8x384xf32>
    %114 = arith.negf %113 : vector<8x384xf32>
    %115 = math.exp %114 : vector<8x384xf32>
    %cst_53 = arith.constant 1.000000e+00 : f32
    %116 = vector.broadcast %cst_53 : f32 to vector<8x384xf32>
    %117 = arith.addf %116, %115 : vector<8x384xf32>
    %118 = arith.divf %116, %117 : vector<8x384xf32>
    %119 = vector.extract_strided_slice %112 {offsets = [0, 384], sizes = [8, 128], strides = [1, 1]} : vector<8x512xf32> to vector<8x128xf32>
    %120 = math.tanh %119 : vector<8x128xf32>
    %121 = vector.extract_strided_slice %118 {offsets = [0, 0], sizes = [8, 128], strides = [1, 1]} : vector<8x384xf32> to vector<8x128xf32>
    %122 = vector.extract_strided_slice %118 {offsets = [0, 128], sizes = [8, 128], strides = [1, 1]} : vector<8x384xf32> to vector<8x128xf32>
    %123 = vector.extract_strided_slice %118 {offsets = [0, 256], sizes = [8, 128], strides = [1, 1]} : vector<8x384xf32> to vector<8x128xf32>
    %124 = arith.mulf %122, %104 : vector<8x128xf32>
    %125 = arith.mulf %121, %120 : vector<8x128xf32>
    %126 = arith.addf %124, %125 : vector<8x128xf32>
    %127 = math.tanh %126 : vector<8x128xf32>
    %128 = arith.mulf %123, %127 : vector<8x128xf32>
    %c0_54 = arith.constant 0 : index
    %c0_55 = arith.constant 0 : index
    %129 = vector.load %arg7[%c0_54, %c0_55] : memref<8x128xf32, #tpu.memory_space<vmem>>, vector<8x128xf32>
    tpu.vector_store %arg7[%c0_54, %c0_55], %126 {strides = array<i32>} : memref<8x128xf32, #tpu.memory_space<vmem>>, vector<8x128xf32>,
    %c0_56 = arith.constant 0 : index
    %c0_57 = arith.constant 0 : index
    %130 = vector.load %arg6[%c0_56, %c0_57] : memref<8x128xf32, #tpu.memory_space<vmem>>, vector<8x128xf32>
    tpu.vector_store %arg6[%c0_56, %c0_57], %128 {strides = array<i32>} : memref<8x128xf32, #tpu.memory_space<vmem>>, vector<8x128xf32>,
    %131 = arith.index_cast %c3_i32 : i32 to index
    %c0_58 = arith.constant 0 : index
    %c0_59 = arith.constant 0 : index
    %132 = vector.load %arg8[%131, %c0_58, %c0_59] : memref<8x8x128xf32, #tpu.memory_space<vmem>>, vector<1x8x128xf32>
    %133 = vector.shape_cast %132 : vector<1x8x128xf32> to vector<8x128xf32>
    %134 = vector.shape_cast %128 : vector<8x128xf32> to vector<1x8x128xf32>
    tpu.vector_store %arg8[%131, %c0_58, %c0_59], %134 {strides = array<i32>} : memref<8x8x128xf32, #tpu.memory_space<vmem>>, vector<1x8x128xf32>,
    %c4_i32 = arith.constant 4 : i32
    %c0_60 = arith.constant 0 : index
    %c0_61 = arith.constant 0 : index
    %135 = vector.load %arg6[%c0_60, %c0_61] : memref<8x128xf32, #tpu.memory_space<vmem>>, vector<8x128xf32>
    %c0_62 = arith.constant 0 : index
    %c0_63 = arith.constant 0 : index
    %136 = vector.load %arg7[%c0_62, %c0_63] : memref<8x128xf32, #tpu.memory_space<vmem>>, vector<8x128xf32>
    %137 = arith.truncf %135 : vector<8x128xf32> to vector<8x128xbf16>
    %cst_64 = arith.constant dense<0.000000e+00> : vector<8x512xf32>
    %138 = tpu.matmul %137, %3, %cst_64 {dimension_numbers = #tpu.dot_dimension_numbers<[1], [0], [0], [1], [0, 0, 1, 1], [], []>} : vector<8x128xbf16>, vector<128x512xbf16>, vector<8x512xf32> -> vector<8x512xf32>
    %139 = arith.index_cast %c4_i32 : i32 to index
    %c0_65 = arith.constant 0 : index
    %c0_66 = arith.constant 0 : index
    %140 = vector.load %arg2[%139, %c0_65, %c0_66] : memref<8x8x512xbf16, #tpu.memory_space<vmem>>, vector<1x8x512xbf16>
    %141 = vector.shape_cast %140 : vector<1x8x512xbf16> to vector<8x512xbf16>
    %142 = arith.extf %141 : vector<8x512xbf16> to vector<8x512xf32>
    %143 = arith.addf %138, %142 : vector<8x512xf32>
    %144 = arith.addf %143, %6 : vector<8x512xf32>
    %145 = vector.extract_strided_slice %144 {offsets = [0, 0], sizes = [8, 384], strides = [1, 1]} : vector<8x512xf32> to vector<8x384xf32>
    %146 = arith.negf %145 : vector<8x384xf32>
    %147 = math.exp %146 : vector<8x384xf32>
    %cst_67 = arith.constant 1.000000e+00 : f32
    %148 = vector.broadcast %cst_67 : f32 to vector<8x384xf32>
    %149 = arith.addf %148, %147 : vector<8x384xf32>
    %150 = arith.divf %148, %149 : vector<8x384xf32>
    %151 = vector.extract_strided_slice %144 {offsets = [0, 384], sizes = [8, 128], strides = [1, 1]} : vector<8x512xf32> to vector<8x128xf32>
    %152 = math.tanh %151 : vector<8x128xf32>
    %153 = vector.extract_strided_slice %150 {offsets = [0, 0], sizes = [8, 128], strides = [1, 1]} : vector<8x384xf32> to vector<8x128xf32>
    %154 = vector.extract_strided_slice %150 {offsets = [0, 128], sizes = [8, 128], strides = [1, 1]} : vector<8x384xf32> to vector<8x128xf32>
    %155 = vector.extract_strided_slice %150 {offsets = [0, 256], sizes = [8, 128], strides = [1, 1]} : vector<8x384xf32> to vector<8x128xf32>
    %156 = arith.mulf %154, %136 : vector<8x128xf32>
    %157 = arith.mulf %153, %152 : vector<8x128xf32>
    %158 = arith.addf %156, %157 : vector<8x128xf32>
    %159 = math.tanh %158 : vector<8x128xf32>
    %160 = arith.mulf %155, %159 : vector<8x128xf32>
    %c0_68 = arith.constant 0 : index
    %c0_69 = arith.constant 0 : index
    %161 = vector.load %arg7[%c0_68, %c0_69] : memref<8x128xf32, #tpu.memory_space<vmem>>, vector<8x128xf32>
    tpu.vector_store %arg7[%c0_68, %c0_69], %158 {strides = array<i32>} : memref<8x128xf32, #tpu.memory_space<vmem>>, vector<8x128xf32>,
    %c0_70 = arith.constant 0 : index
    %c0_71 = arith.constant 0 : index
    %162 = vector.load %arg6[%c0_70, %c0_71] : memref<8x128xf32, #tpu.memory_space<vmem>>, vector<8x128xf32>
    tpu.vector_store %arg6[%c0_70, %c0_71], %160 {strides = array<i32>} : memref<8x128xf32, #tpu.memory_space<vmem>>, vector<8x128xf32>,
    %163 = arith.index_cast %c4_i32 : i32 to index
    %c0_72 = arith.constant 0 : index
    %c0_73 = arith.constant 0 : index
    %164 = vector.load %arg8[%163, %c0_72, %c0_73] : memref<8x8x128xf32, #tpu.memory_space<vmem>>, vector<1x8x128xf32>
    %165 = vector.shape_cast %164 : vector<1x8x128xf32> to vector<8x128xf32>
    %166 = vector.shape_cast %160 : vector<8x128xf32> to vector<1x8x128xf32>
    tpu.vector_store %arg8[%163, %c0_72, %c0_73], %166 {strides = array<i32>} : memref<8x8x128xf32, #tpu.memory_space<vmem>>, vector<1x8x128xf32>,
    %c5_i32 = arith.constant 5 : i32
    %c0_74 = arith.constant 0 : index
    %c0_75 = arith.constant 0 : index
    %167 = vector.load %arg6[%c0_74, %c0_75] : memref<8x128xf32, #tpu.memory_space<vmem>>, vector<8x128xf32>
    %c0_76 = arith.constant 0 : index
    %c0_77 = arith.constant 0 : index
    %168 = vector.load %arg7[%c0_76, %c0_77] : memref<8x128xf32, #tpu.memory_space<vmem>>, vector<8x128xf32>
    %169 = arith.truncf %167 : vector<8x128xf32> to vector<8x128xbf16>
    %cst_78 = arith.constant dense<0.000000e+00> : vector<8x512xf32>
    %170 = tpu.matmul %169, %3, %cst_78 {dimension_numbers = #tpu.dot_dimension_numbers<[1], [0], [0], [1], [0, 0, 1, 1], [], []>} : vector<8x128xbf16>, vector<128x512xbf16>, vector<8x512xf32> -> vector<8x512xf32>
    %171 = arith.index_cast %c5_i32 : i32 to index
    %c0_79 = arith.constant 0 : index
    %c0_80 = arith.constant 0 : index
    %172 = vector.load %arg2[%171, %c0_79, %c0_80] : memref<8x8x512xbf16, #tpu.memory_space<vmem>>, vector<1x8x512xbf16>
    %173 = vector.shape_cast %172 : vector<1x8x512xbf16> to vector<8x512xbf16>
    %174 = arith.extf %173 : vector<8x512xbf16> to vector<8x512xf32>
    %175 = arith.addf %170, %174 : vector<8x512xf32>
    %176 = arith.addf %175, %6 : vector<8x512xf32>
    %177 = vector.extract_strided_slice %176 {offsets = [0, 0], sizes = [8, 384], strides = [1, 1]} : vector<8x512xf32> to vector<8x384xf32>
    %178 = arith.negf %177 : vector<8x384xf32>
    %179 = math.exp %178 : vector<8x384xf32>
    %cst_81 = arith.constant 1.000000e+00 : f32
    %180 = vector.broadcast %cst_81 : f32 to vector<8x384xf32>
    %181 = arith.addf %180, %179 : vector<8x384xf32>
    %182 = arith.divf %180, %181 : vector<8x384xf32>
    %183 = vector.extract_strided_slice %176 {offsets = [0, 384], sizes = [8, 128], strides = [1, 1]} : vector<8x512xf32> to vector<8x128xf32>
    %184 = math.tanh %183 : vector<8x128xf32>
    %185 = vector.extract_strided_slice %182 {offsets = [0, 0], sizes = [8, 128], strides = [1, 1]} : vector<8x384xf32> to vector<8x128xf32>
    %186 = vector.extract_strided_slice %182 {offsets = [0, 128], sizes = [8, 128], strides = [1, 1]} : vector<8x384xf32> to vector<8x128xf32>
    %187 = vector.extract_strided_slice %182 {offsets = [0, 256], sizes = [8, 128], strides = [1, 1]} : vector<8x384xf32> to vector<8x128xf32>
    %188 = arith.mulf %186, %168 : vector<8x128xf32>
    %189 = arith.mulf %185, %184 : vector<8x128xf32>
    %190 = arith.addf %188, %189 : vector<8x128xf32>
    %191 = math.tanh %190 : vector<8x128xf32>
    %192 = arith.mulf %187, %191 : vector<8x128xf32>
    %c0_82 = arith.constant 0 : index
    %c0_83 = arith.constant 0 : index
    %193 = vector.load %arg7[%c0_82, %c0_83] : memref<8x128xf32, #tpu.memory_space<vmem>>, vector<8x128xf32>
    tpu.vector_store %arg7[%c0_82, %c0_83], %190 {strides = array<i32>} : memref<8x128xf32, #tpu.memory_space<vmem>>, vector<8x128xf32>,
    %c0_84 = arith.constant 0 : index
    %c0_85 = arith.constant 0 : index
    %194 = vector.load %arg6[%c0_84, %c0_85] : memref<8x128xf32, #tpu.memory_space<vmem>>, vector<8x128xf32>
    tpu.vector_store %arg6[%c0_84, %c0_85], %192 {strides = array<i32>} : memref<8x128xf32, #tpu.memory_space<vmem>>, vector<8x128xf32>,
    %195 = arith.index_cast %c5_i32 : i32 to index
    %c0_86 = arith.constant 0 : index
    %c0_87 = arith.constant 0 : index
    %196 = vector.load %arg8[%195, %c0_86, %c0_87] : memref<8x8x128xf32, #tpu.memory_space<vmem>>, vector<1x8x128xf32>
    %197 = vector.shape_cast %196 : vector<1x8x128xf32> to vector<8x128xf32>
    %198 = vector.shape_cast %192 : vector<8x128xf32> to vector<1x8x128xf32>
    tpu.vector_store %arg8[%195, %c0_86, %c0_87], %198 {strides = array<i32>} : memref<8x8x128xf32, #tpu.memory_space<vmem>>, vector<1x8x128xf32>,
    %c6_i32 = arith.constant 6 : i32
    %c0_88 = arith.constant 0 : index
    %c0_89 = arith.constant 0 : index
    %199 = vector.load %arg6[%c0_88, %c0_89] : memref<8x128xf32, #tpu.memory_space<vmem>>, vector<8x128xf32>
    %c0_90 = arith.constant 0 : index
    %c0_91 = arith.constant 0 : index
    %200 = vector.load %arg7[%c0_90, %c0_91] : memref<8x128xf32, #tpu.memory_space<vmem>>, vector<8x128xf32>
    %201 = arith.truncf %199 : vector<8x128xf32> to vector<8x128xbf16>
    %cst_92 = arith.constant dense<0.000000e+00> : vector<8x512xf32>
    %202 = tpu.matmul %201, %3, %cst_92 {dimension_numbers = #tpu.dot_dimension_numbers<[1], [0], [0], [1], [0, 0, 1, 1], [], []>} : vector<8x128xbf16>, vector<128x512xbf16>, vector<8x512xf32> -> vector<8x512xf32>
    %203 = arith.index_cast %c6_i32 : i32 to index
    %c0_93 = arith.constant 0 : index
    %c0_94 = arith.constant 0 : index
    %204 = vector.load %arg2[%203, %c0_93, %c0_94] : memref<8x8x512xbf16, #tpu.memory_space<vmem>>, vector<1x8x512xbf16>
    %205 = vector.shape_cast %204 : vector<1x8x512xbf16> to vector<8x512xbf16>
    %206 = arith.extf %205 : vector<8x512xbf16> to vector<8x512xf32>
    %207 = arith.addf %202, %206 : vector<8x512xf32>
    %208 = arith.addf %207, %6 : vector<8x512xf32>
    %209 = vector.extract_strided_slice %208 {offsets = [0, 0], sizes = [8, 384], strides = [1, 1]} : vector<8x512xf32> to vector<8x384xf32>
    %210 = arith.negf %209 : vector<8x384xf32>
    %211 = math.exp %210 : vector<8x384xf32>
    %cst_95 = arith.constant 1.000000e+00 : f32
    %212 = vector.broadcast %cst_95 : f32 to vector<8x384xf32>
    %213 = arith.addf %212, %211 : vector<8x384xf32>
    %214 = arith.divf %212, %213 : vector<8x384xf32>
    %215 = vector.extract_strided_slice %208 {offsets = [0, 384], sizes = [8, 128], strides = [1, 1]} : vector<8x512xf32> to vector<8x128xf32>
    %216 = math.tanh %215 : vector<8x128xf32>
    %217 = vector.extract_strided_slice %214 {offsets = [0, 0], sizes = [8, 128], strides = [1, 1]} : vector<8x384xf32> to vector<8x128xf32>
    %218 = vector.extract_strided_slice %214 {offsets = [0, 128], sizes = [8, 128], strides = [1, 1]} : vector<8x384xf32> to vector<8x128xf32>
    %219 = vector.extract_strided_slice %214 {offsets = [0, 256], sizes = [8, 128], strides = [1, 1]} : vector<8x384xf32> to vector<8x128xf32>
    %220 = arith.mulf %218, %200 : vector<8x128xf32>
    %221 = arith.mulf %217, %216 : vector<8x128xf32>
    %222 = arith.addf %220, %221 : vector<8x128xf32>
    %223 = math.tanh %222 : vector<8x128xf32>
    %224 = arith.mulf %219, %223 : vector<8x128xf32>
    %c0_96 = arith.constant 0 : index
    %c0_97 = arith.constant 0 : index
    %225 = vector.load %arg7[%c0_96, %c0_97] : memref<8x128xf32, #tpu.memory_space<vmem>>, vector<8x128xf32>
    tpu.vector_store %arg7[%c0_96, %c0_97], %222 {strides = array<i32>} : memref<8x128xf32, #tpu.memory_space<vmem>>, vector<8x128xf32>,
    %c0_98 = arith.constant 0 : index
    %c0_99 = arith.constant 0 : index
    %226 = vector.load %arg6[%c0_98, %c0_99] : memref<8x128xf32, #tpu.memory_space<vmem>>, vector<8x128xf32>
    tpu.vector_store %arg6[%c0_98, %c0_99], %224 {strides = array<i32>} : memref<8x128xf32, #tpu.memory_space<vmem>>, vector<8x128xf32>,
    %227 = arith.index_cast %c6_i32 : i32 to index
    %c0_100 = arith.constant 0 : index
    %c0_101 = arith.constant 0 : index
    %228 = vector.load %arg8[%227, %c0_100, %c0_101] : memref<8x8x128xf32, #tpu.memory_space<vmem>>, vector<1x8x128xf32>
    %229 = vector.shape_cast %228 : vector<1x8x128xf32> to vector<8x128xf32>
    %230 = vector.shape_cast %224 : vector<8x128xf32> to vector<1x8x128xf32>
    tpu.vector_store %arg8[%227, %c0_100, %c0_101], %230 {strides = array<i32>} : memref<8x8x128xf32, #tpu.memory_space<vmem>>, vector<1x8x128xf32>,
    %c7_i32 = arith.constant 7 : i32
    %c0_102 = arith.constant 0 : index
    %c0_103 = arith.constant 0 : index
    %231 = vector.load %arg6[%c0_102, %c0_103] : memref<8x128xf32, #tpu.memory_space<vmem>>, vector<8x128xf32>
    %c0_104 = arith.constant 0 : index
    %c0_105 = arith.constant 0 : index
    %232 = vector.load %arg7[%c0_104, %c0_105] : memref<8x128xf32, #tpu.memory_space<vmem>>, vector<8x128xf32>
    %233 = arith.truncf %231 : vector<8x128xf32> to vector<8x128xbf16>
    %cst_106 = arith.constant dense<0.000000e+00> : vector<8x512xf32>
    %234 = tpu.matmul %233, %3, %cst_106 {dimension_numbers = #tpu.dot_dimension_numbers<[1], [0], [0], [1], [0, 0, 1, 1], [], []>} : vector<8x128xbf16>, vector<128x512xbf16>, vector<8x512xf32> -> vector<8x512xf32>
    %235 = arith.index_cast %c7_i32 : i32 to index
    %c0_107 = arith.constant 0 : index
    %c0_108 = arith.constant 0 : index
    %236 = vector.load %arg2[%235, %c0_107, %c0_108] : memref<8x8x512xbf16, #tpu.memory_space<vmem>>, vector<1x8x512xbf16>
    %237 = vector.shape_cast %236 : vector<1x8x512xbf16> to vector<8x512xbf16>
    %238 = arith.extf %237 : vector<8x512xbf16> to vector<8x512xf32>
    %239 = arith.addf %234, %238 : vector<8x512xf32>
    %240 = arith.addf %239, %6 : vector<8x512xf32>
    %241 = vector.extract_strided_slice %240 {offsets = [0, 0], sizes = [8, 384], strides = [1, 1]} : vector<8x512xf32> to vector<8x384xf32>
    %242 = arith.negf %241 : vector<8x384xf32>
    %243 = math.exp %242 : vector<8x384xf32>
    %cst_109 = arith.constant 1.000000e+00 : f32
    %244 = vector.broadcast %cst_109 : f32 to vector<8x384xf32>
    %245 = arith.addf %244, %243 : vector<8x384xf32>
    %246 = arith.divf %244, %245 : vector<8x384xf32>
    %247 = vector.extract_strided_slice %240 {offsets = [0, 384], sizes = [8, 128], strides = [1, 1]} : vector<8x512xf32> to vector<8x128xf32>
    %248 = math.tanh %247 : vector<8x128xf32>
    %249 = vector.extract_strided_slice %246 {offsets = [0, 0], sizes = [8, 128], strides = [1, 1]} : vector<8x384xf32> to vector<8x128xf32>
    %250 = vector.extract_strided_slice %246 {offsets = [0, 128], sizes = [8, 128], strides = [1, 1]} : vector<8x384xf32> to vector<8x128xf32>
    %251 = vector.extract_strided_slice %246 {offsets = [0, 256], sizes = [8, 128], strides = [1, 1]} : vector<8x384xf32> to vector<8x128xf32>
    %252 = arith.mulf %250, %232 : vector<8x128xf32>
    %253 = arith.mulf %249, %248 : vector<8x128xf32>
    %254 = arith.addf %252, %253 : vector<8x128xf32>
    %255 = math.tanh %254 : vector<8x128xf32>
    %256 = arith.mulf %251, %255 : vector<8x128xf32>
    %c0_110 = arith.constant 0 : index
    %c0_111 = arith.constant 0 : index
    %257 = vector.load %arg7[%c0_110, %c0_111] : memref<8x128xf32, #tpu.memory_space<vmem>>, vector<8x128xf32>
    tpu.vector_store %arg7[%c0_110, %c0_111], %254 {strides = array<i32>} : memref<8x128xf32, #tpu.memory_space<vmem>>, vector<8x128xf32>,
    %c0_112 = arith.constant 0 : index
    %c0_113 = arith.constant 0 : index
    %258 = vector.load %arg6[%c0_112, %c0_113] : memref<8x128xf32, #tpu.memory_space<vmem>>, vector<8x128xf32>
    tpu.vector_store %arg6[%c0_112, %c0_113], %256 {strides = array<i32>} : memref<8x128xf32, #tpu.memory_space<vmem>>, vector<8x128xf32>,
    %259 = arith.index_cast %c7_i32 : i32 to index
    %c0_114 = arith.constant 0 : index
    %c0_115 = arith.constant 0 : index
    %260 = vector.load %arg8[%259, %c0_114, %c0_115] : memref<8x8x128xf32, #tpu.memory_space<vmem>>, vector<1x8x128xf32>
    %261 = vector.shape_cast %260 : vector<1x8x128xf32> to vector<8x128xf32>
    %262 = vector.shape_cast %256 : vector<8x128xf32> to vector<1x8x128xf32>
    tpu.vector_store %arg8[%259, %c0_114, %c0_115], %262 {strides = array<i32>} : memref<8x8x128xf32, #tpu.memory_space<vmem>>, vector<1x8x128xf32>,
    %c8_i32 = arith.constant 8 : i32
    %c0_116 = arith.constant 0 : index
    %c0_117 = arith.constant 0 : index
    %c0_118 = arith.constant 0 : index
    %263 = vector.load %arg8[%c0_116, %c0_117, %c0_118] : memref<8x8x128xf32, #tpu.memory_space<vmem>>, vector<8x8x128xf32>
    %264 = arith.truncf %263 : vector<8x8x128xf32> to vector<8x8x128xbf16>
    %c0_119 = arith.constant 0 : index
    %c0_120 = arith.constant 0 : index
    %c0_121 = arith.constant 0 : index
    %265 = vector.load %arg5[%c0_119, %c0_120, %c0_121] : memref<8x8x128xbf16, #tpu.memory_space<vmem>>, vector<8x8x128xbf16>
    tpu.vector_store %arg5[%c0_119, %c0_120, %c0_121], %264 {strides = array<i32>} : memref<8x8x128xbf16, #tpu.memory_space<vmem>>, vector<8x8x128xbf16>,
    return
  }
  func.func @transform_0(%arg0: i32, %arg1: i32) -> (i32, i32, i32) {
    %c0_i32 = arith.constant 0 : i32
    %c0_i32_0 = arith.constant 0 : i32
    return %arg1, %arg0, %c0_i32 : i32, i32, i32
  }
  func.func @transform_1(%arg0: i32, %arg1: i32) -> (i32, i32) {
    %c0_i32 = arith.constant 0 : i32
    %c0_i32_0 = arith.constant 0 : i32
    %c0_i32_1 = arith.constant 0 : i32
    return %c0_i32, %c0_i32_0 : i32, i32
  }
  func.func @transform_2(%arg0: i32, %arg1: i32) -> (i32, i32) {
    %c0_i32 = arith.constant 0 : i32
    %c0_i32_0 = arith.constant 0 : i32
    %c0_i32_1 = arith.constant 0 : i32
    return %c0_i32, %c0_i32_0 : i32, i32
  }
  func.func @transform_3(%arg0: i32, %arg1: i32) -> (i32, i32, i32) {
    %c0_i32 = arith.constant 0 : i32
    %c0_i32_0 = arith.constant 0 : i32
    return %arg1, %arg0, %c0_i32 : i32, i32, i32
  }
}

module attributes {stable_mosaic.version = 11 : i64} {
  func.func @_mlp_head_kernel(%arg0: i32, %arg1: memref<64x128xbf16, #tpu.memory_space<vmem>>, %arg2: memref<128x128xbf16, #tpu.memory_space<vmem>>, %arg3: memref<1x128xf32, #tpu.memory_space<vmem>>, %arg4: memref<128x128xbf16, #tpu.memory_space<vmem>>, %arg5: memref<1x128xf32, #tpu.memory_space<vmem>>, %arg6: memref<64x128xf32, #tpu.memory_space<vmem>>) attributes {dimension_semantics = [#tpu.dimension_semantics<parallel>], iteration_bounds = array<i64: 1>, scalar_prefetch = 0 : i64, scratch_operands = 0 : i64, tpu.core_type = #tpu.core_type<tc>, window_params = [{transform_indices = @transform_0, window_bounds = array<i64: 64, 128>}, {pipeline_mode = #tpu.pipeline_mode<synchronous>, transform_indices = @transform_1, window_bounds = array<i64: 128, 128>}, {pipeline_mode = #tpu.pipeline_mode<synchronous>, transform_indices = @transform_2, window_bounds = array<i64: 1, 128>}, {pipeline_mode = #tpu.pipeline_mode<synchronous>, transform_indices = @transform_3, window_bounds = array<i64: 128, 128>}, {pipeline_mode = #tpu.pipeline_mode<synchronous>, transform_indices = @transform_4, window_bounds = array<i64: 1, 128>}, {transform_indices = @transform_5, window_bounds = array<i64: 64, 128>}]} {
    %c0 = arith.constant 0 : index
    %c0_0 = arith.constant 0 : index
    %0 = vector.load %arg1[%c0, %c0_0] : memref<64x128xbf16, #tpu.memory_space<vmem>>, vector<64x128xbf16>
    %c0_1 = arith.constant 0 : index
    %c0_2 = arith.constant 0 : index
    %1 = vector.load %arg2[%c0_1, %c0_2] : memref<128x128xbf16, #tpu.memory_space<vmem>>, vector<128x128xbf16>
    %cst = arith.constant dense<0.000000e+00> : vector<64x128xf32>
    %2 = tpu.matmul %0, %1, %cst {dimension_numbers = #tpu.dot_dimension_numbers<[1], [0], [0], [1], [0, 0, 1, 1], [], []>} : vector<64x128xbf16>, vector<128x128xbf16>, vector<64x128xf32> -> vector<64x128xf32>
    %c0_3 = arith.constant 0 : index
    %c0_4 = arith.constant 0 : index
    %3 = vector.load %arg3[%c0_3, %c0_4] : memref<1x128xf32, #tpu.memory_space<vmem>>, vector<1x128xf32>
    %4 = vector.broadcast %3 : vector<1x128xf32> to vector<64x128xf32>
    %5 = arith.addf %2, %4 : vector<64x128xf32>
    %cst_5 = arith.constant 0.000000e+00 : f32
    %6 = vector.broadcast %cst_5 : f32 to vector<64x128xf32>
    %7 = arith.maximumf %5, %6 : vector<64x128xf32>
    %8 = arith.truncf %7 : vector<64x128xf32> to vector<64x128xbf16>
    %c0_6 = arith.constant 0 : index
    %c0_7 = arith.constant 0 : index
    %9 = vector.load %arg4[%c0_6, %c0_7] : memref<128x128xbf16, #tpu.memory_space<vmem>>, vector<128x128xbf16>
    %cst_8 = arith.constant dense<0.000000e+00> : vector<64x128xf32>
    %10 = tpu.matmul %8, %9, %cst_8 {dimension_numbers = #tpu.dot_dimension_numbers<[1], [0], [0], [1], [0, 0, 1, 1], [], []>} : vector<64x128xbf16>, vector<128x128xbf16>, vector<64x128xf32> -> vector<64x128xf32>
    %c0_9 = arith.constant 0 : index
    %c0_10 = arith.constant 0 : index
    %11 = vector.load %arg5[%c0_9, %c0_10] : memref<1x128xf32, #tpu.memory_space<vmem>>, vector<1x128xf32>
    %12 = vector.broadcast %11 : vector<1x128xf32> to vector<64x128xf32>
    %13 = arith.addf %10, %12 : vector<64x128xf32>
    %c0_11 = arith.constant 0 : index
    %c0_12 = arith.constant 0 : index
    %14 = vector.load %arg6[%c0_11, %c0_12] : memref<64x128xf32, #tpu.memory_space<vmem>>, vector<64x128xf32>
    tpu.vector_store %arg6[%c0_11, %c0_12], %13 {strides = array<i32>} : memref<64x128xf32, #tpu.memory_space<vmem>>, vector<64x128xf32>,
    return
  }
  func.func @transform_0(%arg0: i32) -> (i32, i32) {
    %c0_i32 = arith.constant 0 : i32
    %c0_i32_0 = arith.constant 0 : i32
    return %arg0, %c0_i32 : i32, i32
  }
  func.func @transform_1(%arg0: i32) -> (i32, i32) {
    %c0_i32 = arith.constant 0 : i32
    %c0_i32_0 = arith.constant 0 : i32
    %c0_i32_1 = arith.constant 0 : i32
    return %c0_i32, %c0_i32_0 : i32, i32
  }
  func.func @transform_2(%arg0: i32) -> (i32, i32) {
    %c0_i32 = arith.constant 0 : i32
    %c0_i32_0 = arith.constant 0 : i32
    %c0_i32_1 = arith.constant 0 : i32
    return %c0_i32, %c0_i32_0 : i32, i32
  }
  func.func @transform_3(%arg0: i32) -> (i32, i32) {
    %c0_i32 = arith.constant 0 : i32
    %c0_i32_0 = arith.constant 0 : i32
    %c0_i32_1 = arith.constant 0 : i32
    return %c0_i32, %c0_i32_0 : i32, i32
  }
  func.func @transform_4(%arg0: i32) -> (i32, i32) {
    %c0_i32 = arith.constant 0 : i32
    %c0_i32_0 = arith.constant 0 : i32
    %c0_i32_1 = arith.constant 0 : i32
    return %c0_i32, %c0_i32_0 : i32, i32
  }
  func.func @transform_5(%arg0: i32) -> (i32, i32) {
    %c0_i32 = arith.constant 0 : i32
    %c0_i32_0 = arith.constant 0 : i32
    return %arg0, %c0_i32 : i32, i32
  }
}

</mosaic_0001>

<bundles_post_ra>
// kernel: lstm_model_forward.3
= control target key start
LH: loop header
LB: loop body
LE: loop exit
PB: predicated region body
PF: predicated region fallthrough
CT: control target
= control target key end

     0   :  { %s508_s1 = inlined_call_operand.vmem [shape: bf16[128,128], index: 1, kind: input, shape index: {}]   ;;  %s509_s2 = inlined_call_operand.vmem [shape: f32[1,128], index: 2, kind: input, shape index: {}]   ;;  %s510_s3 = inlined_call_operand.vmem [shape: bf16[128,128], index: 3, kind: input, shape index: {}]   ;;  %s511_s0 = inlined_call_operand.vmem [shape: bf16[64,128], index: 0, kind: input, shape index: {}]   ;;  %s512_s4 = inlined_call_operand.vmem [shape: f32[1,128], index: 4, kind: input, shape index: {}]   ;;  %s513_s5 = inlined_call_operand.vmem [shape: f32[64,128], index: 5, kind: output, shape index: {}]  }
   0x1   :  { %v361_v0 = vld [vmem:[%s508_s1 + $0x38] sm:$0xff]  ;;  %v360_v1 = vld [vmem:[%s508_s1 + $0x30] sm:$0xff]  ;;  %v359_v2 = vld [vmem:[%s508_s1 + $0x28] sm:$0xff] }
   0x2   :  { %120 = vmatpush.bf16.msra.mxu0 %v361_v0  ;;  %370 = vmatpush.bf16.msra.mxu2 %v361_v0  ;;  %v358_v3 = vld [vmem:[%s508_s1 + $0x20] sm:$0xff]  ;;  %v357_v4 = vld [vmem:[%s508_s1 + $0x18] sm:$0xff]  ;;  %v356_v6 = vld [vmem:[%s508_s1 + $0x10] sm:$0xff] }
   0x3   :  { %v369_v5 = vld [vmem:[%s510_s3 + $0x38] sm:$0xff]  ;;  %v368_v7 = vld [vmem:[%s510_s3 + $0x30] sm:$0xff]  ;;  %v355_v8 = vld [vmem:[%s508_s1 + $0x8] sm:$0xff] }
   0x4   :  { %229 = vmatpush.bf16.msra.mxu1 %v369_v5  ;;  %378 = vmatpush.bf16.msra.mxu3 %v369_v5  ;;  %v367_v9 = vld [vmem:[%s510_s3 + $0x28] sm:$0xff]  ;;  %v354_v10 = vld [vmem:[%s508_s1] sm:$0xff]  ;;  %v352_v13 = vld [vmem:[%s511_s0 + $0x10] sm:$0xff] }
   0x5   :  { %v366_v11 = vld [vmem:[%s510_s3 + $0x20] sm:$0xff]  ;;  %v351_v14 = vld [vmem:[%s511_s0 + $0x8] sm:$0xff]  ;;  %v353_v15 = vld [vmem:[%s511_s0 + $0x18] sm:$0xff] }
   0x6   :  { %121 = vmatpush.bf16.msra.mxu0 %v360_v1  ;;  %371 = vmatpush.bf16.msra.mxu2 %v360_v1  ;;  %v350_v12 = vld [vmem:[%s511_s0] sm:$0xff]  ;;  %v365_v16 = vld [vmem:[%s510_s3 + $0x18] sm:$0xff]  ;;  %v364_v17 = vld [vmem:[%s510_s3 + $0x10] sm:$0xff] }
   0x7   :  { %v363_v18 = vld [vmem:[%s510_s3 + $0x8] sm:$0xff]  ;;  %v362_v19 = vld [vmem:[%s510_s3] sm:$0xff] }
   0x8   :  { %230 = vmatpush.bf16.msra.mxu1 %v368_v7  ;;  %379 = vmatpush.bf16.msra.mxu3 %v368_v7  ;;  %v386_v21 = vld [vmem:[%s509_s2] ss:$0 sm:$0xff] }
   0x9   :  { %v387_v49 = vld [vmem:[%s512_s4] ss:$0 sm:$0xff] }
   0xa   :  { %122 = vmatpush.bf16.msra.mxu0 %v359_v2  ;;  %372 = vmatpush.bf16.msra.mxu2 %v359_v2 }
   0xc   :  { %231 = vmatpush.bf16.msra.mxu1 %v367_v9  ;;  %380 = vmatpush.bf16.msra.mxu3 %v367_v9 }
   0xe   :  { %123 = vmatpush.bf16.msra.mxu0 %v358_v3  ;;  %373 = vmatpush.bf16.msra.mxu2 %v358_v3 }
  0x10   :  { %232 = vmatpush.bf16.msra.mxu1 %v366_v11  ;;  %381 = vmatpush.bf16.msra.mxu3 %v366_v11 }
  0x12   :  { %124 = vmatpush.bf16.msra.mxu0 %v357_v4  ;;  %374 = vmatpush.bf16.msra.mxu2 %v357_v4 }
  0x14   :  { %233 = vmatpush.bf16.msra.mxu1 %v365_v16  ;;  %382 = vmatpush.bf16.msra.mxu3 %v365_v16 }
  0x16   :  { %125 = vmatpush.bf16.msra.mxu0 %v356_v6  ;;  %375 = vmatpush.bf16.msra.mxu2 %v356_v6 }
  0x18   :  { %234 = vmatpush.bf16.msra.mxu1 %v364_v17  ;;  %383 = vmatpush.bf16.msra.mxu3 %v364_v17 }
  0x1a   :  { %126 = vmatpush.bf16.msra.mxu0 %v355_v8  ;;  %376 = vmatpush.bf16.msra.mxu2 %v355_v8 }
  0x1c   :  { %235 = vmatpush.bf16.msra.mxu1 %v363_v18  ;;  %384 = vmatpush.bf16.msra.mxu3 %v363_v18 }
  0x1e   :  { %127 = vmatpush.bf16.msra.mxu0 %v354_v10  ;;  %377 = vmatpush.bf16.msra.mxu2 %v354_v10 }
  0x20   :  { %236 = vmatpush.bf16.msra.mxu1 %v362_v19  ;;  %385 = vmatpush.bf16.msra.mxu3 %v362_v19 }
  0x21   :  { %128 = vmatmul.bf16.vlgmr.msra.gmra.mxu0 %v350_v12  ;;  %138 = vmatmul.bf16.vlgmr.msra.gmra.mxu2 %v352_v13 }
  0x31   :  { %133 = vmatmul.bf16.gmra.mxu0 %v351_v14  ;;  %143 = vmatmul.bf16.gmra.mxu2 %v353_v15 }
  0x9e   :  { %v129_v20 = vpop.f32.mrf.mxu0 }
  0x9f   :  { %v130_v22 = vadd.f32 %v386_v21, %v129_v20 }
  0xa1   :  { %v149_v25 = vmax.f32 %v130_v22, 0.0 }
  0xa4   :  { %v139_v23 = vpop.f32.mrf.mxu2 }
  0xa5   :  { %v140_v28 = vadd.f32 %v386_v21, %v139_v23 }
  0xa6   :  { %v131_v24 = vpop.f32.mrf.mxu0 }
  0xa7   :  { %v132_v26 = vadd.f32 %v386_v21, %v131_v24  ;;  %v153_v33 = vmax.f32 %v140_v28, 0.0 }
  0xa9   :  { %v150_v27 = vmax.f32 %v132_v26, 0.0 }
  0xab   :  { %v157_v29 = vpack.c.bf16 %v150_v27, %v149_v25 }
  0xac   :  { %v141_v30 = vpop.f32.mrf.mxu2 }
  0xad   :  { %v142_v31 = vadd.f32 %v386_v21, %v141_v30  ;;  %237 = vmatmul.bf16.vlgmr.msra.gmra.mxu1 %v157_v29 }
  0xae   :  { %v134_v32 = vpop.f32.mrf.mxu0 }
  0xaf   :  { %v154_v34 = vmax.f32 %v142_v31, 0.0  ;;  %v135_v36 = vadd.f32 %v386_v21, %v134_v32 }
  0xb1   :  { %v159_v35 = vpack.c.bf16 %v154_v34, %v153_v33  ;;  %v151_v39 = vmax.f32 %v135_v36, 0.0 }
  0xb3   :  { %247 = vmatmul.bf16.vlgmr.msra.gmra.mxu3 %v159_v35 }
  0xb4   :  { %v144_v37 = vpop.f32.mrf.mxu2 }
  0xb5   :  { %v145_v42 = vadd.f32 %v386_v21, %v144_v37 }
  0xb6   :  { %v136_v38 = vpop.f32.mrf.mxu0 }
  0xb7   :  { %v137_v40 = vadd.f32 %v386_v21, %v136_v38  ;;  %v155_v46 = vmax.f32 %v145_v42, 0.0 }
  0xb9   :  { %v152_v41 = vmax.f32 %v137_v40, 0.0 }
  0xbb   :  { %v158_v43 = vpack.c.bf16 %v152_v41, %v151_v39 }
  0xbc   :  { %v146_v44 = vpop.f32.mrf.mxu2 }
  0xbd   :  { %v147_v45 = vadd.f32 %v386_v21, %v146_v44  ;;  %242 = vmatmul.bf16.gmra.mxu1 %v158_v43 }
  0xbf   :  { %v156_v47 = vmax.f32 %v147_v45, 0.0 }
  0xc1   :  { %v160_v48 = vpack.c.bf16 %v156_v47, %v155_v46 }
  0xc3   :  { %252 = vmatmul.bf16.gmra.mxu3 %v160_v48 }
 0x12a   :  { %v238_v50 = vpop.f32.mrf.mxu1 }
 0x12b   :  { %v239_v51 = vadd.f32 %v387_v49, %v238_v50 }
 0x12d   :  { %258 = vst [vmem:[%s513_s5] sm:$0xff] %v239_v51 }
 0x132   :  { %v240_v52 = vpop.f32.mrf.mxu1 }
 0x133   :  { %v241_v53 = vadd.f32 %v387_v49, %v240_v52 }
 0x135   :  { %259 = vst [vmem:[%s513_s5 + $0x8] sm:$0xff] %v241_v53 }
 0x136   :  { %v248_v54 = vpop.f32.mrf.mxu3 }
 0x137   :  { %v249_v55 = vadd.f32 %v387_v49, %v248_v54 }
 0x139   :  { %262 = vst [vmem:[%s513_s5 + $0x20] sm:$0xff] %v249_v55 }
 0x13a   :  { %v243_v56 = vpop.f32.mrf.mxu1 }
 0x13b   :  { %v244_v57 = vadd.f32 %v387_v49, %v243_v56 }
 0x13d   :  { %260 = vst [vmem:[%s513_s5 + $0x10] sm:$0xff] %v244_v57 }
 0x13e   :  { %v250_v58 = vpop.f32.mrf.mxu3 }
 0x13f   :  { %v251_v59 = vadd.f32 %v387_v49, %v250_v58 }
 0x141   :  { %263 = vst [vmem:[%s513_s5 + $0x28] sm:$0xff] %v251_v59 }
 0x142   :  { %v245_v60 = vpop.f32.mrf.mxu1 }
 0x143   :  { %v246_v61 = vadd.f32 %v387_v49, %v245_v60 }
 0x145   :  { %261 = vst [vmem:[%s513_s5 + $0x18] sm:$0xff] %v246_v61 }
 0x146   :  { %v253_v62 = vpop.f32.mrf.mxu3 }
 0x147   :  { %v254_v63 = vadd.f32 %v387_v49, %v253_v62 }
 0x149   :  { %264 = vst [vmem:[%s513_s5 + $0x30] sm:$0xff] %v254_v63 }
 0x14e   :  { %v255_v0 = vpop.f32.mrf.mxu3 }
 0x14f   :  { %v256_v1 = vadd.f32 %v387_v49, %v255_v0 }
 0x151   :  { %265 = vst [vmem:[%s513_s5 + $0x38] sm:$0xff] %v256_v1 }

// kernel: lstm_model_forward.2
= control target key start
LH: loop header
LB: loop body
LE: loop exit
PB: predicated region body
PF: predicated region fallthrough
CT: control target
= control target key end

     0   :  { %s2346_s1 = inlined_call_operand.vmem [shape: bf16[128,512], index: 1, kind: input, shape index: {}]   ;;  %s2347_s0 = inlined_call_operand.vmem [shape: bf16[8,8,512], index: 0, kind: input, shape index: {}]   ;;  %s2348_s2 = inlined_call_operand.vmem [shape: f32[1,512], index: 2, kind: input, shape index: {}]   ;;  %s2349_s3 = inlined_call_operand.vmem [shape: bf16[8,8,128], index: 3, kind: output, shape index: {}]  }
   0x1   :  { %v1426_v0 = vld [vmem:[%s2346_s1 + $0xe0] sm:$0xf]  ;;  %v1508_v1 = vld [vmem:[%s2346_s1 + $0xec] sm:$0xf0]  ;;  %v1506_v2 = vld [vmem:[%s2346_s1 + $0xe4] sm:$0xf] }
   0x2   :  { %v1692_v3 = vor.u32 %v1508_v1, %v1426_v0  ;;  %v1428_v4 = vld [vmem:[%s2346_s1 + $0xf0] sm:$0xf0]  ;;  %v1434_v5 = vld [vmem:[%s2346_s1 + $0xe8] sm:$0xf]  ;;  %v1509_v6 = vld [vmem:[%s2346_s1 + $0xf4] sm:$0xf0] }
   0x3   :  { %v1703_v7 = vor.u32 %v1506_v2, %v1428_v4  ;;  %v1705_v8 = vor.u32 %v1509_v6, %v1434_v5  ;;  %v1410_v9 = vld [vmem:[%s2346_s1 + $0xc0] sm:$0xf]  ;;  %v1504_v10 = vld [vmem:[%s2346_s1 + $0xcc] sm:$0xf0]  ;;  %v1502_v11 = vld [vmem:[%s2346_s1 + $0xc4] sm:$0xf] }
   0x4   :  { %231 = vmatpush.bf16.msra.mxu0 %v1692_v3  ;;  %v1717_v12 = vor.u32 %v1504_v10, %v1410_v9  ;;  %v1412_v13 = vld [vmem:[%s2346_s1 + $0xd0] sm:$0xf0]  ;;  %v1418_v14 = vld [vmem:[%s2346_s1 + $0xc8] sm:$0xf]  ;;  %v1505_v15 = vld [vmem:[%s2346_s1 + $0xd4] sm:$0xf0] }
   0x5   :  { %244 = vmatpush.bf16.msra.mxu1 %v1703_v7  ;;  %257 = vmatpush.bf16.msra.mxu2 %v1705_v8  ;;  %v1730_v16 = vor.u32 %v1502_v11, %v1412_v13  ;;  %v1732_v17 = vor.u32 %v1505_v15, %v1418_v14  ;;  %v1507_v18 = vld [vmem:[%s2346_s1 + $0xec] sm:$0xf]  ;;  %v1436_v19 = vld [vmem:[%s2346_s1 + $0xf8] sm:$0xf0]  ;;  %v1394_v20 = vld [vmem:[%s2346_s1 + $0xa0] sm:$0xf] }
   0x6   :  { %v1743_v21 = vor.u32 %v1507_v18, %v1436_v19  ;;  %v1500_v22 = vld [vmem:[%s2346_s1 + $0xac] sm:$0xf0]  ;;  %v1498_v23 = vld [vmem:[%s2346_s1 + $0xa4] sm:$0xf]  ;;  %v1396_v24 = vld [vmem:[%s2346_s1 + $0xb0] sm:$0xf0] }
   0x7   :  { %v1402_v25 = vld [vmem:[%s2346_s1 + $0xa8] sm:$0xf]  ;;  %v1501_v26 = vld [vmem:[%s2346_s1 + $0xb4] sm:$0xf0]  ;;  %v1503_v27 = vld [vmem:[%s2346_s1 + $0xcc] sm:$0xf]  ;;  %v1765_v28 = vor.u32 %v1500_v22, %v1394_v20  ;;  %v1778_v32 = vor.u32 %v1498_v23, %v1396_v24 }
   0x8   :  { %232 = vmatpush.bf16.msra.mxu0 %v1717_v12  ;;  %270 = vmatpush.bf16.msra.mxu3 %v1743_v21  ;;  %v1420_v29 = vld [vmem:[%s2346_s1 + $0xd8] sm:$0xf0]  ;;  %v1378_v30 = vld [vmem:[%s2346_s1 + $0x80] sm:$0xf]  ;;  %v1496_v31 = vld [vmem:[%s2346_s1 + $0x8c] sm:$0xf0]  ;;  %v1780_v33 = vor.u32 %v1501_v26, %v1402_v25 }
   0x9   :  { %245 = vmatpush.bf16.msra.mxu1 %v1730_v16  ;;  %258 = vmatpush.bf16.msra.mxu2 %v1732_v17  ;;  %v1782_v34 = vor.u32 %v1503_v27, %v1420_v29  ;;  %v1494_v35 = vld [vmem:[%s2346_s1 + $0x84] sm:$0xf]  ;;  %v1380_v36 = vld [vmem:[%s2346_s1 + $0x90] sm:$0xf0]  ;;  %v1386_v37 = vld [vmem:[%s2346_s1 + $0x88] sm:$0xf]  ;;  %v1804_v41 = vor.u32 %v1496_v31, %v1378_v30 }
   0xa   :  { %v1497_v38 = vld [vmem:[%s2346_s1 + $0x94] sm:$0xf0]  ;;  %v1499_v39 = vld [vmem:[%s2346_s1 + $0xac] sm:$0xf]  ;;  %v1404_v40 = vld [vmem:[%s2346_s1 + $0xb8] sm:$0xf0]  ;;  %v1816_v45 = vor.u32 %v1494_v35, %v1380_v36 }
   0xb   :  { %v1806_v42 = vor.u32 %v1499_v39, %v1404_v40  ;;  %v1362_v43 = vld [vmem:[%s2346_s1 + $0x60] sm:$0xf]  ;;  %v1492_v44 = vld [vmem:[%s2346_s1 + $0x6c] sm:$0xf0]  ;;  %v1818_v46 = vor.u32 %v1497_v38, %v1386_v37  ;;  %v1490_v47 = vld [vmem:[%s2346_s1 + $0x64] sm:$0xf] }
   0xc   :  { %233 = vmatpush.bf16.msra.mxu0 %v1765_v28  ;;  %271 = vmatpush.bf16.msra.mxu3 %v1782_v34  ;;  %v1495_v48 = vld [vmem:[%s2346_s1 + $0x8c] sm:$0xf]  ;;  %v1388_v49 = vld [vmem:[%s2346_s1 + $0x98] sm:$0xf0]  ;;  %v1364_v50 = vld [vmem:[%s2346_s1 + $0x70] sm:$0xf0]  ;;  %v1840_v53 = vor.u32 %v1492_v44, %v1362_v43 }
   0xd   :  { %246 = vmatpush.bf16.msra.mxu1 %v1778_v32  ;;  %259 = vmatpush.bf16.msra.mxu2 %v1780_v33  ;;  %v1370_v51 = vld [vmem:[%s2346_s1 + $0x68] sm:$0xf]  ;;  %v1493_v52 = vld [vmem:[%s2346_s1 + $0x74] sm:$0xf0]  ;;  %v1842_v54 = vor.u32 %v1495_v48, %v1388_v49  ;;  %v1346_v55 = vld [vmem:[%s2346_s1 + $0x40] sm:$0xf]  ;;  %v1852_v57 = vor.u32 %v1490_v47, %v1364_v50 }
   0xe   :  { %v1488_v56 = vld [vmem:[%s2346_s1 + $0x4c] sm:$0xf0]  ;;  %v1854_v58 = vor.u32 %v1493_v52, %v1370_v51  ;;  %v1486_v59 = vld [vmem:[%s2346_s1 + $0x44] sm:$0xf]  ;;  %v1491_v60 = vld [vmem:[%s2346_s1 + $0x6c] sm:$0xf] }
   0xf   :  { %v1372_v61 = vld [vmem:[%s2346_s1 + $0x78] sm:$0xf0]  ;;  %v1348_v62 = vld [vmem:[%s2346_s1 + $0x50] sm:$0xf0]  ;;  %v1354_v63 = vld [vmem:[%s2346_s1 + $0x48] sm:$0xf]  ;;  %v1876_v1 = vor.u32 %v1488_v56, %v1346_v55 }
  0x10   :  { %234 = vmatpush.bf16.msra.mxu0 %v1804_v41  ;;  %272 = vmatpush.bf16.msra.mxu3 %v1806_v42  ;;  %v1489_v0 = vld [vmem:[%s2346_s1 + $0x54] sm:$0xf0]  ;;  %v1878_v2 = vor.u32 %v1491_v60, %v1372_v61  ;;  %v1330_v4 = vld [vmem:[%s2346_s1 + $0x20] sm:$0xf]  ;;  %v1484_v5 = vld [vmem:[%s2346_s1 + $0x2c] sm:$0xf0]  ;;  %v1888_v6 = vor.u32 %v1486_v59, %v1348_v62 }
  0x11   :  { %247 = vmatpush.bf16.msra.mxu1 %v1816_v45  ;;  %260 = vmatpush.bf16.msra.mxu2 %v1818_v46  ;;  %v1890_v9 = vor.u32 %v1489_v0, %v1354_v63  ;;  %v1482_v10 = vld [vmem:[%s2346_s1 + $0x24] sm:$0xf]  ;;  %v1487_v11 = vld [vmem:[%s2346_s1 + $0x4c] sm:$0xf]  ;;  %v1356_v13 = vld [vmem:[%s2346_s1 + $0x58] sm:$0xf0]  ;;  %v1912_v19 = vor.u32 %v1484_v5, %v1330_v4 }
  0x12   :  { %v1332_v14 = vld [vmem:[%s2346_s1 + $0x30] sm:$0xf0]  ;;  %v1338_v15 = vld [vmem:[%s2346_s1 + $0x28] sm:$0xf]  ;;  %v1485_v18 = vld [vmem:[%s2346_s1 + $0x34] sm:$0xf0]  ;;  %v1914_v20 = vor.u32 %v1487_v11, %v1356_v13 }
  0x13   :  { %v1314_v22 = vld [vmem:[%s2346_s1] sm:$0xf]  ;;  %v1480_v23 = vld [vmem:[%s2346_s1 + $0xc] sm:$0xf0]  ;;  %v1924_v24 = vor.u32 %v1482_v10, %v1332_v14  ;;  %v1926_v25 = vor.u32 %v1485_v18, %v1338_v15  ;;  %v1478_v26 = vld [vmem:[%s2346_s1 + $0x4] sm:$0xf] }
  0x14   :  { %235 = vmatpush.bf16.msra.mxu0 %v1840_v53  ;;  %273 = vmatpush.bf16.msra.mxu3 %v1842_v54  ;;  %v1483_v27 = vld [vmem:[%s2346_s1 + $0x2c] sm:$0xf]  ;;  %v1340_v29 = vld [vmem:[%s2346_s1 + $0x38] sm:$0xf0]  ;;  %v1316_v30 = vld [vmem:[%s2346_s1 + $0x10] sm:$0xf0]  ;;  %v1948_v36 = vor.u32 %v1480_v23, %v1314_v22 }
  0x15   :  { %248 = vmatpush.bf16.msra.mxu1 %v1852_v57  ;;  %261 = vmatpush.bf16.msra.mxu2 %v1854_v58  ;;  %v1322_v31 = vld [vmem:[%s2346_s1 + $0x8] sm:$0xf]  ;;  %v1481_v35 = vld [vmem:[%s2346_s1 + $0x14] sm:$0xf0]  ;;  %v1950_v37 = vor.u32 %v1483_v27, %v1340_v29  ;;  %v1954_v38 = vor.u32 %v1478_v26, %v1316_v30  ;;  %v1479_v40 = vld [vmem:[%s2346_s1 + $0xc] sm:$0xf] }
  0x16   :  { %v1956_v39 = vor.u32 %v1481_v35, %v1322_v31  ;;  %v1324_v43 = vld [vmem:[%s2346_s1 + $0x18] sm:$0xf0]  ;;  %v1662_v47 = vmov 0.0|0.0   ;;  %v65_v48 = vld [vmem:[%s2347_s0] sm:$0xff]  ;;  %v66_v61 = vld [vmem:[%s2347_s0 + $0x8] sm:$0xff] }
  0x17   :  { %v1968_v44 = vor.u32 %v1479_v40, %v1324_v43  ;;  %v52_v49 = vld [vmem:[%s2348_s2] sm:$0xf]  ;;  %v67_v50 = vunpack.c.l.bf16 %v65_v48  ;;  %v68_v51 = vunpack.c.h.bf16 %v65_v48  ;;  %v69_v4 = vunpack.c.l.bf16 %v66_v61 }
  0x18   :  { %236 = vmatpush.bf16.msra.mxu0 %v1876_v1  ;;  %274 = vmatpush.bf16.msra.mxu3 %v1878_v2  ;;  %v2041_v52 = vperm.slane %v52_v49, 0  ;;  %v2043_v56 = vperm.slane %v52_v49, 1  ;;  %v2050_v11 = vperm.slane %v52_v49, 2  ;;  %v70_v27 = vunpack.c.h.bf16 %v66_v61 }
  0x19   :  { %249 = vmatpush.bf16.msra.mxu1 %v1888_v6  ;;  %262 = vmatpush.bf16.msra.mxu2 %v1890_v9  ;;  %v2053_v43 = vperm.slane %v52_v49, 3 }
  0x1c   :  { %237 = vmatpush.bf16.msra.mxu0 %v1912_v19  ;;  %275 = vmatpush.bf16.msra.mxu3 %v1914_v20 }
  0x1d   :  { %250 = vmatpush.bf16.msra.mxu1 %v1924_v24  ;;  %263 = vmatpush.bf16.msra.mxu2 %v1926_v25 }
  0x20   :  { %238 = vmatpush.bf16.msra.mxu0 %v1948_v36  ;;  %276 = vmatpush.bf16.msra.mxu3 %v1950_v37 }
  0x21   :  { %251 = vmatpush.bf16.msra.mxu1 %v1954_v38  ;;  %264 = vmatpush.bf16.msra.mxu2 %v1956_v39 }
  0x23   :  { %239 = vmatmul.bf16.vlgmr.msra.gmra.mxu0 %v1662_v47 }
  0x24   :  { %363 = vmatpush.bf16.msrb.mxu0 %v1692_v3  ;;  %252 = vmatmul.bf16.vlgmr.msra.gmra.mxu1 %v1662_v47 }
  0x25   :  { %376 = vmatpush.bf16.msrb.mxu1 %v1703_v7  ;;  %389 = vmatpush.bf16.msrb.mxu2 %v1705_v8 }
  0x26   :  { %265 = vmatmul.bf16.vlgmr.msra.gmra.mxu2 %v1662_v47  ;;  %277 = vmatpush.bf16.msra.mxu3 %v1968_v44 }
  0x28   :  { %364 = vmatpush.bf16.msrb.mxu0 %v1717_v12 }
  0x29   :  { %377 = vmatpush.bf16.msrb.mxu1 %v1730_v16  ;;  %390 = vmatpush.bf16.msrb.mxu2 %v1732_v17 }
  0x2a   :  { %402 = vmatpush.bf16.msrb.mxu3 %v1743_v21 }
  0x2b   :  { %278 = vmatmul.bf16.vlgmr.msra.gmra.mxu3 %v1662_v47 }
  0x2c   :  { %365 = vmatpush.bf16.msrb.mxu0 %v1765_v28 }
  0x2d   :  { %378 = vmatpush.bf16.msrb.mxu1 %v1778_v32  ;;  %391 = vmatpush.bf16.msrb.mxu2 %v1780_v33 }
  0x2e   :  { %403 = vmatpush.bf16.msrb.mxu3 %v1782_v34 }
  0x30   :  { %366 = vmatpush.bf16.msrb.mxu0 %v1804_v41 }
  0x31   :  { %379 = vmatpush.bf16.msrb.mxu1 %v1816_v45  ;;  %392 = vmatpush.bf16.msrb.mxu2 %v1818_v46 }
  0x32   :  { %404 = vmatpush.bf16.msrb.mxu3 %v1806_v42 }
  0x34   :  { %367 = vmatpush.bf16.msrb.mxu0 %v1840_v53 }
  0x35   :  { %380 = vmatpush.bf16.msrb.mxu1 %v1852_v57  ;;  %393 = vmatpush.bf16.msrb.mxu2 %v1854_v58 }
  0x36   :  { %405 = vmatpush.bf16.msrb.mxu3 %v1842_v54 }
  0x38   :  { %368 = vmatpush.bf16.msrb.mxu0 %v1876_v1 }
  0x39   :  { %381 = vmatpush.bf16.msrb.mxu1 %v1888_v6  ;;  %394 = vmatpush.bf16.msrb.mxu2 %v1890_v9 }
  0x3a   :  { %406 = vmatpush.bf16.msrb.mxu3 %v1878_v2 }
  0x3c   :  { %369 = vmatpush.bf16.msrb.mxu0 %v1912_v19 }
  0x3d   :  { %382 = vmatpush.bf16.msrb.mxu1 %v1924_v24  ;;  %395 = vmatpush.bf16.msrb.mxu2 %v1926_v25 }
  0x3e   :  { %407 = vmatpush.bf16.msrb.mxu3 %v1914_v20 }
  0x40   :  { %370 = vmatpush.bf16.msrb.mxu0 %v1948_v36 }
  0x41   :  { %383 = vmatpush.bf16.msrb.mxu1 %v1954_v38  ;;  %396 = vmatpush.bf16.msrb.mxu2 %v1956_v39 }
  0x42   :  { %408 = vmatpush.bf16.msrb.mxu3 %v1950_v37 }
  0x44   :  { %496 = vmatpush.bf16.msra.mxu0 %v1692_v3 }
  0x45   :  { %509 = vmatpush.bf16.msra.mxu1 %v1703_v7  ;;  %522 = vmatpush.bf16.msra.mxu2 %v1705_v8 }
  0x46   :  { %409 = vmatpush.bf16.msrb.mxu3 %v1968_v44 }
  0x48   :  { %497 = vmatpush.bf16.msra.mxu0 %v1717_v12 }
  0x49   :  { %510 = vmatpush.bf16.msra.mxu1 %v1730_v16  ;;  %523 = vmatpush.bf16.msra.mxu2 %v1732_v17 }
  0x4a   :  { %535 = vmatpush.bf16.msra.mxu3 %v1743_v21 }
  0x4c   :  { %498 = vmatpush.bf16.msra.mxu0 %v1765_v28 }
  0x4d   :  { %511 = vmatpush.bf16.msra.mxu1 %v1778_v32  ;;  %524 = vmatpush.bf16.msra.mxu2 %v1780_v33 }
  0x4e   :  { %536 = vmatpush.bf16.msra.mxu3 %v1782_v34 }
  0x50   :  { %499 = vmatpush.bf16.msra.mxu0 %v1804_v41 }
  0x51   :  { %512 = vmatpush.bf16.msra.mxu1 %v1816_v45  ;;  %525 = vmatpush.bf16.msra.mxu2 %v1818_v46 }
  0x52   :  { %537 = vmatpush.bf16.msra.mxu3 %v1806_v42 }
  0x54   :  { %500 = vmatpush.bf16.msra.mxu0 %v1840_v53 }
  0x55   :  { %513 = vmatpush.bf16.msra.mxu1 %v1852_v57  ;;  %526 = vmatpush.bf16.msra.mxu2 %v1854_v58 }
  0x56   :  { %538 = vmatpush.bf16.msra.mxu3 %v1842_v54 }
  0x58   :  { %501 = vmatpush.bf16.msra.mxu0 %v1876_v1 }
  0x59   :  { %514 = vmatpush.bf16.msra.mxu1 %v1888_v6  ;;  %527 = vmatpush.bf16.msra.mxu2 %v1890_v9 }
  0x5a   :  { %539 = vmatpush.bf16.msra.mxu3 %v1878_v2 }
  0x5c   :  { %502 = vmatpush.bf16.msra.mxu0 %v1912_v19 }
  0x5d   :  { %515 = vmatpush.bf16.msra.mxu1 %v1924_v24  ;;  %528 = vmatpush.bf16.msra.mxu2 %v1926_v25 }
  0x5e   :  { %540 = vmatpush.bf16.msra.mxu3 %v1914_v20 }
  0x60   :  { %503 = vmatpush.bf16.msra.mxu0 %v1948_v36 }
  0x61   :  { %516 = vmatpush.bf16.msra.mxu1 %v1954_v38  ;;  %529 = vmatpush.bf16.msra.mxu2 %v1956_v39 }
  0x62   :  { %541 = vmatpush.bf16.msra.mxu3 %v1950_v37 }
  0x66   :  { %542 = vmatpush.bf16.msra.mxu3 %v1968_v44 }
  0xa0   :  { %v240_v55 = vpop.f32.mrf.mxu0 }
  0xa1   :  { %v241_v59 = vadd.f32 %v240_v55, %v67_v50  ;;  %v253_v60 = vpop.f32.mrf.mxu1 }
  0xa2   :  { %v254_v62 = vadd.f32 %v253_v60, %v68_v51 }
  0xa3   :  { %v283_v63 = vadd.f32 %v241_v59, %v2041_v52 }
  0xa4   :  { %v284_v0 = vadd.f32 %v254_v62, %v2043_v56 }
  0xa5   :  { %v1440_v5 = vmul.f32 -1.442695, %v283_v63 }
  0xa6   :  { %v1441_v10 = vmul.f32 -1.442695, %v284_v0 }
  0xa7   :  { %1534 = vpow2.f32 %v1440_v5 }
  0xa8   :  { %1536 = vpow2.f32 %v1441_v10  ;;  %v242_v15 = vpop.f32.mrf.mxu0 }
  0xa9   :  { %v266_v13 = vpop.f32.mrf.mxu2  ;;  %v255_v18 = vpop.f32.mrf.mxu1 }
  0xaa   :  { %v267_v14 = vadd.f32 %v266_v13, %v69_v4 }
  0xac   :  { %v285_v22 = vadd.f32 %v267_v14, %v2050_v11 }
  0xad   :  { %v1535_v29 = vpop.eup %1534 }
  0xae   :  { %v279_v23 = vpop.f32.mrf.mxu3  ;;  %v1442_v26 = vmul.f32 -1.442695, %v285_v22  ;;  %v1537_v30 = vpop.eup %1536  ;;  %v296_v31 = vadd.f32 1.0, %v1535_v29 }
  0xaf   :  { %v297_v35 = vadd.f32 1.0, %v1537_v30  ;;  %v280_v47 = vadd.f32 %v279_v23, %v70_v27 }
  0xb0   :  { %1538 = vpow2.f32 %v1442_v26  ;;  %v310_v4 = vand.u32 2147483648, %v296_v31  ;;  %v308_v49 = vand.u32 2147483647, %v296_v31  ;;  %vm304_vm2 = vweird.f32 %v296_v31 }
  0xb1   :  { %v268_v40 = vpop.f32.mrf.mxu2  ;;  %1540 = vrcp.f32 %v296_v31  ;;  %v286_v51 = vadd.f32 %v280_v47, %v2053_v43  ;;  %v325_v5 = vand.u32 2147483648, %v297_v35  ;;  %v323_v14 = vand.u32 2147483647, %v297_v35 }
  0xb2   :  { %1542 = vrcp.f32 %v297_v35  ;;  %vm319_vm3 = vweird.f32 %v297_v35  ;;  %v311_v26 = vor.u32 1.1754944e-38, %v310_v4  ;;  %vm309_vm5 = vcmp.eq.f32.partialorder %v308_v49, 8.507059e+37 }
  0xb3   :  { %v326_v29 = vor.u32 1.1754944e-38, %v325_v5  ;;  %vm324_vm7 = vcmp.eq.f32.partialorder %v323_v14, 8.507059e+37 }
  0xb6   :  { %v281_v48 = vpop.f32.mrf.mxu3  ;;  %v1539_v50 = vpop.eup %1538 }
  0xb7   :  { %v298_v55 = vadd.f32 1.0, %v1539_v50  ;;  %v1541_v59 = vpop.eup %1540 }
  0xb8   :  { %v1543_v60 = vpop.eup %1542  ;;  %v300_v62 = vmul.f32 %v1541_v59, %v296_v31  ;;  %vm305_vm0 = vweird.f32 %v1541_v59 }
  0xb9   :  { %1544 = vrcp.f32 %v298_v55  ;;  %v315_v61 = vmul.f32 %v1543_v60, %v297_v35  ;;  %vm320_vm1 = vweird.f32 %v1543_v60  ;;  %vm306_vm4 = vmor %vm304_vm2, %vm305_vm0  ;;  %v340_v35 = vand.u32 2147483648, %v298_v55 }
  0xba   :  { %1546 = vtanh.f32 %v286_v51  ;;  %v301_v63 = vsub.f32 1.0, %v300_v62  ;;  %vm321_vm6 = vmor %vm319_vm3, %vm320_vm1  ;;  %vm334_vm9 = vweird.f32 %v298_v55 }
  0xbb   :  { %v316_v0 = vsub.f32 1.0, %v315_v61  ;;  %v341_v4 = vor.u32 1.1754944e-38, %v340_v35 }
  0xbc   :  { %v302_v10 = vmul.f32 %v1541_v59, %v301_v63 }
  0xbd   :  { %v317_v13 = vmul.f32 %v1543_v60, %v316_v0  ;;  %v338_v0 = vand.u32 2147483647, %v298_v55 }
  0xbe   :  { %v303_v18 = vadd.f32 %v1541_v59, %v302_v10 }
  0xbf   :  { %v1545_v15 = vpop.eup %1544  ;;  %v318_v27 = vadd.f32 %v1543_v60, %v317_v13  ;;  %vm339_vm11 = vcmp.eq.f32.partialorder %v338_v0, 8.507059e+37 }
  0xc0   :  { %v1547_v22 = vpop.eup %1546  ;;  %v330_v23 = vmul.f32 %v1545_v15, %v298_v55  ;;  %v307_v30 = vsel %vm306_vm4, %v1541_v59, %v303_v18  ;;  %vm335_vm8 = vweird.f32 %v1545_v15  ;;  %v1443_v55 = vld [vmem:[%s2347_s0 + $0x10] sm:$0xff] }
  0xc1   :  { %v312_v47 = vsel %vm309_vm5, %v311_v26, %v307_v30  ;;  %v322_v48 = vsel %vm321_vm6, %v1543_v60, %v318_v27  ;;  %vm336_vm10 = vmor %vm334_vm9, %vm335_vm8  ;;  %v359_v13 = vunpack.c.l.bf16 %v1443_v55  ;;  %v360_v14 = vunpack.c.h.bf16 %v1443_v55  ;;  %v1444_v26 = vld [vmem:[%s2347_s0 + $0x18] sm:$0xff] }
  0xc2   :  { %v331_v40 = vsub.f32 1.0, %v330_v23  ;;  %v327_v50 = vsel %vm324_vm7, %v326_v29, %v322_v48  ;;  %v346_v51 = vmul.f32 %v1547_v22, %v312_v47  ;;  %v361_v30 = vunpack.c.l.bf16 %v1444_v26 }
  0xc3   :  { %v345_v62 = vmul.f32 0.0, %v327_v50 }
  0xc4   :  { %v332_v61 = vmul.f32 %v1545_v15, %v331_v40 }
  0xc5   :  { %v2056_v63 = vadd.f32 %v346_v51, %v345_v62 }
  0xc6   :  { %v333_v31 = vadd.f32 %v1545_v15, %v332_v61 }
  0xc7   :  { %1548 = vtanh.f32 %v2056_v63 }
  0xc8   :  { %v337_v59 = vsel %vm336_vm10, %v1545_v15, %v333_v31 }
  0xc9   :  { %v342_v60 = vsel %vm339_vm11, %v341_v4, %v337_v59 }
  0xcd   :  { %v1549_v5 = vpop.eup %1548 }
  0xce   :  { %v2059_v10 = vmul.f32 %v1549_v5, %v342_v60  ;;  %v362_v5 = vunpack.c.h.bf16 %v1444_v26 }
  0xd0   :  { %v355_v49 = vpack.c.bf16 %v2059_v10, %v2059_v10 }
  0xd2   :  { %371 = vmatmul.bf16.vlgmr.msrb.gmra.mxu0 %v355_v49  ;;  %384 = vmatmul.bf16.vlgmr.msrb.gmra.mxu1 %v355_v49 }
  0xd3   :  { %397 = vmatmul.bf16.vlgmr.msrb.gmra.mxu2 %v355_v49  ;;  %410 = vmatmul.bf16.vlgmr.msrb.gmra.mxu3 %v355_v49 }
  0xd4   :  { %629 = vmatpush.bf16.msrb.mxu0 %v1692_v3  ;;  %642 = vmatpush.bf16.msrb.mxu1 %v1703_v7 }
  0xd5   :  { %655 = vmatpush.bf16.msrb.mxu2 %v1705_v8  ;;  %668 = vmatpush.bf16.msrb.mxu3 %v1743_v21 }
  0xd8   :  { %630 = vmatpush.bf16.msrb.mxu0 %v1717_v12  ;;  %643 = vmatpush.bf16.msrb.mxu1 %v1730_v16 }
  0xd9   :  { %656 = vmatpush.bf16.msrb.mxu2 %v1732_v17  ;;  %669 = vmatpush.bf16.msrb.mxu3 %v1782_v34 }
  0xdc   :  { %631 = vmatpush.bf16.msrb.mxu0 %v1765_v28  ;;  %644 = vmatpush.bf16.msrb.mxu1 %v1778_v32 }
  0xdd   :  { %657 = vmatpush.bf16.msrb.mxu2 %v1780_v33  ;;  %670 = vmatpush.bf16.msrb.mxu3 %v1806_v42 }
  0xe0   :  { %632 = vmatpush.bf16.msrb.mxu0 %v1804_v41  ;;  %645 = vmatpush.bf16.msrb.mxu1 %v1816_v45 }
  0xe1   :  { %658 = vmatpush.bf16.msrb.mxu2 %v1818_v46  ;;  %671 = vmatpush.bf16.msrb.mxu3 %v1842_v54 }
  0xe4   :  { %633 = vmatpush.bf16.msrb.mxu0 %v1840_v53  ;;  %646 = vmatpush.bf16.msrb.mxu1 %v1852_v57 }
  0xe5   :  { %659 = vmatpush.bf16.msrb.mxu2 %v1854_v58  ;;  %672 = vmatpush.bf16.msrb.mxu3 %v1878_v2 }
  0xe8   :  { %634 = vmatpush.bf16.msrb.mxu0 %v1876_v1  ;;  %647 = vmatpush.bf16.msrb.mxu1 %v1888_v6 }
  0xe9   :  { %660 = vmatpush.bf16.msrb.mxu2 %v1890_v9  ;;  %673 = vmatpush.bf16.msrb.mxu3 %v1914_v20 }
  0xec   :  { %635 = vmatpush.bf16.msrb.mxu0 %v1912_v19  ;;  %648 = vmatpush.bf16.msrb.mxu1 %v1924_v24 }
  0xed   :  { %661 = vmatpush.bf16.msrb.mxu2 %v1926_v25  ;;  %674 = vmatpush.bf16.msrb.mxu3 %v1950_v37 }
  0xf0   :  { %636 = vmatpush.bf16.msrb.mxu0 %v1948_v36  ;;  %649 = vmatpush.bf16.msrb.mxu1 %v1954_v38 }
  0xf1   :  { %662 = vmatpush.bf16.msrb.mxu2 %v1956_v39  ;;  %675 = vmatpush.bf16.msrb.mxu3 %v1968_v44 }
 0x14f   :  { %v372_v15 = vpop.f32.mrf.mxu0  ;;  %v385_v18 = vpop.f32.mrf.mxu1 }
 0x150   :  { %v373_v22 = vadd.f32 %v372_v15, %v359_v13  ;;  %v386_v23 = vadd.f32 %v385_v18, %v360_v14 }
 0x152   :  { %v415_v27 = vadd.f32 %v373_v22, %v2041_v52  ;;  %v416_v29 = vadd.f32 %v386_v23, %v2043_v56 }
 0x154   :  { %v1445_v40 = vmul.f32 -1.442695, %v415_v27  ;;  %v1446_v47 = vmul.f32 -1.442695, %v416_v29 }
 0x156   :  { %1550 = vpow2.f32 %v1445_v40  ;;  %v398_v48 = vpop.f32.mrf.mxu2  ;;  %v411_v50 = vpop.f32.mrf.mxu3 }
 0x157   :  { %1552 = vpow2.f32 %v1446_v47  ;;  %v399_v51 = vadd.f32 %v398_v48, %v361_v30  ;;  %v374_v62 = vpop.f32.mrf.mxu0  ;;  %v387_v61 = vpop.f32.mrf.mxu1  ;;  %v412_v13 = vadd.f32 %v411_v50, %v362_v5 }
 0x159   :  { %v417_v31 = vadd.f32 %v399_v51, %v2050_v11  ;;  %v418_v22 = vadd.f32 %v412_v13, %v2053_v43 }
 0x15b   :  { %v1447_v35 = vmul.f32 -1.442695, %v417_v31 }
 0x15c   :  { %v1551_v0 = vpop.eup %1550 }
 0x15d   :  { %v1553_v59 = vpop.eup %1552  ;;  %v428_v4 = vadd.f32 1.0, %v1551_v0  ;;  %1554 = vpow2.f32 %v1447_v35 }
 0x15e   :  { %v429_v60 = vadd.f32 1.0, %v1553_v59  ;;  %v400_v49 = vpop.f32.mrf.mxu2  ;;  %v413_v55 = vpop.f32.mrf.mxu3 }
 0x15f   :  { %1556 = vrcp.f32 %v428_v4  ;;  %v442_v47 = vand.u32 2147483648, %v428_v4  ;;  %v440_v51 = vand.u32 2147483647, %v428_v4  ;;  %vm436_vm14 = vweird.f32 %v428_v4 }
 0x160   :  { %1558 = vrcp.f32 %v429_v60  ;;  %v457_v26 = vand.u32 2147483648, %v429_v60  ;;  %v455_v50 = vand.u32 2147483647, %v429_v60  ;;  %vm451_vm15 = vweird.f32 %v429_v60 }
 0x161   :  { %v443_v0 = vor.u32 1.1754944e-38, %v442_v47  ;;  %vm441_vm2 = vcmp.eq.f32.partialorder %v440_v51, 8.507059e+37 }
 0x162   :  { %v458_v5 = vor.u32 1.1754944e-38, %v457_v26  ;;  %vm456_vm3 = vcmp.eq.f32.partialorder %v455_v50, 8.507059e+37 }
 0x163   :  { %v1555_v14 = vpop.eup %1554 }
 0x164   :  { %v430_v15 = vadd.f32 1.0, %v1555_v14 }
 0x165   :  { %v1557_v18 = vpop.eup %1556 }
 0x166   :  { %v1559_v23 = vpop.eup %1558  ;;  %v432_v27 = vmul.f32 %v1557_v18, %v428_v4  ;;  %1560 = vrcp.f32 %v430_v15  ;;  %vm437_vm12 = vweird.f32 %v1557_v18  ;;  %v472_v47 = vand.u32 2147483648, %v430_v15 }
 0x167   :  { %v447_v29 = vmul.f32 %v1559_v23, %v429_v60  ;;  %1562 = vtanh.f32 %v418_v22  ;;  %vm452_vm13 = vweird.f32 %v1559_v23  ;;  %vm438_vm0 = vmor %vm436_vm14, %vm437_vm12  ;;  %vm466_vm5 = vweird.f32 %v430_v15 }
 0x168   :  { %v433_v30 = vsub.f32 1.0, %v432_v27  ;;  %vm453_vm1 = vmor %vm451_vm15, %vm452_vm13 }
 0x169   :  { %v448_v40 = vsub.f32 1.0, %v447_v29 }
 0x16a   :  { %v434_v48 = vmul.f32 %v1557_v18, %v433_v30 }
 0x16b   :  { %v449_v62 = vmul.f32 %v1559_v23, %v448_v40 }
 0x16c   :  { %v1561_v61 = vpop.eup %1560  ;;  %v435_v31 = vadd.f32 %v1557_v18, %v434_v48  ;;  %v473_v48 = vor.u32 1.1754944e-38, %v472_v47 }
 0x16d   :  { %v462_v35 = vmul.f32 %v1561_v61, %v430_v15  ;;  %v450_v59 = vadd.f32 %v1559_v23, %v449_v62  ;;  %v1563_v55 = vpop.eup %1562  ;;  %vm467_vm4 = vweird.f32 %v1561_v61 }
 0x16e   :  { %v439_v49 = vsel %vm438_vm0, %v1557_v18, %v435_v31  ;;  %v470_v18 = vand.u32 2147483647, %v430_v15  ;;  %vm468_vm6 = vmor %vm466_vm5, %vm467_vm4 }
 0x16f   :  { %v463_v13 = vsub.f32 1.0, %v462_v35  ;;  %v444_v14 = vsel %vm441_vm2, %v443_v0, %v439_v49  ;;  %v454_v22 = vsel %vm453_vm1, %v1559_v23, %v450_v59 }
 0x170   :  { %v459_v27 = vsel %vm456_vm3, %v458_v5, %v454_v22  ;;  %v478_v29 = vmul.f32 %v1563_v55, %v444_v14  ;;  %vm471_vm7 = vcmp.eq.f32.partialorder %v470_v18, 8.507059e+37  ;;  %v1449_v5 = vld [vmem:[%s2347_s0 + $0x28] sm:$0xff] }
 0x171   :  { %v477_v30 = vmul.f32 %v459_v27, %v2056_v63  ;;  %v464_v40 = vmul.f32 %v1561_v61, %v463_v13  ;;  %v494_v13 = vunpack.c.l.bf16 %v1449_v5 }
 0x173   :  { %v2106_v4 = vadd.f32 %v478_v29, %v477_v30  ;;  %v465_v60 = vadd.f32 %v1561_v61, %v464_v40 }
 0x175   :  { %1564 = vtanh.f32 %v2106_v4  ;;  %v469_v26 = vsel %vm468_vm6, %v1561_v61, %v465_v60 }
 0x176   :  { %v474_v51 = vsel %vm471_vm7, %v473_v48, %v469_v26 }
 0x17b   :  { %v1565_v23 = vpop.eup %1564 }
 0x17c   :  { %v481_v62 = vmul.f32 %v1565_v23, %v474_v51  ;;  %v495_v51 = vunpack.c.h.bf16 %v1449_v5 }
 0x17e   :  { %v488_v50 = vpack.c.bf16 %v481_v62, %v481_v62  ;;  %v1513_v63 = vpack.c.bf16 %v481_v62, %v2059_v10  ;;  %v1448_v10 = vld [vmem:[%s2347_s0 + $0x20] sm:$0xff] }
 0x17f   :  { %v492_v15 = vunpack.c.l.bf16 %v1448_v10  ;;  %v493_v61 = vunpack.c.h.bf16 %v1448_v10 }
 0x180   :  { %504 = vmatmul.bf16.vlgmr.msra.gmra.mxu0 %v488_v50  ;;  %1514 = vst [vmem:[%s2349_s3] sm:$0xff] %v1513_v63   ;;  %517 = vmatmul.bf16.vlgmr.msra.gmra.mxu1 %v488_v50 }
 0x181   :  { %530 = vmatmul.bf16.vlgmr.msra.gmra.mxu2 %v488_v50  ;;  %543 = vmatmul.bf16.vlgmr.msra.gmra.mxu3 %v488_v50 }
 0x182   :  { %762 = vmatpush.bf16.msra.mxu0 %v1692_v3  ;;  %775 = vmatpush.bf16.msra.mxu1 %v1703_v7 }
 0x183   :  { %788 = vmatpush.bf16.msra.mxu2 %v1705_v8  ;;  %801 = vmatpush.bf16.msra.mxu3 %v1743_v21 }
 0x186   :  { %763 = vmatpush.bf16.msra.mxu0 %v1717_v12  ;;  %776 = vmatpush.bf16.msra.mxu1 %v1730_v16 }
 0x187   :  { %789 = vmatpush.bf16.msra.mxu2 %v1732_v17  ;;  %802 = vmatpush.bf16.msra.mxu3 %v1782_v34 }
 0x18a   :  { %764 = vmatpush.bf16.msra.mxu0 %v1765_v28  ;;  %777 = vmatpush.bf16.msra.mxu1 %v1778_v32 }
 0x18b   :  { %790 = vmatpush.bf16.msra.mxu2 %v1780_v33  ;;  %803 = vmatpush.bf16.msra.mxu3 %v1806_v42 }
 0x18e   :  { %765 = vmatpush.bf16.msra.mxu0 %v1804_v41  ;;  %778 = vmatpush.bf16.msra.mxu1 %v1816_v45 }
 0x18f   :  { %791 = vmatpush.bf16.msra.mxu2 %v1818_v46  ;;  %804 = vmatpush.bf16.msra.mxu3 %v1842_v54 }
 0x192   :  { %766 = vmatpush.bf16.msra.mxu0 %v1840_v53  ;;  %779 = vmatpush.bf16.msra.mxu1 %v1852_v57 }
 0x193   :  { %792 = vmatpush.bf16.msra.mxu2 %v1854_v58  ;;  %805 = vmatpush.bf16.msra.mxu3 %v1878_v2 }
 0x196   :  { %767 = vmatpush.bf16.msra.mxu0 %v1876_v1  ;;  %780 = vmatpush.bf16.msra.mxu1 %v1888_v6 }
 0x197   :  { %793 = vmatpush.bf16.msra.mxu2 %v1890_v9  ;;  %806 = vmatpush.bf16.msra.mxu3 %v1914_v20 }
 0x19a   :  { %768 = vmatpush.bf16.msra.mxu0 %v1912_v19  ;;  %781 = vmatpush.bf16.msra.mxu1 %v1924_v24 }
 0x19b   :  { %794 = vmatpush.bf16.msra.mxu2 %v1926_v25  ;;  %807 = vmatpush.bf16.msra.mxu3 %v1950_v37 }
 0x19e   :  { %769 = vmatpush.bf16.msra.mxu0 %v1948_v36  ;;  %782 = vmatpush.bf16.msra.mxu1 %v1954_v38 }
 0x19f   :  { %795 = vmatpush.bf16.msra.mxu2 %v1956_v39  ;;  %808 = vmatpush.bf16.msra.mxu3 %v1968_v44 }
 0x1fd   :  { %v505_v31 = vpop.f32.mrf.mxu0  ;;  %v518_v35 = vpop.f32.mrf.mxu1 }
 0x1fe   :  { %v506_v0 = vadd.f32 %v505_v31, %v492_v15  ;;  %v519_v59 = vadd.f32 %v518_v35, %v493_v61 }
 0x200   :  { %v548_v49 = vadd.f32 %v506_v0, %v2041_v52  ;;  %v549_v55 = vadd.f32 %v519_v59, %v2043_v56 }
 0x202   :  { %v1450_v14 = vmul.f32 -1.442695, %v548_v49  ;;  %v1451_v22 = vmul.f32 -1.442695, %v549_v55 }
 0x204   :  { %1566 = vpow2.f32 %v1450_v14  ;;  %v531_v27 = vpop.f32.mrf.mxu2  ;;  %v544_v29 = vpop.f32.mrf.mxu3 }
 0x205   :  { %1568 = vpow2.f32 %v1451_v22  ;;  %v532_v30 = vadd.f32 %v531_v27, %v494_v13  ;;  %v507_v40 = vpop.f32.mrf.mxu0  ;;  %v520_v60 = vpop.f32.mrf.mxu1  ;;  %v545_v10 = vadd.f32 %v544_v29, %v495_v51 }
 0x207   :  { %v550_v47 = vadd.f32 %v532_v30, %v2050_v11  ;;  %v551_v35 = vadd.f32 %v545_v10, %v2053_v43 }
 0x209   :  { %v1452_v18 = vmul.f32 -1.442695, %v550_v47 }
 0x20a   :  { %v1567_v26 = vpop.eup %1566 }
 0x20b   :  { %v1569_v48 = vpop.eup %1568  ;;  %v561_v23 = vadd.f32 1.0, %v1567_v26  ;;  %1570 = vpow2.f32 %v1452_v18 }
 0x20c   :  { %v562_v62 = vadd.f32 1.0, %v1569_v48  ;;  %v533_v50 = vpop.f32.mrf.mxu2  ;;  %v546_v63 = vpop.f32.mrf.mxu3 }
 0x20d   :  { %1572 = vrcp.f32 %v561_v23  ;;  %v575_v14 = vand.u32 2147483648, %v561_v23  ;;  %v573_v27 = vand.u32 2147483647, %v561_v23  ;;  %vm569_vm10 = vweird.f32 %v561_v23 }
 0x20e   :  { %1574 = vrcp.f32 %v562_v62  ;;  %v590_v5 = vand.u32 2147483648, %v562_v62  ;;  %v588_v29 = vand.u32 2147483647, %v562_v62  ;;  %vm584_vm11 = vweird.f32 %v562_v62 }
 0x20f   :  { %v576_v18 = vor.u32 1.1754944e-38, %v575_v14  ;;  %vm574_vm14 = vcmp.eq.f32.partialorder %v573_v27, 8.507059e+37 }
 0x210   :  { %v591_v48 = vor.u32 1.1754944e-38, %v590_v5  ;;  %vm589_vm15 = vcmp.eq.f32.partialorder %v588_v29, 8.507059e+37 }
 0x211   :  { %v1571_v15 = vpop.eup %1570 }
 0x212   :  { %v563_v61 = vadd.f32 1.0, %v1571_v15 }
 0x213   :  { %v1573_v31 = vpop.eup %1572 }
 0x214   :  { %v1575_v0 = vpop.eup %1574  ;;  %v565_v59 = vmul.f32 %v1573_v31, %v561_v23  ;;  %1576 = vrcp.f32 %v563_v61  ;;  %vm570_vm8 = vweird.f32 %v1573_v31  ;;  %vm599_vm1 = vweird.f32 %v563_v61 }
 0x215   :  { %v580_v49 = vmul.f32 %v1575_v0, %v562_v62  ;;  %1578 = vtanh.f32 %v551_v35  ;;  %vm585_vm9 = vweird.f32 %v1575_v0  ;;  %vm571_vm12 = vmor %vm569_vm10, %vm570_vm8 }
 0x216   :  { %v566_v55 = vsub.f32 1.0, %v565_v59  ;;  %vm586_vm13 = vmor %vm584_vm11, %vm585_vm9 }
 0x217   :  { %v581_v13 = vsub.f32 1.0, %v580_v49 }
 0x218   :  { %v567_v22 = vmul.f32 %v1573_v31, %v566_v55 }
 0x219   :  { %v582_v30 = vmul.f32 %v1575_v0, %v581_v13  ;;  %v605_v13 = vand.u32 2147483648, %v563_v61 }
 0x21a   :  { %v1577_v40 = vpop.eup %1576  ;;  %v568_v60 = vadd.f32 %v1573_v31, %v567_v22 }
 0x21b   :  { %v595_v47 = vmul.f32 %v1577_v40, %v563_v61  ;;  %v583_v26 = vadd.f32 %v1575_v0, %v582_v30  ;;  %v1579_v50 = vpop.eup %1578  ;;  %vm600_vm0 = vweird.f32 %v1577_v40  ;;  %v606_v5 = vor.u32 1.1754944e-38, %v605_v13 }
 0x21c   :  { %v572_v51 = vsel %vm571_vm12, %v1573_v31, %v568_v60  ;;  %v603_v31 = vand.u32 2147483647, %v563_v61  ;;  %vm601_vm2 = vmor %vm599_vm1, %vm600_vm0  ;;  %v1453_v61 = vld [vmem:[%s2347_s0 + $0x30] sm:$0xff] }
 0x21d   :  { %v596_v63 = vsub.f32 1.0, %v595_v47  ;;  %v577_v10 = vsel %vm574_vm14, %v576_v18, %v572_v51  ;;  %v587_v15 = vsel %vm586_vm13, %v1575_v0, %v583_v26  ;;  %v625_v30 = vunpack.c.l.bf16 %v1453_v61  ;;  %v1454_v26 = vld [vmem:[%s2347_s0 + $0x38] sm:$0xff] }
 0x21e   :  { %v592_v35 = vsel %vm589_vm15, %v591_v48, %v587_v15  ;;  %v611_v59 = vmul.f32 %v1579_v50, %v577_v10  ;;  %vm604_vm3 = vcmp.eq.f32.partialorder %v603_v31, 8.507059e+37  ;;  %v626_v29 = vunpack.c.h.bf16 %v1453_v61 }
 0x21f   :  { %v610_v49 = vmul.f32 %v592_v35, %v2106_v4  ;;  %v597_v55 = vmul.f32 %v1577_v40, %v596_v63  ;;  %v627_v50 = vunpack.c.l.bf16 %v1454_v26 }
 0x221   :  { %v2156_v23 = vadd.f32 %v611_v59, %v610_v49  ;;  %v598_v62 = vadd.f32 %v1577_v40, %v597_v55 }
 0x223   :  { %1580 = vtanh.f32 %v2156_v23  ;;  %v602_v14 = vsel %vm601_vm2, %v1577_v40, %v598_v62 }
 0x224   :  { %v607_v22 = vsel %vm604_vm3, %v606_v5, %v602_v14 }
 0x229   :  { %v1581_v0 = vpop.eup %1580 }
 0x22a   :  { %v2159_v27 = vmul.f32 %v1581_v0, %v607_v22  ;;  %v628_v0 = vunpack.c.h.bf16 %v1454_v26 }
 0x22c   :  { %v621_v4 = vpack.c.bf16 %v2159_v27, %v2159_v27 }
 0x22e   :  { %637 = vmatmul.bf16.vlgmr.msrb.gmra.mxu0 %v621_v4  ;;  %650 = vmatmul.bf16.vlgmr.msrb.gmra.mxu1 %v621_v4 }
 0x22f   :  { %663 = vmatmul.bf16.vlgmr.msrb.gmra.mxu2 %v621_v4  ;;  %676 = vmatmul.bf16.vlgmr.msrb.gmra.mxu3 %v621_v4 }
 0x230   :  { %895 = vmatpush.bf16.msrb.mxu0 %v1692_v3  ;;  %908 = vmatpush.bf16.msrb.mxu1 %v1703_v7 }
 0x231   :  { %921 = vmatpush.bf16.msrb.mxu2 %v1705_v8  ;;  %934 = vmatpush.bf16.msrb.mxu3 %v1743_v21 }
 0x234   :  { %896 = vmatpush.bf16.msrb.mxu0 %v1717_v12  ;;  %909 = vmatpush.bf16.msrb.mxu1 %v1730_v16 }
 0x235   :  { %922 = vmatpush.bf16.msrb.mxu2 %v1732_v17  ;;  %935 = vmatpush.bf16.msrb.mxu3 %v1782_v34 }
 0x238   :  { %897 = vmatpush.bf16.msrb.mxu0 %v1765_v28  ;;  %910 = vmatpush.bf16.msrb.mxu1 %v1778_v32 }
 0x239   :  { %923 = vmatpush.bf16.msrb.mxu2 %v1780_v33  ;;  %936 = vmatpush.bf16.msrb.mxu3 %v1806_v42 }
 0x23c   :  { %898 = vmatpush.bf16.msrb.mxu0 %v1804_v41  ;;  %911 = vmatpush.bf16.msrb.mxu1 %v1816_v45 }
 0x23d   :  { %924 = vmatpush.bf16.msrb.mxu2 %v1818_v46  ;;  %937 = vmatpush.bf16.msrb.mxu3 %v1842_v54 }
 0x240   :  { %899 = vmatpush.bf16.msrb.mxu0 %v1840_v53  ;;  %912 = vmatpush.bf16.msrb.mxu1 %v1852_v57 }
 0x241   :  { %925 = vmatpush.bf16.msrb.mxu2 %v1854_v58  ;;  %938 = vmatpush.bf16.msrb.mxu3 %v1878_v2 }
 0x244   :  { %900 = vmatpush.bf16.msrb.mxu0 %v1876_v1  ;;  %913 = vmatpush.bf16.msrb.mxu1 %v1888_v6 }
 0x245   :  { %926 = vmatpush.bf16.msrb.mxu2 %v1890_v9  ;;  %939 = vmatpush.bf16.msrb.mxu3 %v1914_v20 }
 0x248   :  { %901 = vmatpush.bf16.msrb.mxu0 %v1912_v19  ;;  %914 = vmatpush.bf16.msrb.mxu1 %v1924_v24 }
 0x249   :  { %927 = vmatpush.bf16.msrb.mxu2 %v1926_v25  ;;  %940 = vmatpush.bf16.msrb.mxu3 %v1950_v37 }
 0x24c   :  { %902 = vmatpush.bf16.msrb.mxu0 %v1948_v36  ;;  %915 = vmatpush.bf16.msrb.mxu1 %v1954_v38 }
 0x24d   :  { %928 = vmatpush.bf16.msrb.mxu2 %v1956_v39  ;;  %941 = vmatpush.bf16.msrb.mxu3 %v1968_v44 }
 0x2ab   :  { %v638_v40 = vpop.f32.mrf.mxu0  ;;  %v651_v60 = vpop.f32.mrf.mxu1 }
 0x2ac   :  { %v639_v47 = vadd.f32 %v638_v40, %v625_v30  ;;  %v652_v18 = vadd.f32 %v651_v60, %v626_v29 }
 0x2ae   :  { %v681_v48 = vadd.f32 %v639_v47, %v2041_v52  ;;  %v682_v51 = vadd.f32 %v652_v18, %v2043_v56 }
 0x2b0   :  { %v1455_v63 = vmul.f32 -1.442695, %v681_v48  ;;  %v1456_v10 = vmul.f32 -1.442695, %v682_v51 }
 0x2b2   :  { %1582 = vpow2.f32 %v1455_v63  ;;  %v664_v15 = vpop.f32.mrf.mxu2  ;;  %v677_v35 = vpop.f32.mrf.mxu3 }
 0x2b3   :  { %1584 = vpow2.f32 %v1456_v10  ;;  %v665_v59 = vadd.f32 %v664_v15, %v627_v50  ;;  %v640_v49 = vpop.f32.mrf.mxu0  ;;  %v653_v55 = vpop.f32.mrf.mxu1  ;;  %v678_v30 = vadd.f32 %v677_v35, %v628_v0 }
 0x2b5   :  { %v683_v62 = vadd.f32 %v665_v59, %v2050_v11  ;;  %v684_v47 = vadd.f32 %v678_v30, %v2053_v43 }
 0x2b7   :  { %v1457_v13 = vmul.f32 -1.442695, %v683_v62 }
 0x2b8   :  { %v1583_v31 = vpop.eup %1582 }
 0x2b9   :  { %v1585_v14 = vpop.eup %1584  ;;  %v694_v5 = vadd.f32 1.0, %v1583_v31  ;;  %1586 = vpow2.f32 %v1457_v13 }
 0x2ba   :  { %v695_v22 = vadd.f32 1.0, %v1585_v14  ;;  %v666_v4 = vpop.f32.mrf.mxu2  ;;  %v679_v61 = vpop.f32.mrf.mxu3 }
 0x2bb   :  { %1588 = vrcp.f32 %v694_v5  ;;  %v708_v10 = vand.u32 2147483648, %v694_v5  ;;  %v706_v59 = vand.u32 2147483647, %v694_v5  ;;  %vm702_vm6 = vweird.f32 %v694_v5 }
 0x2bc   :  { %1590 = vrcp.f32 %v695_v22  ;;  %v723_v26 = vand.u32 2147483648, %v695_v22  ;;  %v721_v35 = vand.u32 2147483647, %v695_v22  ;;  %vm717_vm7 = vweird.f32 %v695_v22 }
 0x2bd   :  { %v709_v31 = vor.u32 1.1754944e-38, %v708_v10  ;;  %vm707_vm10 = vcmp.eq.f32.partialorder %v706_v59, 8.507059e+37 }
 0x2be   :  { %v724_v0 = vor.u32 1.1754944e-38, %v723_v26  ;;  %vm722_vm11 = vcmp.eq.f32.partialorder %v721_v35, 8.507059e+37 }
 0x2bf   :  { %v1587_v29 = vpop.eup %1586 }
 0x2c0   :  { %v696_v40 = vadd.f32 1.0, %v1587_v29 }
 0x2c1   :  { %v1589_v60 = vpop.eup %1588 }
 0x2c2   :  { %v1591_v18 = vpop.eup %1590  ;;  %v698_v48 = vmul.f32 %v1589_v60, %v694_v5  ;;  %1592 = vrcp.f32 %v696_v40  ;;  %vm703_vm4 = vweird.f32 %v1589_v60  ;;  %v738_v10 = vand.u32 2147483648, %v696_v40 }
 0x2c3   :  { %v713_v51 = vmul.f32 %v1591_v18, %v695_v22  ;;  %1594 = vtanh.f32 %v684_v47  ;;  %vm718_vm5 = vweird.f32 %v1591_v18  ;;  %vm704_vm8 = vmor %vm702_vm6, %vm703_vm4  ;;  %vm732_vm13 = vweird.f32 %v696_v40 }
 0x2c4   :  { %v699_v50 = vsub.f32 1.0, %v698_v48  ;;  %vm719_vm9 = vmor %vm717_vm7, %vm718_vm5 }
 0x2c5   :  { %v714_v63 = vsub.f32 1.0, %v713_v51 }
 0x2c6   :  { %v700_v15 = vmul.f32 %v1589_v60, %v699_v50 }
 0x2c7   :  { %v715_v49 = vmul.f32 %v1591_v18, %v714_v63 }
 0x2c8   :  { %v1593_v55 = vpop.eup %1592  ;;  %v701_v62 = vadd.f32 %v1589_v60, %v700_v15  ;;  %v739_v15 = vor.u32 1.1754944e-38, %v738_v10 }
 0x2c9   :  { %v728_v13 = vmul.f32 %v1593_v55, %v696_v40  ;;  %v716_v14 = vadd.f32 %v1591_v18, %v715_v49  ;;  %v1595_v61 = vpop.eup %1594  ;;  %vm733_vm12 = vweird.f32 %v1593_v55 }
 0x2ca   :  { %v705_v4 = vsel %vm704_vm8, %v1589_v60, %v701_v62  ;;  %v736_v60 = vand.u32 2147483647, %v696_v40  ;;  %vm734_vm14 = vmor %vm732_vm13, %vm733_vm12 }
 0x2cb   :  { %v729_v30 = vsub.f32 1.0, %v728_v13  ;;  %v710_v29 = vsel %vm707_vm10, %v709_v31, %v705_v4  ;;  %v720_v47 = vsel %vm719_vm9, %v1591_v18, %v716_v14 }
 0x2cc   :  { %v725_v48 = vsel %vm722_vm11, %v724_v0, %v720_v47  ;;  %v744_v51 = vmul.f32 %v1595_v61, %v710_v29  ;;  %vm737_vm15 = vcmp.eq.f32.partialorder %v736_v60, 8.507059e+37  ;;  %v1459_v0 = vld [vmem:[%s2347_s0 + $0x48] sm:$0xff] }
 0x2cd   :  { %v743_v50 = vmul.f32 %v725_v48, %v2156_v23  ;;  %v730_v63 = vmul.f32 %v1593_v55, %v729_v30  ;;  %v760_v30 = vunpack.c.l.bf16 %v1459_v0 }
 0x2cf   :  { %v2206_v5 = vadd.f32 %v744_v51, %v743_v50  ;;  %v731_v22 = vadd.f32 %v1593_v55, %v730_v63 }
 0x2d1   :  { %1596 = vtanh.f32 %v2206_v5  ;;  %v735_v26 = vsel %vm734_vm14, %v1593_v55, %v731_v22 }
 0x2d2   :  { %v740_v59 = vsel %vm737_vm15, %v739_v15, %v735_v26 }
 0x2d7   :  { %v1597_v18 = vpop.eup %1596 }
 0x2d8   :  { %v747_v49 = vmul.f32 %v1597_v18, %v740_v59  ;;  %v761_v59 = vunpack.c.h.bf16 %v1459_v0 }
 0x2da   :  { %v754_v35 = vpack.c.bf16 %v747_v49, %v747_v49  ;;  %v1518_v23 = vpack.c.bf16 %v747_v49, %v2159_v27  ;;  %v1458_v27 = vld [vmem:[%s2347_s0 + $0x40] sm:$0xff] }
 0x2db   :  { %v758_v40 = vunpack.c.l.bf16 %v1458_v27  ;;  %v759_v55 = vunpack.c.h.bf16 %v1458_v27 }
 0x2dc   :  { %770 = vmatmul.bf16.vlgmr.msra.gmra.mxu0 %v754_v35  ;;  %1530 = vst [vmem:[%s2349_s3 + $0x8] sm:$0xff] %v1518_v23   ;;  %783 = vmatmul.bf16.vlgmr.msra.gmra.mxu1 %v754_v35 }
 0x2dd   :  { %796 = vmatmul.bf16.vlgmr.msra.gmra.mxu2 %v754_v35  ;;  %809 = vmatmul.bf16.vlgmr.msra.gmra.mxu3 %v754_v35 }
 0x2de   :  { %1028 = vmatpush.bf16.msra.mxu0 %v1692_v3  ;;  %1041 = vmatpush.bf16.msra.mxu1 %v1703_v7 }
 0x2df   :  { %1054 = vmatpush.bf16.msra.mxu2 %v1705_v8  ;;  %1067 = vmatpush.bf16.msra.mxu3 %v1743_v21 }
 0x2e2   :  { %1029 = vmatpush.bf16.msra.mxu0 %v1717_v12  ;;  %1042 = vmatpush.bf16.msra.mxu1 %v1730_v16 }
 0x2e3   :  { %1055 = vmatpush.bf16.msra.mxu2 %v1732_v17  ;;  %1068 = vmatpush.bf16.msra.mxu3 %v1782_v34 }
 0x2e6   :  { %1030 = vmatpush.bf16.msra.mxu0 %v1765_v28  ;;  %1043 = vmatpush.bf16.msra.mxu1 %v1778_v32 }
 0x2e7   :  { %1056 = vmatpush.bf16.msra.mxu2 %v1780_v33  ;;  %1069 = vmatpush.bf16.msra.mxu3 %v1806_v42 }
 0x2ea   :  { %1031 = vmatpush.bf16.msra.mxu0 %v1804_v41  ;;  %1044 = vmatpush.bf16.msra.mxu1 %v1816_v45 }
 0x2eb   :  { %1057 = vmatpush.bf16.msra.mxu2 %v1818_v46  ;;  %1070 = vmatpush.bf16.msra.mxu3 %v1842_v54 }
 0x2ee   :  { %1032 = vmatpush.bf16.msra.mxu0 %v1840_v53  ;;  %1045 = vmatpush.bf16.msra.mxu1 %v1852_v57 }
 0x2ef   :  { %1058 = vmatpush.bf16.msra.mxu2 %v1854_v58  ;;  %1071 = vmatpush.bf16.msra.mxu3 %v1878_v2 }
 0x2f2   :  { %1033 = vmatpush.bf16.msra.mxu0 %v1876_v1  ;;  %1046 = vmatpush.bf16.msra.mxu1 %v1888_v6 }
 0x2f3   :  { %1059 = vmatpush.bf16.msra.mxu2 %v1890_v9  ;;  %1072 = vmatpush.bf16.msra.mxu3 %v1914_v20 }
 0x2f6   :  { %1034 = vmatpush.bf16.msra.mxu0 %v1912_v19  ;;  %1047 = vmatpush.bf16.msra.mxu1 %v1924_v24 }
 0x2f7   :  { %1060 = vmatpush.bf16.msra.mxu2 %v1926_v25  ;;  %1073 = vmatpush.bf16.msra.mxu3 %v1950_v37 }
 0x2fa   :  { %1035 = vmatpush.bf16.msra.mxu0 %v1948_v36  ;;  %1048 = vmatpush.bf16.msra.mxu1 %v1954_v38 }
 0x2fb   :  { %1061 = vmatpush.bf16.msra.mxu2 %v1956_v39  ;;  %1074 = vmatpush.bf16.msra.mxu3 %v1968_v44 }
 0x359   :  { %v771_v62 = vpop.f32.mrf.mxu0  ;;  %v784_v13 = vpop.f32.mrf.mxu1 }
 0x35a   :  { %v772_v31 = vadd.f32 %v771_v62, %v758_v40  ;;  %v785_v14 = vadd.f32 %v784_v13, %v759_v55 }
 0x35c   :  { %v814_v4 = vadd.f32 %v772_v31, %v2041_v52  ;;  %v815_v61 = vadd.f32 %v785_v14, %v2043_v56 }
 0x35e   :  { %v1460_v29 = vmul.f32 -1.442695, %v814_v4  ;;  %v1461_v47 = vmul.f32 -1.442695, %v815_v61 }
 0x360   :  { %1598 = vpow2.f32 %v1460_v29  ;;  %v797_v48 = vpop.f32.mrf.mxu2  ;;  %v810_v51 = vpop.f32.mrf.mxu3 }
 0x361   :  { %1600 = vpow2.f32 %v1461_v47  ;;  %v798_v50 = vadd.f32 %v797_v48, %v760_v30  ;;  %v773_v63 = vpop.f32.mrf.mxu0  ;;  %v786_v22 = vpop.f32.mrf.mxu1  ;;  %v811_v27 = vadd.f32 %v810_v51, %v761_v59 }
 0x363   :  { %v816_v10 = vadd.f32 %v798_v50, %v2050_v11  ;;  %v817_v13 = vadd.f32 %v811_v27, %v2053_v43 }
 0x365   :  { %v1462_v60 = vmul.f32 -1.442695, %v816_v10 }
 0x366   :  { %v1599_v26 = vpop.eup %1598 }
 0x367   :  { %v1601_v15 = vpop.eup %1600  ;;  %v827_v18 = vadd.f32 1.0, %v1599_v26  ;;  %1602 = vpow2.f32 %v1462_v60 }
 0x368   :  { %v828_v49 = vadd.f32 1.0, %v1601_v15  ;;  %v799_v35 = vpop.f32.mrf.mxu2  ;;  %v812_v23 = vpop.f32.mrf.mxu3 }
 0x369   :  { %1604 = vrcp.f32 %v827_v18  ;;  %v841_v29 = vand.u32 2147483648, %v827_v18  ;;  %v839_v48 = vand.u32 2147483647, %v827_v18  ;;  %vm835_vm2 = vweird.f32 %v827_v18 }
 0x36a   :  { %1606 = vrcp.f32 %v828_v49  ;;  %v856_v0 = vand.u32 2147483648, %v828_v49  ;;  %v854_v51 = vand.u32 2147483647, %v828_v49  ;;  %vm850_vm3 = vweird.f32 %v828_v49 }
 0x36b   :  { %v842_v60 = vor.u32 1.1754944e-38, %v841_v29  ;;  %vm840_vm6 = vcmp.eq.f32.partialorder %v839_v48, 8.507059e+37 }
 0x36c   :  { %v857_v15 = vor.u32 1.1754944e-38, %v856_v0  ;;  %vm855_vm7 = vcmp.eq.f32.partialorder %v854_v51, 8.507059e+37 }
 0x36d   :  { %v1603_v40 = vpop.eup %1602 }
 0x36e   :  { %v829_v55 = vadd.f32 1.0, %v1603_v40 }
 0x36f   :  { %v1605_v62 = vpop.eup %1604 }
 0x370   :  { %v1607_v31 = vpop.eup %1606  ;;  %v831_v14 = vmul.f32 %v1605_v62, %v827_v18  ;;  %1608 = vrcp.f32 %v829_v55  ;;  %vm836_vm0 = vweird.f32 %v1605_v62  ;;  %vm865_vm9 = vweird.f32 %v829_v55 }
 0x371   :  { %v846_v4 = vmul.f32 %v1607_v31, %v828_v49  ;;  %1610 = vtanh.f32 %v817_v13  ;;  %vm851_vm1 = vweird.f32 %v1607_v31  ;;  %vm837_vm4 = vmor %vm835_vm2, %vm836_vm0 }
 0x372   :  { %v832_v61 = vsub.f32 1.0, %v831_v14  ;;  %vm852_vm5 = vmor %vm850_vm3, %vm851_vm1 }
 0x373   :  { %v847_v30 = vsub.f32 1.0, %v846_v4 }
 0x374   :  { %v833_v47 = vmul.f32 %v1605_v62, %v832_v61 }
 0x375   :  { %v848_v50 = vmul.f32 %v1607_v31, %v847_v30  ;;  %v871_v30 = vand.u32 2147483648, %v829_v55 }
 0x376   :  { %v1609_v63 = vpop.eup %1608  ;;  %v834_v22 = vadd.f32 %v1605_v62, %v833_v47 }
 0x377   :  { %v861_v10 = vmul.f32 %v1609_v63, %v829_v55  ;;  %v849_v26 = vadd.f32 %v1607_v31, %v848_v50  ;;  %v1611_v35 = vpop.eup %1610  ;;  %vm866_vm8 = vweird.f32 %v1609_v63  ;;  %v872_v0 = vor.u32 1.1754944e-38, %v871_v30 }
 0x378   :  { %v838_v59 = vsel %vm837_vm4, %v1605_v62, %v834_v22  ;;  %v869_v62 = vand.u32 2147483647, %v829_v55  ;;  %vm867_vm10 = vmor %vm865_vm9, %vm866_vm8 }
 0x379   :  { %v862_v23 = vsub.f32 1.0, %v861_v10  ;;  %v843_v27 = vsel %vm840_vm6, %v842_v60, %v838_v59  ;;  %v853_v40 = vsel %vm852_vm5, %v1607_v31, %v849_v26 }
 0x37a   :  { %v858_v13 = vsel %vm855_vm7, %v857_v15, %v853_v40  ;;  %v877_v14 = vmul.f32 %v1611_v35, %v843_v27  ;;  %vm870_vm11 = vcmp.eq.f32.partialorder %v869_v62, 8.507059e+37 }
 0x37b   :  { %v876_v4 = vmul.f32 %v858_v13, %v2206_v5  ;;  %v863_v61 = vmul.f32 %v1609_v63, %v862_v23 }
 0x37d   :  { %v2256_v18 = vadd.f32 %v877_v14, %v876_v4  ;;  %v864_v49 = vadd.f32 %v1609_v63, %v863_v61 }
 0x37f   :  { %1612 = vtanh.f32 %v2256_v18  ;;  %v868_v29 = vsel %vm867_vm10, %v1609_v63, %v864_v49 }
 0x380   :  { %v873_v47 = vsel %vm870_vm11, %v872_v0, %v868_v29 }
 0x385   :  { %v1613_v31 = vpop.eup %1612 }
 0x386   :  { %v2259_v48 = vmul.f32 %v1613_v31, %v873_v47 }
 0x388   :  { %v887_v5 = vpack.c.bf16 %v2259_v48, %v2259_v48 }
 0x38a   :  { %903 = vmatmul.bf16.vlgmr.msrb.gmra.mxu0 %v887_v5  ;;  %916 = vmatmul.bf16.vlgmr.msrb.gmra.mxu1 %v887_v5 }
 0x38b   :  { %929 = vmatmul.bf16.vlgmr.msrb.gmra.mxu2 %v887_v5  ;;  %942 = vmatmul.bf16.vlgmr.msrb.gmra.mxu3 %v887_v5 }
 0x38c   :  { %1161 = vmatpush.bf16.msrb.mxu0 %v1692_v3  ;;  %1174 = vmatpush.bf16.msrb.mxu1 %v1703_v7  ;;  %v1463_v3 = vld [vmem:[%s2347_s0 + $0x50] sm:$0xff] }
 0x38d   :  { %1187 = vmatpush.bf16.msrb.mxu2 %v1705_v8  ;;  %1200 = vmatpush.bf16.msrb.mxu3 %v1743_v21  ;;  %v891_v7 = vunpack.c.l.bf16 %v1463_v3  ;;  %v892_v8 = vunpack.c.h.bf16 %v1463_v3 }
 0x390   :  { %1162 = vmatpush.bf16.msrb.mxu0 %v1717_v12  ;;  %1175 = vmatpush.bf16.msrb.mxu1 %v1730_v16 }
 0x391   :  { %1188 = vmatpush.bf16.msrb.mxu2 %v1732_v17  ;;  %1201 = vmatpush.bf16.msrb.mxu3 %v1782_v34 }
 0x394   :  { %1163 = vmatpush.bf16.msrb.mxu0 %v1765_v28  ;;  %1176 = vmatpush.bf16.msrb.mxu1 %v1778_v32  ;;  %v1464_v28 = vld [vmem:[%s2347_s0 + $0x58] sm:$0xff] }
 0x395   :  { %1189 = vmatpush.bf16.msrb.mxu2 %v1780_v33  ;;  %1202 = vmatpush.bf16.msrb.mxu3 %v1806_v42  ;;  %v893_v34 = vunpack.c.l.bf16 %v1464_v28 }
 0x398   :  { %1164 = vmatpush.bf16.msrb.mxu0 %v1804_v41  ;;  %1177 = vmatpush.bf16.msrb.mxu1 %v1816_v45 }
 0x399   :  { %1190 = vmatpush.bf16.msrb.mxu2 %v1818_v46  ;;  %1203 = vmatpush.bf16.msrb.mxu3 %v1842_v54 }
 0x39c   :  { %1165 = vmatpush.bf16.msrb.mxu0 %v1840_v53  ;;  %1178 = vmatpush.bf16.msrb.mxu1 %v1852_v57 }
 0x39d   :  { %1191 = vmatpush.bf16.msrb.mxu2 %v1854_v58  ;;  %1204 = vmatpush.bf16.msrb.mxu3 %v1878_v2 }
 0x3a0   :  { %1166 = vmatpush.bf16.msrb.mxu0 %v1876_v1  ;;  %1179 = vmatpush.bf16.msrb.mxu1 %v1888_v6 }
 0x3a1   :  { %1192 = vmatpush.bf16.msrb.mxu2 %v1890_v9  ;;  %1205 = vmatpush.bf16.msrb.mxu3 %v1914_v20 }
 0x3a4   :  { %1167 = vmatpush.bf16.msrb.mxu0 %v1912_v19  ;;  %1180 = vmatpush.bf16.msrb.mxu1 %v1924_v24  ;;  %v894_v19 = vunpack.c.h.bf16 %v1464_v28 }
 0x3a5   :  { %1193 = vmatpush.bf16.msrb.mxu2 %v1926_v25  ;;  %1206 = vmatpush.bf16.msrb.mxu3 %v1950_v37 }
 0x3a8   :  { %1168 = vmatpush.bf16.msrb.mxu0 %v1948_v36  ;;  %1181 = vmatpush.bf16.msrb.mxu1 %v1954_v38 }
 0x3a9   :  { %1194 = vmatpush.bf16.msrb.mxu2 %v1956_v39  ;;  %1207 = vmatpush.bf16.msrb.mxu3 %v1968_v44 }
 0x407   :  { %v904_v12 = vpop.f32.mrf.mxu0  ;;  %v917_v16 = vpop.f32.mrf.mxu1 }
 0x408   :  { %v905_v17 = vadd.f32 %v904_v12, %v891_v7  ;;  %v918_v21 = vadd.f32 %v917_v16, %v892_v8 }
 0x40a   :  { %v947_v32 = vadd.f32 %v905_v17, %v2041_v52  ;;  %v948_v33 = vadd.f32 %v918_v21, %v2043_v56 }
 0x40c   :  { %v1465_v41 = vmul.f32 -1.442695, %v947_v32  ;;  %v1466_v42 = vmul.f32 -1.442695, %v948_v33 }
 0x40e   :  { %1614 = vpow2.f32 %v1465_v41  ;;  %v930_v45 = vpop.f32.mrf.mxu2  ;;  %v943_v46 = vpop.f32.mrf.mxu3 }
 0x40f   :  { %1616 = vpow2.f32 %v1466_v42  ;;  %v931_v53 = vadd.f32 %v930_v45, %v893_v34  ;;  %v906_v54 = vpop.f32.mrf.mxu0  ;;  %v919_v57 = vpop.f32.mrf.mxu1  ;;  %v944_v36 = vadd.f32 %v943_v46, %v894_v19  ;;  %v1468_v34 = vld [vmem:[%s2347_s0 + $0x60] sm:$0xff] }
 0x410   :  { %v1024_v41 = vunpack.c.l.bf16 %v1468_v34  ;;  %v1025_v42 = vunpack.c.h.bf16 %v1468_v34 }
 0x411   :  { %v949_v58 = vadd.f32 %v931_v53, %v2050_v11  ;;  %v950_v44 = vadd.f32 %v944_v36, %v2053_v43 }
 0x413   :  { %v1467_v1 = vmul.f32 -1.442695, %v949_v58 }
 0x414   :  { %v1615_v2 = vpop.eup %1614 }
 0x415   :  { %v1617_v6 = vpop.eup %1616  ;;  %v960_v9 = vadd.f32 1.0, %v1615_v2  ;;  %1618 = vpow2.f32 %v1467_v1 }
 0x416   :  { %v961_v20 = vadd.f32 1.0, %v1617_v6  ;;  %v932_v24 = vpop.f32.mrf.mxu2  ;;  %v945_v25 = vpop.f32.mrf.mxu3 }
 0x417   :  { %1620 = vrcp.f32 %v960_v9  ;;  %v974_v10 = vand.u32 2147483648, %v960_v9  ;;  %v972_v15 = vand.u32 2147483647, %v960_v9  ;;  %vm968_vm14 = vweird.f32 %v960_v9 }
 0x418   :  { %1622 = vrcp.f32 %v961_v20  ;;  %v989_v60 = vand.u32 2147483648, %v961_v20  ;;  %v987_v35 = vand.u32 2147483647, %v961_v20  ;;  %vm983_vm15 = vweird.f32 %v961_v20 }
 0x419   :  { %v975_v13 = vor.u32 1.1754944e-38, %v974_v10  ;;  %vm973_vm2 = vcmp.eq.f32.partialorder %v972_v15, 8.507059e+37 }
 0x41a   :  { %v990_v4 = vor.u32 1.1754944e-38, %v989_v60  ;;  %vm988_vm3 = vcmp.eq.f32.partialorder %v987_v35, 8.507059e+37 }
 0x41b   :  { %v1619_v37 = vpop.eup %1618 }
 0x41c   :  { %v962_v38 = vadd.f32 1.0, %v1619_v37 }
 0x41d   :  { %v1621_v39 = vpop.eup %1620 }
 0x41e   :  { %v1623_v55 = vpop.eup %1622  ;;  %v964_v50 = vmul.f32 %v1621_v39, %v960_v9  ;;  %1624 = vrcp.f32 %v962_v38  ;;  %vm969_vm12 = vweird.f32 %v1621_v39  ;;  %v1004_v8 = vand.u32 2147483648, %v962_v38 }
 0x41f   :  { %v979_v51 = vmul.f32 %v1623_v55, %v961_v20  ;;  %1626 = vtanh.f32 %v950_v44  ;;  %vm984_vm13 = vweird.f32 %v1623_v55  ;;  %vm970_vm0 = vmor %vm968_vm14, %vm969_vm12  ;;  %vm998_vm5 = vweird.f32 %v962_v38 }
 0x420   :  { %v965_v63 = vsub.f32 1.0, %v964_v50  ;;  %vm985_vm1 = vmor %vm983_vm15, %vm984_vm13  ;;  %v1002_v12 = vand.u32 2147483647, %v962_v38  ;;  %v1005_v17 = vor.u32 1.1754944e-38, %v1004_v8 }
 0x421   :  { %v980_v22 = vsub.f32 1.0, %v979_v51 }
 0x422   :  { %v966_v26 = vmul.f32 %v1621_v39, %v965_v63  ;;  %vm1003_vm7 = vcmp.eq.f32.partialorder %v1002_v12, 8.507059e+37 }
 0x423   :  { %v981_v59 = vmul.f32 %v1623_v55, %v980_v22 }
 0x424   :  { %v1625_v23 = vpop.eup %1624  ;;  %v967_v27 = vadd.f32 %v1621_v39, %v966_v26 }
 0x425   :  { %v994_v40 = vmul.f32 %v1625_v23, %v962_v38  ;;  %v982_v14 = vadd.f32 %v1623_v55, %v981_v59  ;;  %v1627_v49 = vpop.eup %1626  ;;  %vm999_vm4 = vweird.f32 %v1625_v23 }
 0x426   :  { %v971_v61 = vsel %vm970_vm0, %v1621_v39, %v967_v27  ;;  %vm1000_vm6 = vmor %vm998_vm5, %vm999_vm4 }
 0x427   :  { %v995_v30 = vsub.f32 1.0, %v994_v40  ;;  %v976_v62 = vsel %vm973_vm2, %v975_v13, %v971_v61  ;;  %v986_v29 = vsel %vm985_vm1, %v1623_v55, %v982_v14 }
 0x428   :  { %v991_v0 = vsel %vm988_vm3, %v990_v4, %v986_v29  ;;  %v1010_v31 = vmul.f32 %v1627_v49, %v976_v62 }
 0x429   :  { %v1009_v47 = vmul.f32 %v991_v0, %v2256_v18  ;;  %v996_v5 = vmul.f32 %v1625_v23, %v995_v30 }
 0x42b   :  { %v2306_v3 = vadd.f32 %v1010_v31, %v1009_v47  ;;  %v997_v7 = vadd.f32 %v1625_v23, %v996_v5 }
 0x42d   :  { %1628 = vtanh.f32 %v2306_v3  ;;  %v1001_v16 = vsel %vm1000_vm6, %v1625_v23, %v997_v7 }
 0x42e   :  { %v1006_v28 = vsel %vm1003_vm7, %v1005_v17, %v1001_v16 }
 0x433   :  { %v1629_v21 = vpop.eup %1628 }
 0x434   :  { %v1013_v32 = vmul.f32 %v1629_v21, %v1006_v28 }
 0x436   :  { %v1020_v33 = vpack.c.bf16 %v1013_v32, %v1013_v32  ;;  %v1523_v18 = vpack.c.bf16 %v1013_v32, %v2259_v48  ;;  %v1469_v48 = vld [vmem:[%s2347_s0 + $0x68] sm:$0xff] }
 0x437   :  { %v1026_v1 = vunpack.c.l.bf16 %v1469_v48  ;;  %v1027_v55 = vunpack.c.h.bf16 %v1469_v48 }
 0x438   :  { %1036 = vmatmul.bf16.vlgmr.msra.gmra.mxu0 %v1020_v33  ;;  %1531 = vst [vmem:[%s2349_s3 + $0x10] sm:$0xff] %v1523_v18   ;;  %1049 = vmatmul.bf16.vlgmr.msra.gmra.mxu1 %v1020_v33 }
 0x439   :  { %1062 = vmatmul.bf16.vlgmr.msra.gmra.mxu2 %v1020_v33  ;;  %1075 = vmatmul.bf16.vlgmr.msra.gmra.mxu3 %v1020_v33 }
 0x4b5   :  { %v1037_v45 = vpop.f32.mrf.mxu0  ;;  %v1050_v46 = vpop.f32.mrf.mxu1 }
 0x4b6   :  { %v1038_v53 = vadd.f32 %v1037_v45, %v1024_v41  ;;  %v1051_v54 = vadd.f32 %v1050_v46, %v1025_v42 }
 0x4b8   :  { %v1080_v57 = vadd.f32 %v1038_v53, %v2041_v52  ;;  %v1081_v58 = vadd.f32 %v1051_v54, %v2043_v56 }
 0x4ba   :  { %v1470_v2 = vmul.f32 -1.442695, %v1080_v57  ;;  %v1471_v6 = vmul.f32 -1.442695, %v1081_v58  ;;  %v1473_v57 = vld [vmem:[%s2347_s0 + $0x70] sm:$0xff] }
 0x4bb   :  { %v1157_v58 = vunpack.c.l.bf16 %v1473_v57 }
 0x4bc   :  { %1630 = vpow2.f32 %v1470_v2  ;;  %v1063_v9 = vpop.f32.mrf.mxu2  ;;  %v1076_v19 = vpop.f32.mrf.mxu3 }
 0x4bd   :  { %1632 = vpow2.f32 %v1471_v6  ;;  %v1064_v20 = vadd.f32 %v1063_v9, %v1026_v1  ;;  %v1039_v24 = vpop.f32.mrf.mxu0  ;;  %v1052_v25 = vpop.f32.mrf.mxu1  ;;  %v1077_v22 = vadd.f32 %v1076_v19, %v1027_v55  ;;  %v1158_v1 = vunpack.c.h.bf16 %v1473_v57 }
 0x4bf   :  { %v1082_v36 = vadd.f32 %v1064_v20, %v2050_v11  ;;  %v1083_v15 = vadd.f32 %v1077_v22, %v2053_v43  ;;  %v1474_v20 = vld [vmem:[%s2347_s0 + $0x78] sm:$0xff] }
 0x4c1   :  { %v1472_v37 = vmul.f32 -1.442695, %v1082_v36  ;;  %v1159_v36 = vunpack.c.l.bf16 %v1474_v20 }
 0x4c2   :  { %v1631_v38 = vpop.eup %1630 }
 0x4c3   :  { %v1633_v39 = vpop.eup %1632  ;;  %v1093_v44 = vadd.f32 1.0, %v1631_v38  ;;  %1634 = vpow2.f32 %v1472_v37 }
 0x4c4   :  { %v1094_v50 = vadd.f32 1.0, %v1633_v39  ;;  %v1065_v51 = vpop.f32.mrf.mxu2  ;;  %v1078_v63 = vpop.f32.mrf.mxu3 }
 0x4c5   :  { %1636 = vrcp.f32 %v1093_v44  ;;  %v1107_v13 = vand.u32 2147483648, %v1093_v44  ;;  %v1105_v61 = vand.u32 2147483647, %v1093_v44  ;;  %vm1101_vm10 = vweird.f32 %v1093_v44 }
 0x4c6   :  { %1638 = vrcp.f32 %v1094_v50  ;;  %v1122_v14 = vand.u32 2147483648, %v1094_v50  ;;  %v1120_v30 = vand.u32 2147483647, %v1094_v50  ;;  %vm1116_vm11 = vweird.f32 %v1094_v50 }
 0x4c7   :  { %v1108_v31 = vor.u32 1.1754944e-38, %v1107_v13  ;;  %vm1106_vm14 = vcmp.eq.f32.partialorder %v1105_v61, 8.507059e+37 }
 0x4c8   :  { %v1123_v5 = vor.u32 1.1754944e-38, %v1122_v14  ;;  %vm1121_vm15 = vcmp.eq.f32.partialorder %v1120_v30, 8.507059e+37 }
 0x4c9   :  { %v1635_v10 = vpop.eup %1634 }
 0x4ca   :  { %v1095_v60 = vadd.f32 1.0, %v1635_v10 }
 0x4cb   :  { %v1637_v26 = vpop.eup %1636 }
 0x4cc   :  { %v1639_v59 = vpop.eup %1638  ;;  %v1097_v35 = vmul.f32 %v1637_v26, %v1093_v44  ;;  %1640 = vrcp.f32 %v1095_v60  ;;  %vm1102_vm8 = vweird.f32 %v1637_v26  ;;  %v1137_v41 = vand.u32 2147483648, %v1095_v60 }
 0x4cd   :  { %v1112_v23 = vmul.f32 %v1639_v59, %v1094_v50  ;;  %1642 = vtanh.f32 %v1083_v15  ;;  %vm1117_vm9 = vweird.f32 %v1639_v59  ;;  %vm1103_vm12 = vmor %vm1101_vm10, %vm1102_vm8  ;;  %vm1131_vm1 = vweird.f32 %v1095_v60 }
 0x4ce   :  { %v1098_v27 = vsub.f32 1.0, %v1097_v35  ;;  %vm1118_vm13 = vmor %vm1116_vm11, %vm1117_vm9  ;;  %v1135_v42 = vand.u32 2147483647, %v1095_v60  ;;  %v1138_v46 = vor.u32 1.1754944e-38, %v1137_v41 }
 0x4cf   :  { %v1113_v40 = vsub.f32 1.0, %v1112_v23 }
 0x4d0   :  { %v1099_v4 = vmul.f32 %v1637_v26, %v1098_v27  ;;  %vm1136_vm3 = vcmp.eq.f32.partialorder %v1135_v42, 8.507059e+37 }
 0x4d1   :  { %v1114_v49 = vmul.f32 %v1639_v59, %v1113_v40 }
 0x4d2   :  { %v1641_v62 = vpop.eup %1640  ;;  %v1100_v29 = vadd.f32 %v1637_v26, %v1099_v4 }
 0x4d3   :  { %v1127_v0 = vmul.f32 %v1641_v62, %v1095_v60  ;;  %v1115_v47 = vadd.f32 %v1639_v59, %v1114_v49  ;;  %v1643_v8 = vpop.eup %1642  ;;  %vm1132_vm0 = vweird.f32 %v1641_v62 }
 0x4d4   :  { %v1104_v7 = vsel %vm1103_vm12, %v1637_v26, %v1100_v29  ;;  %vm1133_vm2 = vmor %vm1131_vm1, %vm1132_vm0 }
 0x4d5   :  { %v1128_v12 = vsub.f32 1.0, %v1127_v0  ;;  %v1109_v16 = vsel %vm1106_vm14, %v1108_v31, %v1104_v7  ;;  %v1119_v17 = vsel %vm1118_vm13, %v1639_v59, %v1115_v47 }
 0x4d6   :  { %v1124_v21 = vsel %vm1121_vm15, %v1123_v5, %v1119_v17  ;;  %v1143_v28 = vmul.f32 %v1643_v8, %v1109_v16 }
 0x4d7   :  { %v1142_v32 = vmul.f32 %v1124_v21, %v2306_v3  ;;  %v1129_v33 = vmul.f32 %v1641_v62, %v1128_v12 }
 0x4d9   :  { %v2324_v18 = vadd.f32 %v1143_v28, %v1142_v32  ;;  %v1130_v34 = vadd.f32 %v1641_v62, %v1129_v33 }
 0x4db   :  { %1644 = vtanh.f32 %v2324_v18  ;;  %v1134_v45 = vsel %vm1133_vm2, %v1641_v62, %v1130_v34 }
 0x4dc   :  { %v1139_v54 = vsel %vm1136_vm3, %v1138_v46, %v1134_v45 }
 0x4e1   :  { %v1645_v53 = vpop.eup %1644 }
 0x4e2   :  { %v2327_v48 = vmul.f32 %v1645_v53, %v1139_v54 }
 0x4e4   :  { %v1153_v3 = vpack.c.bf16 %v2327_v48, %v2327_v48 }
 0x4e6   :  { %1169 = vmatmul.bf16.vlgmr.msrb.gmra.mxu0 %v1153_v3  ;;  %1182 = vmatmul.bf16.vlgmr.msrb.gmra.mxu1 %v1153_v3 }
 0x4e7   :  { %1195 = vmatmul.bf16.vlgmr.msrb.gmra.mxu2 %v1153_v3  ;;  %1208 = vmatmul.bf16.vlgmr.msrb.gmra.mxu3 %v1153_v3 }
 0x563   :  { %v1170_v2 = vpop.f32.mrf.mxu0  ;;  %v1183_v6 = vpop.f32.mrf.mxu1 }
 0x564   :  { %v1171_v9 = vadd.f32 %v1170_v2, %v1157_v58  ;;  %v1184_v19 = vadd.f32 %v1183_v6, %v1158_v1 }
 0x566   :  { %v1213_v24 = vadd.f32 %v1171_v9, %v2041_v52  ;;  %v1214_v25 = vadd.f32 %v1184_v19, %v2043_v56  ;;  %v1160_v52 = vunpack.c.h.bf16 %v1474_v20 }
 0x568   :  { %v1475_v37 = vmul.f32 -1.442695, %v1213_v24  ;;  %v1476_v38 = vmul.f32 -1.442695, %v1214_v25 }
 0x56a   :  { %1646 = vpow2.f32 %v1475_v37  ;;  %v1196_v39 = vpop.f32.mrf.mxu2  ;;  %v1209_v44 = vpop.f32.mrf.mxu3 }
 0x56b   :  { %1648 = vpow2.f32 %v1476_v38  ;;  %v1197_v55 = vadd.f32 %v1196_v39, %v1159_v36  ;;  %v1172_v50 = vpop.f32.mrf.mxu0  ;;  %v1185_v51 = vpop.f32.mrf.mxu1  ;;  %v1210_v35 = vadd.f32 %v1209_v44, %v1160_v52 }
 0x56d   :  { %v1215_v63 = vadd.f32 %v1197_v55, %v2050_v11  ;;  %v1216_v13 = vadd.f32 %v1210_v35, %v2053_v43 }
 0x56f   :  { %v1477_v22 = vmul.f32 -1.442695, %v1215_v63 }
 0x570   :  { %v1647_v10 = vpop.eup %1646 }
 0x571   :  { %v1649_v60 = vpop.eup %1648  ;;  %v1226_v26 = vadd.f32 1.0, %v1647_v10  ;;  %1650 = vpow2.f32 %v1477_v22 }
 0x572   :  { %v1227_v15 = vadd.f32 1.0, %v1649_v60  ;;  %v1198_v56 = vpop.f32.mrf.mxu2  ;;  %v1211_v59 = vpop.f32.mrf.mxu3 }
 0x573   :  { %1652 = vrcp.f32 %v1226_v26  ;;  %v1240_v30 = vand.u32 2147483648, %v1226_v26  ;;  %v1238_v0 = vand.u32 2147483647, %v1226_v26  ;;  %vm1234_vm6 = vweird.f32 %v1226_v26 }
 0x574   :  { %1654 = vrcp.f32 %v1227_v15  ;;  %v1255_v62 = vand.u32 2147483648, %v1227_v15  ;;  %v1253_v47 = vand.u32 2147483647, %v1227_v15  ;;  %vm1249_vm7 = vweird.f32 %v1227_v15 }
 0x575   :  { %v1241_v8 = vor.u32 1.1754944e-38, %v1240_v30  ;;  %vm1239_vm10 = vcmp.eq.f32.partialorder %v1238_v0, 8.507059e+37 }
 0x576   :  { %v1256_v16 = vor.u32 1.1754944e-38, %v1255_v62  ;;  %vm1254_vm11 = vcmp.eq.f32.partialorder %v1253_v47, 8.507059e+37 }
 0x577   :  { %v1651_v23 = vpop.eup %1650 }
 0x578   :  { %v1228_v27 = vadd.f32 1.0, %v1651_v23 }
 0x579   :  { %v1653_v40 = vpop.eup %1652 }
 0x57a   :  { %v1655_v14 = vpop.eup %1654  ;;  %v1230_v4 = vmul.f32 %v1653_v40, %v1226_v26  ;;  %1656 = vrcp.f32 %v1228_v27  ;;  %vm1235_vm4 = vweird.f32 %v1653_v40  ;;  %v1270_v54 = vand.u32 2147483648, %v1228_v27 }
 0x57b   :  { %v1245_v11 = vmul.f32 %v1655_v14, %v1227_v15  ;;  %1658 = vtanh.f32 %v1216_v13  ;;  %vm1250_vm5 = vweird.f32 %v1655_v14  ;;  %vm1236_vm8 = vmor %vm1234_vm6, %vm1235_vm4  ;;  %vm1264_vm13 = vweird.f32 %v1228_v27 }
 0x57c   :  { %v1231_v61 = vsub.f32 1.0, %v1230_v4  ;;  %vm1251_vm9 = vmor %vm1249_vm7, %vm1250_vm5  ;;  %v1268_v3 = vand.u32 2147483647, %v1228_v27  ;;  %v1271_v58 = vor.u32 1.1754944e-38, %v1270_v54 }
 0x57d   :  { %v1246_v49 = vsub.f32 1.0, %v1245_v11 }
 0x57e   :  { %v1232_v29 = vmul.f32 %v1653_v40, %v1231_v61  ;;  %vm1269_vm15 = vcmp.eq.f32.partialorder %v1268_v3, 8.507059e+37 }
 0x57f   :  { %v1247_v31 = vmul.f32 %v1655_v14, %v1246_v49 }
 0x580   :  { %v1657_v5 = vpop.eup %1656  ;;  %v1233_v7 = vadd.f32 %v1653_v40, %v1232_v29 }
 0x581   :  { %v1260_v43 = vmul.f32 %v1657_v5, %v1228_v27  ;;  %v1248_v12 = vadd.f32 %v1655_v14, %v1247_v31  ;;  %v1659_v21 = vpop.eup %1658  ;;  %vm1265_vm12 = vweird.f32 %v1657_v5 }
 0x582   :  { %v1237_v17 = vsel %vm1236_vm8, %v1653_v40, %v1233_v7  ;;  %vm1266_vm14 = vmor %vm1264_vm13, %vm1265_vm12 }
 0x583   :  { %v1261_v28 = vsub.f32 1.0, %v1260_v43  ;;  %v1242_v32 = vsel %vm1239_vm10, %v1241_v8, %v1237_v17  ;;  %v1252_v33 = vsel %vm1251_vm9, %v1655_v14, %v1248_v12 }
 0x584   :  { %v1257_v34 = vsel %vm1254_vm11, %v1256_v16, %v1252_v33  ;;  %v1276_v41 = vmul.f32 %v1659_v21, %v1242_v32 }
 0x585   :  { %v1262_v42 = vmul.f32 %v1657_v5, %v1261_v28  ;;  %v1275_v45 = vmul.f32 %v1257_v34, %v2324_v18 }
 0x587   :  { %v1277_v46 = vadd.f32 %v1276_v41, %v1275_v45  ;;  %v1263_v53 = vadd.f32 %v1657_v5, %v1262_v42 }
 0x589   :  { %1660 = vtanh.f32 %v1277_v46  ;;  %v1267_v57 = vsel %vm1266_vm14, %v1657_v5, %v1263_v53 }
 0x58a   :  { %v1272_v2 = vsel %vm1269_vm15, %v1271_v58, %v1267_v57 }
 0x58f   :  { %v1661_v1 = vpop.eup %1660 }
 0x590   :  { %v1279_v6 = vmul.f32 %v1661_v1, %v1272_v2 }
 0x592   :  { %v1528_v9 = vpack.c.bf16 %v1279_v6, %v2327_v48 }
 0x594   :  { %1532 = vst [vmem:[%s2349_s3 + $0x18] sm:$0xff] %v1528_v9  }

// kernel: lstm_model_forward.3
= control target key start
LH: loop header
LB: loop body
LE: loop exit
PB: predicated region body
PF: predicated region fallthrough
CT: control target
= control target key end

     0   :  { %s508_s1 = inlined_call_operand.vmem [shape: bf16[128,128], index: 1, kind: input, shape index: {}]   ;;  %s509_s2 = inlined_call_operand.vmem [shape: f32[1,128], index: 2, kind: input, shape index: {}]   ;;  %s510_s3 = inlined_call_operand.vmem [shape: bf16[128,128], index: 3, kind: input, shape index: {}]   ;;  %s511_s0 = inlined_call_operand.vmem [shape: bf16[64,128], index: 0, kind: input, shape index: {}]   ;;  %s512_s4 = inlined_call_operand.vmem [shape: f32[1,128], index: 4, kind: input, shape index: {}]   ;;  %s513_s5 = inlined_call_operand.vmem [shape: f32[64,128], index: 5, kind: output, shape index: {}]  }
   0x1   :  { %v361_v0 = vld [vmem:[%s508_s1 + $0x38] sm:$0xff]  ;;  %v360_v1 = vld [vmem:[%s508_s1 + $0x30] sm:$0xff]  ;;  %v359_v2 = vld [vmem:[%s508_s1 + $0x28] sm:$0xff] }
   0x2   :  { %120 = vmatpush.bf16.msra.mxu0 %v361_v0  ;;  %370 = vmatpush.bf16.msra.mxu2 %v361_v0  ;;  %v358_v3 = vld [vmem:[%s508_s1 + $0x20] sm:$0xff]  ;;  %v357_v4 = vld [vmem:[%s508_s1 + $0x18] sm:$0xff]  ;;  %v356_v6 = vld [vmem:[%s508_s1 + $0x10] sm:$0xff] }
   0x3   :  { %v369_v5 = vld [vmem:[%s510_s3 + $0x38] sm:$0xff]  ;;  %v368_v7 = vld [vmem:[%s510_s3 + $0x30] sm:$0xff]  ;;  %v355_v8 = vld [vmem:[%s508_s1 + $0x8] sm:$0xff] }
   0x4   :  { %229 = vmatpush.bf16.msra.mxu1 %v369_v5  ;;  %378 = vmatpush.bf16.msra.mxu3 %v369_v5  ;;  %v367_v9 = vld [vmem:[%s510_s3 + $0x28] sm:$0xff]  ;;  %v354_v10 = vld [vmem:[%s508_s1] sm:$0xff]  ;;  %v352_v13 = vld [vmem:[%s511_s0 + $0x10] sm:$0xff] }
   0x5   :  { %v366_v11 = vld [vmem:[%s510_s3 + $0x20] sm:$0xff]  ;;  %v351_v14 = vld [vmem:[%s511_s0 + $0x8] sm:$0xff]  ;;  %v353_v15 = vld [vmem:[%s511_s0 + $0x18] sm:$0xff] }
   0x6   :  { %121 = vmatpush.bf16.msra.mxu0 %v360_v1  ;;  %371 = vmatpush.bf16.msra.mxu2 %v360_v1  ;;  %v350_v12 = vld [vmem:[%s511_s0] sm:$0xff]  ;;  %v365_v16 = vld [vmem:[%s510_s3 + $0x18] sm:$0xff]  ;;  %v364_v17 = vld [vmem:[%s510_s3 + $0x10] sm:$0xff] }
   0x7   :  { %v363_v18 = vld [vmem:[%s510_s3 + $0x8] sm:$0xff]  ;;  %v362_v19 = vld [vmem:[%s510_s3] sm:$0xff] }
   0x8   :  { %230 = vmatpush.bf16.msra.mxu1 %v368_v7  ;;  %379 = vmatpush.bf16.msra.mxu3 %v368_v7  ;;  %v386_v21 = vld [vmem:[%s509_s2] ss:$0 sm:$0xff] }
   0x9   :  { %v387_v49 = vld [vmem:[%s512_s4] ss:$0 sm:$0xff] }
   0xa   :  { %122 = vmatpush.bf16.msra.mxu0 %v359_v2  ;;  %372 = vmatpush.bf16.msra.mxu2 %v359_v2 }
   0xc   :  { %231 = vmatpush.bf16.msra.mxu1 %v367_v9  ;;  %380 = vmatpush.bf16.msra.mxu3 %v367_v9 }
   0xe   :  { %123 = vmatpush.bf16.msra.mxu0 %v358_v3  ;;  %373 = vmatpush.bf16.msra.mxu2 %v358_v3 }
  0x10   :  { %232 = vmatpush.bf16.msra.mxu1 %v366_v11  ;;  %381 = vmatpush.bf16.msra.mxu3 %v366_v11 }
  0x12   :  { %124 = vmatpush.bf16.msra.mxu0 %v357_v4  ;;  %374 = vmatpush.bf16.msra.mxu2 %v357_v4 }
  0x14   :  { %233 = vmatpush.bf16.msra.mxu1 %v365_v16  ;;  %382 = vmatpush.bf16.msra.mxu3 %v365_v16 }
  0x16   :  { %125 = vmatpush.bf16.msra.mxu0 %v356_v6  ;;  %375 = vmatpush.bf16.msra.mxu2 %v356_v6 }
  0x18   :  { %234 = vmatpush.bf16.msra.mxu1 %v364_v17  ;;  %383 = vmatpush.bf16.msra.mxu3 %v364_v17 }
  0x1a   :  { %126 = vmatpush.bf16.msra.mxu0 %v355_v8  ;;  %376 = vmatpush.bf16.msra.mxu2 %v355_v8 }
  0x1c   :  { %235 = vmatpush.bf16.msra.mxu1 %v363_v18  ;;  %384 = vmatpush.bf16.msra.mxu3 %v363_v18 }
  0x1e   :  { %127 = vmatpush.bf16.msra.mxu0 %v354_v10  ;;  %377 = vmatpush.bf16.msra.mxu2 %v354_v10 }
  0x20   :  { %236 = vmatpush.bf16.msra.mxu1 %v362_v19  ;;  %385 = vmatpush.bf16.msra.mxu3 %v362_v19 }
  0x21   :  { %128 = vmatmul.bf16.vlgmr.msra.gmra.mxu0 %v350_v12  ;;  %138 = vmatmul.bf16.vlgmr.msra.gmra.mxu2 %v352_v13 }
  0x31   :  { %133 = vmatmul.bf16.gmra.mxu0 %v351_v14  ;;  %143 = vmatmul.bf16.gmra.mxu2 %v353_v15 }
  0x9e   :  { %v129_v20 = vpop.f32.mrf.mxu0 }
  0x9f   :  { %v130_v22 = vadd.f32 %v386_v21, %v129_v20 }
  0xa1   :  { %v149_v25 = vmax.f32 %v130_v22, 0.0 }
  0xa4   :  { %v139_v23 = vpop.f32.mrf.mxu2 }
  0xa5   :  { %v140_v28 = vadd.f32 %v386_v21, %v139_v23 }
  0xa6   :  { %v131_v24 = vpop.f32.mrf.mxu0 }
  0xa7   :  { %v132_v26 = vadd.f32 %v386_v21, %v131_v24  ;;  %v153_v33 = vmax.f32 %v140_v28, 0.0 }
  0xa9   :  { %v150_v27 = vmax.f32 %v132_v26, 0.0 }
  0xab   :  { %v157_v29 = vpack.c.bf16 %v150_v27, %v149_v25 }
  0xac   :  { %v141_v30 = vpop.f32.mrf.mxu2 }
  0xad   :  { %v142_v31 = vadd.f32 %v386_v21, %v141_v30  ;;  %237 = vmatmul.bf16.vlgmr.msra.gmra.mxu1 %v157_v29 }
  0xae   :  { %v134_v32 = vpop.f32.mrf.mxu0 }
  0xaf   :  { %v154_v34 = vmax.f32 %v142_v31, 0.0  ;;  %v135_v36 = vadd.f32 %v386_v21, %v134_v32 }
  0xb1   :  { %v159_v35 = vpack.c.bf16 %v154_v34, %v153_v33  ;;  %v151_v39 = vmax.f32 %v135_v36, 0.0 }
  0xb3   :  { %247 = vmatmul.bf16.vlgmr.msra.gmra.mxu3 %v159_v35 }
  0xb4   :  { %v144_v37 = vpop.f32.mrf.mxu2 }
  0xb5   :  { %v145_v42 = vadd.f32 %v386_v21, %v144_v37 }
  0xb6   :  { %v136_v38 = vpop.f32.mrf.mxu0 }
  0xb7   :  { %v137_v40 = vadd.f32 %v386_v21, %v136_v38  ;;  %v155_v46 = vmax.f32 %v145_v42, 0.0 }
  0xb9   :  { %v152_v41 = vmax.f32 %v137_v40, 0.0 }
  0xbb   :  { %v158_v43 = vpack.c.bf16 %v152_v41, %v151_v39 }
  0xbc   :  { %v146_v44 = vpop.f32.mrf.mxu2 }
  0xbd   :  { %v147_v45 = vadd.f32 %v386_v21, %v146_v44  ;;  %242 = vmatmul.bf16.gmra.mxu1 %v158_v43 }
  0xbf   :  { %v156_v47 = vmax.f32 %v147_v45, 0.0 }
  0xc1   :  { %v160_v48 = vpack.c.bf16 %v156_v47, %v155_v46 }
  0xc3   :  { %252 = vmatmul.bf16.gmra.mxu3 %v160_v48 }
 0x12a   :  { %v238_v50 = vpop.f32.mrf.mxu1 }
 0x12b   :  { %v239_v51 = vadd.f32 %v387_v49, %v238_v50 }
 0x12d   :  { %258 = vst [vmem:[%s513_s5] sm:$0xff] %v239_v51 }
 0x132   :  { %v240_v52 = vpop.f32.mrf.mxu1 }
 0x133   :  { %v241_v53 = vadd.f32 %v387_v49, %v240_v52 }
 0x135   :  { %259 = vst [vmem:[%s513_s5 + $0x8] sm:$0xff] %v241_v53 }
 0x136   :  { %v248_v54 = vpop.f32.mrf.mxu3 }
 0x137   :  { %v249_v55 = vadd.f32 %v387_v49, %v248_v54 }
 0x139   :  { %262 = vst [vmem:[%s513_s5 + $0x20] sm:$0xff] %v249_v55 }
 0x13a   :  { %v243_v56 = vpop.f32.mrf.mxu1 }
 0x13b   :  { %v244_v57 = vadd.f32 %v387_v49, %v243_v56 }
 0x13d   :  { %260 = vst [vmem:[%s513_s5 + $0x10] sm:$0xff] %v244_v57 }
 0x13e   :  { %v250_v58 = vpop.f32.mrf.mxu3 }
 0x13f   :  { %v251_v59 = vadd.f32 %v387_v49, %v250_v58 }
 0x141   :  { %263 = vst [vmem:[%s513_s5 + $0x28] sm:$0xff] %v251_v59 }
 0x142   :  { %v245_v60 = vpop.f32.mrf.mxu1 }
 0x143   :  { %v246_v61 = vadd.f32 %v387_v49, %v245_v60 }
 0x145   :  { %261 = vst [vmem:[%s513_s5 + $0x18] sm:$0xff] %v246_v61 }
 0x146   :  { %v253_v62 = vpop.f32.mrf.mxu3 }
 0x147   :  { %v254_v63 = vadd.f32 %v387_v49, %v253_v62 }
 0x149   :  { %264 = vst [vmem:[%s513_s5 + $0x30] sm:$0xff] %v254_v63 }
 0x14e   :  { %v255_v0 = vpop.f32.mrf.mxu3 }
 0x14f   :  { %v256_v1 = vadd.f32 %v387_v49, %v255_v0 }
 0x151   :  { %265 = vst [vmem:[%s513_s5 + $0x38] sm:$0xff] %v256_v1 }

// kernel: lstm_model_forward.2
= control target key start
LH: loop header
LB: loop body
LE: loop exit
PB: predicated region body
PF: predicated region fallthrough
CT: control target
= control target key end

     0   :  { %s2346_s1 = inlined_call_operand.vmem [shape: bf16[128,512], index: 1, kind: input, shape index: {}]   ;;  %s2347_s0 = inlined_call_operand.vmem [shape: bf16[8,8,512], index: 0, kind: input, shape index: {}]   ;;  %s2348_s2 = inlined_call_operand.vmem [shape: f32[1,512], index: 2, kind: input, shape index: {}]   ;;  %s2349_s3 = inlined_call_operand.vmem [shape: bf16[8,8,128], index: 3, kind: output, shape index: {}]  }
   0x1   :  { %v1426_v0 = vld [vmem:[%s2346_s1 + $0xe0] sm:$0xf]  ;;  %v1508_v1 = vld [vmem:[%s2346_s1 + $0xec] sm:$0xf0]  ;;  %v1506_v2 = vld [vmem:[%s2346_s1 + $0xe4] sm:$0xf] }
   0x2   :  { %v1692_v3 = vor.u32 %v1508_v1, %v1426_v0  ;;  %v1428_v4 = vld [vmem:[%s2346_s1 + $0xf0] sm:$0xf0]  ;;  %v1434_v5 = vld [vmem:[%s2346_s1 + $0xe8] sm:$0xf]  ;;  %v1509_v6 = vld [vmem:[%s2346_s1 + $0xf4] sm:$0xf0] }
   0x3   :  { %v1703_v7 = vor.u32 %v1506_v2, %v1428_v4  ;;  %v1705_v8 = vor.u32 %v1509_v6, %v1434_v5  ;;  %v1410_v9 = vld [vmem:[%s2346_s1 + $0xc0] sm:$0xf]  ;;  %v1504_v10 = vld [vmem:[%s2346_s1 + $0xcc] sm:$0xf0]  ;;  %v1502_v11 = vld [vmem:[%s2346_s1 + $0xc4] sm:$0xf] }
   0x4   :  { %231 = vmatpush.bf16.msra.mxu0 %v1692_v3  ;;  %v1717_v12 = vor.u32 %v1504_v10, %v1410_v9  ;;  %v1412_v13 = vld [vmem:[%s2346_s1 + $0xd0] sm:$0xf0]  ;;  %v1418_v14 = vld [vmem:[%s2346_s1 + $0xc8] sm:$0xf]  ;;  %v1505_v15 = vld [vmem:[%s2346_s1 + $0xd4] sm:$0xf0] }
   0x5   :  { %244 = vmatpush.bf16.msra.mxu1 %v1703_v7  ;;  %257 = vmatpush.bf16.msra.mxu2 %v1705_v8  ;;  %v1730_v16 = vor.u32 %v1502_v11, %v1412_v13  ;;  %v1732_v17 = vor.u32 %v1505_v15, %v1418_v14  ;;  %v1507_v18 = vld [vmem:[%s2346_s1 + $0xec] sm:$0xf]  ;;  %v1436_v19 = vld [vmem:[%s2346_s1 + $0xf8] sm:$0xf0]  ;;  %v1394_v20 = vld [vmem:[%s2346_s1 + $0xa0] sm:$0xf] }
   0x6   :  { %v1743_v21 = vor.u32 %v1507_v18, %v1436_v19  ;;  %v1500_v22 = vld [vmem:[%s2346_s1 + $0xac] sm:$0xf0]  ;;  %v1498_v23 = vld [vmem:[%s2346_s1 + $0xa4] sm:$0xf]  ;;  %v1396_v24 = vld [vmem:[%s2346_s1 + $0xb0] sm:$0xf0] }
   0x7   :  { %v1402_v25 = vld [vmem:[%s2346_s1 + $0xa8] sm:$0xf]  ;;  %v1501_v26 = vld [vmem:[%s2346_s1 + $0xb4] sm:$0xf0]  ;;  %v1503_v27 = vld [vmem:[%s2346_s1 + $0xcc] sm:$0xf]  ;;  %v1765_v28 = vor.u32 %v1500_v22, %v1394_v20  ;;  %v1778_v32 = vor.u32 %v1498_v23, %v1396_v24 }
   0x8   :  { %232 = vmatpush.bf16.msra.mxu0 %v1717_v12  ;;  %270 = vmatpush.bf16.msra.mxu3 %v1743_v21  ;;  %v1420_v29 = vld [vmem:[%s2346_s1 + $0xd8] sm:$0xf0]  ;;  %v1378_v30 = vld [vmem:[%s2346_s1 + $0x80] sm:$0xf]  ;;  %v1496_v31 = vld [vmem:[%s2346_s1 + $0x8c] sm:$0xf0]  ;;  %v1780_v33 = vor.u32 %v1501_v26, %v1402_v25 }
   0x9   :  { %245 = vmatpush.bf16.msra.mxu1 %v1730_v16  ;;  %258 = vmatpush.bf16.msra.mxu2 %v1732_v17  ;;  %v1782_v34 = vor.u32 %v1503_v27, %v1420_v29  ;;  %v1494_v35 = vld [vmem:[%s2346_s1 + $0x84] sm:$0xf]  ;;  %v1380_v36 = vld [vmem:[%s2346_s1 + $0x90] sm:$0xf0]  ;;  %v1386_v37 = vld [vmem:[%s2346_s1 + $0x88] sm:$0xf]  ;;  %v1804_v41 = vor.u32 %v1496_v31, %v1378_v30 }
   0xa   :  { %v1497_v38 = vld [vmem:[%s2346_s1 + $0x94] sm:$0xf0]  ;;  %v1499_v39 = vld [vmem:[%s2346_s1 + $0xac] sm:$0xf]  ;;  %v1404_v40 = vld [vmem:[%s2346_s1 + $0xb8] sm:$0xf0]  ;;  %v1816_v45 = vor.u32 %v1494_v35, %v1380_v36 }
   0xb   :  { %v1806_v42 = vor.u32 %v1499_v39, %v1404_v40  ;;  %v1362_v43 = vld [vmem:[%s2346_s1 + $0x60] sm:$0xf]  ;;  %v1492_v44 = vld [vmem:[%s2346_s1 + $0x6c] sm:$0xf0]  ;;  %v1818_v46 = vor.u32 %v1497_v38, %v1386_v37  ;;  %v1490_v47 = vld [vmem:[%s2346_s1 + $0x64] sm:$0xf] }
   0xc   :  { %233 = vmatpush.bf16.msra.mxu0 %v1765_v28  ;;  %271 = vmatpush.bf16.msra.mxu3 %v1782_v34  ;;  %v1495_v48 = vld [vmem:[%s2346_s1 + $0x8c] sm:$0xf]  ;;  %v1388_v49 = vld [vmem:[%s2346_s1 + $0x98] sm:$0xf0]  ;;  %v1364_v50 = vld [vmem:[%s2346_s1 + $0x70] sm:$0xf0]  ;;  %v1840_v53 = vor.u32 %v1492_v44, %v1362_v43 }
   0xd   :  { %246 = vmatpush.bf16.msra.mxu1 %v1778_v32  ;;  %259 = vmatpush.bf16.msra.mxu2 %v1780_v33  ;;  %v1370_v51 = vld [vmem:[%s2346_s1 + $0x68] sm:$0xf]  ;;  %v1493_v52 = vld [vmem:[%s2346_s1 + $0x74] sm:$0xf0]  ;;  %v1842_v54 = vor.u32 %v1495_v48, %v1388_v49  ;;  %v1346_v55 = vld [vmem:[%s2346_s1 + $0x40] sm:$0xf]  ;;  %v1852_v57 = vor.u32 %v1490_v47, %v1364_v50 }
   0xe   :  { %v1488_v56 = vld [vmem:[%s2346_s1 + $0x4c] sm:$0xf0]  ;;  %v1854_v58 = vor.u32 %v1493_v52, %v1370_v51  ;;  %v1486_v59 = vld [vmem:[%s2346_s1 + $0x44] sm:$0xf]  ;;  %v1491_v60 = vld [vmem:[%s2346_s1 + $0x6c] sm:$0xf] }
   0xf   :  { %v1372_v61 = vld [vmem:[%s2346_s1 + $0x78] sm:$0xf0]  ;;  %v1348_v62 = vld [vmem:[%s2346_s1 + $0x50] sm:$0xf0]  ;;  %v1354_v63 = vld [vmem:[%s2346_s1 + $0x48] sm:$0xf]  ;;  %v1876_v1 = vor.u32 %v1488_v56, %v1346_v55 }
  0x10   :  { %234 = vmatpush.bf16.msra.mxu0 %v1804_v41  ;;  %272 = vmatpush.bf16.msra.mxu3 %v1806_v42  ;;  %v1489_v0 = vld [vmem:[%s2346_s1 + $0x54] sm:$0xf0]  ;;  %v1878_v2 = vor.u32 %v1491_v60, %v1372_v61  ;;  %v1330_v4 = vld [vmem:[%s2346_s1 + $0x20] sm:$0xf]  ;;  %v1484_v5 = vld [vmem:[%s2346_s1 + $0x2c] sm:$0xf0]  ;;  %v1888_v6 = vor.u32 %v1486_v59, %v1348_v62 }
  0x11   :  { %247 = vmatpush.bf16.msra.mxu1 %v1816_v45  ;;  %260 = vmatpush.bf16.msra.mxu2 %v1818_v46  ;;  %v1890_v9 = vor.u32 %v1489_v0, %v1354_v63  ;;  %v1482_v10 = vld [vmem:[%s2346_s1 + $0x24] sm:$0xf]  ;;  %v1487_v11 = vld [vmem:[%s2346_s1 + $0x4c] sm:$0xf]  ;;  %v1356_v13 = vld [vmem:[%s2346_s1 + $0x58] sm:$0xf0]  ;;  %v1912_v19 = vor.u32 %v1484_v5, %v1330_v4 }
  0x12   :  { %v1332_v14 = vld [vmem:[%s2346_s1 + $0x30] sm:$0xf0]  ;;  %v1338_v15 = vld [vmem:[%s2346_s1 + $0x28] sm:$0xf]  ;;  %v1485_v18 = vld [vmem:[%s2346_s1 + $0x34] sm:$0xf0]  ;;  %v1914_v20 = vor.u32 %v1487_v11, %v1356_v13 }
  0x13   :  { %v1314_v22 = vld [vmem:[%s2346_s1] sm:$0xf]  ;;  %v1480_v23 = vld [vmem:[%s2346_s1 + $0xc] sm:$0xf0]  ;;  %v1924_v24 = vor.u32 %v1482_v10, %v1332_v14  ;;  %v1926_v25 = vor.u32 %v1485_v18, %v1338_v15  ;;  %v1478_v26 = vld [vmem:[%s2346_s1 + $0x4] sm:$0xf] }
  0x14   :  { %235 = vmatpush.bf16.msra.mxu0 %v1840_v53  ;;  %273 = vmatpush.bf16.msra.mxu3 %v1842_v54  ;;  %v1483_v27 = vld [vmem:[%s2346_s1 + $0x2c] sm:$0xf]  ;;  %v1340_v29 = vld [vmem:[%s2346_s1 + $0x38] sm:$0xf0]  ;;  %v1316_v30 = vld [vmem:[%s2346_s1 + $0x10] sm:$0xf0]  ;;  %v1948_v36 = vor.u32 %v1480_v23, %v1314_v22 }
  0x15   :  { %248 = vmatpush.bf16.msra.mxu1 %v1852_v57  ;;  %261 = vmatpush.bf16.msra.mxu2 %v1854_v58  ;;  %v1322_v31 = vld [vmem:[%s2346_s1 + $0x8] sm:$0xf]  ;;  %v1481_v35 = vld [vmem:[%s2346_s1 + $0x14] sm:$0xf0]  ;;  %v1950_v37 = vor.u32 %v1483_v27, %v1340_v29  ;;  %v1954_v38 = vor.u32 %v1478_v26, %v1316_v30  ;;  %v1479_v40 = vld [vmem:[%s2346_s1 + $0xc] sm:$0xf] }
  0x16   :  { %v1956_v39 = vor.u32 %v1481_v35, %v1322_v31  ;;  %v1324_v43 = vld [vmem:[%s2346_s1 + $0x18] sm:$0xf0]  ;;  %v1662_v47 = vmov 0.0|0.0   ;;  %v65_v48 = vld [vmem:[%s2347_s0] sm:$0xff]  ;;  %v66_v61 = vld [vmem:[%s2347_s0 + $0x8] sm:$0xff] }
  0x17   :  { %v1968_v44 = vor.u32 %v1479_v40, %v1324_v43  ;;  %v52_v49 = vld [vmem:[%s2348_s2] sm:$0xf]  ;;  %v67_v50 = vunpack.c.l.bf16 %v65_v48  ;;  %v68_v51 = vunpack.c.h.bf16 %v65_v48  ;;  %v69_v4 = vunpack.c.l.bf16 %v66_v61 }
  0x18   :  { %236 = vmatpush.bf16.msra.mxu0 %v1876_v1  ;;  %274 = vmatpush.bf16.msra.mxu3 %v1878_v2  ;;  %v2041_v52 = vperm.slane %v52_v49, 0  ;;  %v2043_v56 = vperm.slane %v52_v49, 1  ;;  %v2050_v11 = vperm.slane %v52_v49, 2  ;;  %v70_v27 = vunpack.c.h.bf16 %v66_v61 }
  0x19   :  { %249 = vmatpush.bf16.msra.mxu1 %v1888_v6  ;;  %262 = vmatpush.bf16.msra.mxu2 %v1890_v9  ;;  %v2053_v43 = vperm.slane %v52_v49, 3 }
  0x1c   :  { %237 = vmatpush.bf16.msra.mxu0 %v1912_v19  ;;  %275 = vmatpush.bf16.msra.mxu3 %v1914_v20 }
  0x1d   :  { %250 = vmatpush.bf16.msra.mxu1 %v1924_v24  ;;  %263 = vmatpush.bf16.msra.mxu2 %v1926_v25 }
  0x20   :  { %238 = vmatpush.bf16.msra.mxu0 %v1948_v36  ;;  %276 = vmatpush.bf16.msra.mxu3 %v1950_v37 }
  0x21   :  { %251 = vmatpush.bf16.msra.mxu1 %v1954_v38  ;;  %264 = vmatpush.bf16.msra.mxu2 %v1956_v39 }
  0x23   :  { %239 = vmatmul.bf16.vlgmr.msra.gmra.mxu0 %v1662_v47 }
  0x24   :  { %363 = vmatpush.bf16.msrb.mxu0 %v1692_v3  ;;  %252 = vmatmul.bf16.vlgmr.msra.gmra.mxu1 %v1662_v47 }
  0x25   :  { %376 = vmatpush.bf16.msrb.mxu1 %v1703_v7  ;;  %389 = vmatpush.bf16.msrb.mxu2 %v1705_v8 }
  0x26   :  { %265 = vmatmul.bf16.vlgmr.msra.gmra.mxu2 %v1662_v47  ;;  %277 = vmatpush.bf16.msra.mxu3 %v1968_v44 }
  0x28   :  { %364 = vmatpush.bf16.msrb.mxu0 %v1717_v12 }
  0x29   :  { %377 = vmatpush.bf16.msrb.mxu1 %v1730_v16  ;;  %390 = vmatpush.bf16.msrb.mxu2 %v1732_v17 }
  0x2a   :  { %402 = vmatpush.bf16.msrb.mxu3 %v1743_v21 }
  0x2b   :  { %278 = vmatmul.bf16.vlgmr.msra.gmra.mxu3 %v1662_v47 }
  0x2c   :  { %365 = vmatpush.bf16.msrb.mxu0 %v1765_v28 }
  0x2d   :  { %378 = vmatpush.bf16.msrb.mxu1 %v1778_v32  ;;  %391 = vmatpush.bf16.msrb.mxu2 %v1780_v33 }
  0x2e   :  { %403 = vmatpush.bf16.msrb.mxu3 %v1782_v34 }
  0x30   :  { %366 = vmatpush.bf16.msrb.mxu0 %v1804_v41 }
  0x31   :  { %379 = vmatpush.bf16.msrb.mxu1 %v1816_v45  ;;  %392 = vmatpush.bf16.msrb.mxu2 %v1818_v46 }
  0x32   :  { %404 = vmatpush.bf16.msrb.mxu3 %v1806_v42 }
  0x34   :  { %367 = vmatpush.bf16.msrb.mxu0 %v1840_v53 }
  0x35   :  { %380 = vmatpush.bf16.msrb.mxu1 %v1852_v57  ;;  %393 = vmatpush.bf16.msrb.mxu2 %v1854_v58 }
  0x36   :  { %405 = vmatpush.bf16.msrb.mxu3 %v1842_v54 }
  0x38   :  { %368 = vmatpush.bf16.msrb.mxu0 %v1876_v1 }
  0x39   :  { %381 = vmatpush.bf16.msrb.mxu1 %v1888_v6  ;;  %394 = vmatpush.bf16.msrb.mxu2 %v1890_v9 }
  0x3a   :  { %406 = vmatpush.bf16.msrb.mxu3 %v1878_v2 }
  0x3c   :  { %369 = vmatpush.bf16.msrb.mxu0 %v1912_v19 }
  0x3d   :  { %382 = vmatpush.bf16.msrb.mxu1 %v1924_v24  ;;  %395 = vmatpush.bf16.msrb.mxu2 %v1926_v25 }
  0x3e   :  { %407 = vmatpush.bf16.msrb.mxu3 %v1914_v20 }
  0x40   :  { %370 = vmatpush.bf16.msrb.mxu0 %v1948_v36 }
  0x41   :  { %383 = vmatpush.bf16.msrb.mxu1 %v1954_v38  ;;  %396 = vmatpush.bf16.msrb.mxu2 %v1956_v39 }
  0x42   :  { %408 = vmatpush.bf16.msrb.mxu3 %v1950_v37 }
  0x44   :  { %496 = vmatpush.bf16.msra.mxu0 %v1692_v3 }
  0x45   :  { %509 = vmatpush.bf16.msra.mxu1 %v1703_v7  ;;  %522 = vmatpush.bf16.msra.mxu2 %v1705_v8 }
  0x46   :  { %409 = vmatpush.bf16.msrb.mxu3 %v1968_v44 }
  0x48   :  { %497 = vmatpush.bf16.msra.mxu0 %v1717_v12 }
  0x49   :  { %510 = vmatpush.bf16.msra.mxu1 %v1730_v16  ;;  %523 = vmatpush.bf16.msra.mxu2 %v1732_v17 }
  0x4a   :  { %535 = vmatpush.bf16.msra.mxu3 %v1743_v21 }
  0x4c   :  { %498 = vmatpush.bf16.msra.mxu0 %v1765_v28 }
  0x4d   :  { %511 = vmatpush.bf16.msra.mxu1 %v1778_v32  ;;  %524 = vmatpush.bf16.msra.mxu2 %v1780_v33 }
  0x4e   :  { %536 = vmatpush.bf16.msra.mxu3 %v1782_v34 }
  0x50   :  { %499 = vmatpush.bf16.msra.mxu0 %v1804_v41 }
  0x51   :  { %512 = vmatpush.bf16.msra.mxu1 %v1816_v45  ;;  %525 = vmatpush.bf16.msra.mxu2 %v1818_v46 }
  0x52   :  { %537 = vmatpush.bf16.msra.mxu3 %v1806_v42 }
  0x54   :  { %500 = vmatpush.bf16.msra.mxu0 %v1840_v53 }
  0x55   :  { %513 = vmatpush.bf16.msra.mxu1 %v1852_v57  ;;  %526 = vmatpush.bf16.msra.mxu2 %v1854_v58 }
  0x56   :  { %538 = vmatpush.bf16.msra.mxu3 %v1842_v54 }
  0x58   :  { %501 = vmatpush.bf16.msra.mxu0 %v1876_v1 }
  0x59   :  { %514 = vmatpush.bf16.msra.mxu1 %v1888_v6  ;;  %527 = vmatpush.bf16.msra.mxu2 %v1890_v9 }
  0x5a   :  { %539 = vmatpush.bf16.msra.mxu3 %v1878_v2 }
  0x5c   :  { %502 = vmatpush.bf16.msra.mxu0 %v1912_v19 }
  0x5d   :  { %515 = vmatpush.bf16.msra.mxu1 %v1924_v24  ;;  %528 = vmatpush.bf16.msra.mxu2 %v1926_v25 }
  0x5e   :  { %540 = vmatpush.bf16.msra.mxu3 %v1914_v20 }
  0x60   :  { %503 = vmatpush.bf16.msra.mxu0 %v1948_v36 }
  0x61   :  { %516 = vmatpush.bf16.msra.mxu1 %v1954_v38  ;;  %529 = vmatpush.bf16.msra.mxu2 %v1956_v39 }
  0x62   :  { %541 = vmatpush.bf16.msra.mxu3 %v1950_v37 }
  0x66   :  { %542 = vmatpush.bf16.msra.mxu3 %v1968_v44 }
  0xa0   :  { %v240_v55 = vpop.f32.mrf.mxu0 }
  0xa1   :  { %v241_v59 = vadd.f32 %v240_v55, %v67_v50  ;;  %v253_v60 = vpop.f32.mrf.mxu1 }
  0xa2   :  { %v254_v62 = vadd.f32 %v253_v60, %v68_v51 }
  0xa3   :  { %v283_v63 = vadd.f32 %v241_v59, %v2041_v52 }
  0xa4   :  { %v284_v0 = vadd.f32 %v254_v62, %v2043_v56 }
  0xa5   :  { %v1440_v5 = vmul.f32 -1.442695, %v283_v63 }
  0xa6   :  { %v1441_v10 = vmul.f32 -1.442695, %v284_v0 }
  0xa7   :  { %1534 = vpow2.f32 %v1440_v5 }
  0xa8   :  { %1536 = vpow2.f32 %v1441_v10  ;;  %v242_v15 = vpop.f32.mrf.mxu0 }
  0xa9   :  { %v266_v13 = vpop.f32.mrf.mxu2  ;;  %v255_v18 = vpop.f32.mrf.mxu1 }
  0xaa   :  { %v267_v14 = vadd.f32 %v266_v13, %v69_v4 }
  0xac   :  { %v285_v22 = vadd.f32 %v267_v14, %v2050_v11 }
  0xad   :  { %v1535_v29 = vpop.eup %1534 }
  0xae   :  { %v279_v23 = vpop.f32.mrf.mxu3  ;;  %v1442_v26 = vmul.f32 -1.442695, %v285_v22  ;;  %v1537_v30 = vpop.eup %1536  ;;  %v296_v31 = vadd.f32 1.0, %v1535_v29 }
  0xaf   :  { %v297_v35 = vadd.f32 1.0, %v1537_v30  ;;  %v280_v47 = vadd.f32 %v279_v23, %v70_v27 }
  0xb0   :  { %1538 = vpow2.f32 %v1442_v26  ;;  %v310_v4 = vand.u32 2147483648, %v296_v31  ;;  %v308_v49 = vand.u32 2147483647, %v296_v31  ;;  %vm304_vm2 = vweird.f32 %v296_v31 }
  0xb1   :  { %v268_v40 = vpop.f32.mrf.mxu2  ;;  %1540 = vrcp.f32 %v296_v31  ;;  %v286_v51 = vadd.f32 %v280_v47, %v2053_v43  ;;  %v325_v5 = vand.u32 2147483648, %v297_v35  ;;  %v323_v14 = vand.u32 2147483647, %v297_v35 }
  0xb2   :  { %1542 = vrcp.f32 %v297_v35  ;;  %vm319_vm3 = vweird.f32 %v297_v35  ;;  %v311_v26 = vor.u32 1.1754944e-38, %v310_v4  ;;  %vm309_vm5 = vcmp.eq.f32.partialorder %v308_v49, 8.507059e+37 }
  0xb3   :  { %v326_v29 = vor.u32 1.1754944e-38, %v325_v5  ;;  %vm324_vm7 = vcmp.eq.f32.partialorder %v323_v14, 8.507059e+37 }
  0xb6   :  { %v281_v48 = vpop.f32.mrf.mxu3  ;;  %v1539_v50 = vpop.eup %1538 }
  0xb7   :  { %v298_v55 = vadd.f32 1.0, %v1539_v50  ;;  %v1541_v59 = vpop.eup %1540 }
  0xb8   :  { %v1543_v60 = vpop.eup %1542  ;;  %v300_v62 = vmul.f32 %v1541_v59, %v296_v31  ;;  %vm305_vm0 = vweird.f32 %v1541_v59 }
  0xb9   :  { %1544 = vrcp.f32 %v298_v55  ;;  %v315_v61 = vmul.f32 %v1543_v60, %v297_v35  ;;  %vm320_vm1 = vweird.f32 %v1543_v60  ;;  %vm306_vm4 = vmor %vm304_vm2, %vm305_vm0  ;;  %v340_v35 = vand.u32 2147483648, %v298_v55 }
  0xba   :  { %1546 = vtanh.f32 %v286_v51  ;;  %v301_v63 = vsub.f32 1.0, %v300_v62  ;;  %vm321_vm6 = vmor %vm319_vm3, %vm320_vm1  ;;  %vm334_vm9 = vweird.f32 %v298_v55 }
  0xbb   :  { %v316_v0 = vsub.f32 1.0, %v315_v61  ;;  %v341_v4 = vor.u32 1.1754944e-38, %v340_v35 }
  0xbc   :  { %v302_v10 = vmul.f32 %v1541_v59, %v301_v63 }
  0xbd   :  { %v317_v13 = vmul.f32 %v1543_v60, %v316_v0  ;;  %v338_v0 = vand.u32 2147483647, %v298_v55 }
  0xbe   :  { %v303_v18 = vadd.f32 %v1541_v59, %v302_v10 }
  0xbf   :  { %v1545_v15 = vpop.eup %1544  ;;  %v318_v27 = vadd.f32 %v1543_v60, %v317_v13  ;;  %vm339_vm11 = vcmp.eq.f32.partialorder %v338_v0, 8.507059e+37 }
  0xc0   :  { %v1547_v22 = vpop.eup %1546  ;;  %v330_v23 = vmul.f32 %v1545_v15, %v298_v55  ;;  %v307_v30 = vsel %vm306_vm4, %v1541_v59, %v303_v18  ;;  %vm335_vm8 = vweird.f32 %v1545_v15  ;;  %v1443_v55 = vld [vmem:[%s2347_s0 + $0x10] sm:$0xff] }
  0xc1   :  { %v312_v47 = vsel %vm309_vm5, %v311_v26, %v307_v30  ;;  %v322_v48 = vsel %vm321_vm6, %v1543_v60, %v318_v27  ;;  %vm336_vm10 = vmor %vm334_vm9, %vm335_vm8  ;;  %v359_v13 = vunpack.c.l.bf16 %v1443_v55  ;;  %v360_v14 = vunpack.c.h.bf16 %v1443_v55  ;;  %v1444_v26 = vld [vmem:[%s2347_s0 + $0x18] sm:$0xff] }
  0xc2   :  { %v331_v40 = vsub.f32 1.0, %v330_v23  ;;  %v327_v50 = vsel %vm324_vm7, %v326_v29, %v322_v48  ;;  %v346_v51 = vmul.f32 %v1547_v22, %v312_v47  ;;  %v361_v30 = vunpack.c.l.bf16 %v1444_v26 }
  0xc3   :  { %v345_v62 = vmul.f32 0.0, %v327_v50 }
  0xc4   :  { %v332_v61 = vmul.f32 %v1545_v15, %v331_v40 }
  0xc5   :  { %v2056_v63 = vadd.f32 %v346_v51, %v345_v62 }
  0xc6   :  { %v333_v31 = vadd.f32 %v1545_v15, %v332_v61 }
  0xc7   :  { %1548 = vtanh.f32 %v2056_v63 }
  0xc8   :  { %v337_v59 = vsel %vm336_vm10, %v1545_v15, %v333_v31 }
  0xc9   :  { %v342_v60 = vsel %vm339_vm11, %v341_v4, %v337_v59 }
  0xcd   :  { %v1549_v5 = vpop.eup %1548 }
  0xce   :  { %v2059_v10 = vmul.f32 %v1549_v5, %v342_v60  ;;  %v362_v5 = vunpack.c.h.bf16 %v1444_v26 }
  0xd0   :  { %v355_v49 = vpack.c.bf16 %v2059_v10, %v2059_v10 }
  0xd2   :  { %371 = vmatmul.bf16.vlgmr.msrb.gmra.mxu0 %v355_v49  ;;  %384 = vmatmul.bf16.vlgmr.msrb.gmra.mxu1 %v355_v49 }
  0xd3   :  { %397 = vmatmul.bf16.vlgmr.msrb.gmra.mxu2 %v355_v49  ;;  %410 = vmatmul.bf16.vlgmr.msrb.gmra.mxu3 %v355_v49 }
  0xd4   :  { %629 = vmatpush.bf16.msrb.mxu0 %v1692_v3  ;;  %642 = vmatpush.bf16.msrb.mxu1 %v1703_v7 }
  0xd5   :  { %655 = vmatpush.bf16.msrb.mxu2 %v1705_v8  ;;  %668 = vmatpush.bf16.msrb.mxu3 %v1743_v21 }
  0xd8   :  { %630 = vmatpush.bf16.msrb.mxu0 %v1717_v12  ;;  %643 = vmatpush.bf16.msrb.mxu1 %v1730_v16 }
  0xd9   :  { %656 = vmatpush.bf16.msrb.mxu2 %v1732_v17  ;;  %669 = vmatpush.bf16.msrb.mxu3 %v1782_v34 }
  0xdc   :  { %631 = vmatpush.bf16.msrb.mxu0 %v1765_v28  ;;  %644 = vmatpush.bf16.msrb.mxu1 %v1778_v32 }
  0xdd   :  { %657 = vmatpush.bf16.msrb.mxu2 %v1780_v33  ;;  %670 = vmatpush.bf16.msrb.mxu3 %v1806_v42 }
  0xe0   :  { %632 = vmatpush.bf16.msrb.mxu0 %v1804_v41  ;;  %645 = vmatpush.bf16.msrb.mxu1 %v1816_v45 }
  0xe1   :  { %658 = vmatpush.bf16.msrb.mxu2 %v1818_v46  ;;  %671 = vmatpush.bf16.msrb.mxu3 %v1842_v54 }
  0xe4   :  { %633 = vmatpush.bf16.msrb.mxu0 %v1840_v53  ;;  %646 = vmatpush.bf16.msrb.mxu1 %v1852_v57 }
  0xe5   :  { %659 = vmatpush.bf16.msrb.mxu2 %v1854_v58  ;;  %672 = vmatpush.bf16.msrb.mxu3 %v1878_v2 }
  0xe8   :  { %634 = vmatpush.bf16.msrb.mxu0 %v1876_v1  ;;  %647 = vmatpush.bf16.msrb.mxu1 %v1888_v6 }
  0xe9   :  { %660 = vmatpush.bf16.msrb.mxu2 %v1890_v9  ;;  %673 = vmatpush.bf16.msrb.mxu3 %v1914_v20 }
  0xec   :  { %635 = vmatpush.bf16.msrb.mxu0 %v1912_v19  ;;  %648 = vmatpush.bf16.msrb.mxu1 %v1924_v24 }
  0xed   :  { %661 = vmatpush.bf16.msrb.mxu2 %v1926_v25  ;;  %674 = vmatpush.bf16.msrb.mxu3 %v1950_v37 }
  0xf0   :  { %636 = vmatpush.bf16.msrb.mxu0 %v1948_v36  ;;  %649 = vmatpush.bf16.msrb.mxu1 %v1954_v38 }
  0xf1   :  { %662 = vmatpush.bf16.msrb.mxu2 %v1956_v39  ;;  %675 = vmatpush.bf16.msrb.mxu3 %v1968_v44 }
 0x14f   :  { %v372_v15 = vpop.f32.mrf.mxu0  ;;  %v385_v18 = vpop.f32.mrf.mxu1 }
 0x150   :  { %v373_v22 = vadd.f32 %v372_v15, %v359_v13  ;;  %v386_v23 = vadd.f32 %v385_v18, %v360_v14 }
 0x152   :  { %v415_v27 = vadd.f32 %v373_v22, %v2041_v52  ;;  %v416_v29 = vadd.f32 %v386_v23, %v2043_v56 }
 0x154   :  { %v1445_v40 = vmul.f32 -1.442695, %v415_v27  ;;  %v1446_v47 = vmul.f32 -1.442695, %v416_v29 }
 0x156   :  { %1550 = vpow2.f32 %v1445_v40  ;;  %v398_v48 = vpop.f32.mrf.mxu2  ;;  %v411_v50 = vpop.f32.mrf.mxu3 }
 0x157   :  { %1552 = vpow2.f32 %v1446_v47  ;;  %v399_v51 = vadd.f32 %v398_v48, %v361_v30  ;;  %v374_v62 = vpop.f32.mrf.mxu0  ;;  %v387_v61 = vpop.f32.mrf.mxu1  ;;  %v412_v13 = vadd.f32 %v411_v50, %v362_v5 }
 0x159   :  { %v417_v31 = vadd.f32 %v399_v51, %v2050_v11  ;;  %v418_v22 = vadd.f32 %v412_v13, %v2053_v43 }
 0x15b   :  { %v1447_v35 = vmul.f32 -1.442695, %v417_v31 }
 0x15c   :  { %v1551_v0 = vpop.eup %1550 }
 0x15d   :  { %v1553_v59 = vpop.eup %1552  ;;  %v428_v4 = vadd.f32 1.0, %v1551_v0  ;;  %1554 = vpow2.f32 %v1447_v35 }
 0x15e   :  { %v429_v60 = vadd.f32 1.0, %v1553_v59  ;;  %v400_v49 = vpop.f32.mrf.mxu2  ;;  %v413_v55 = vpop.f32.mrf.mxu3 }
 0x15f   :  { %1556 = vrcp.f32 %v428_v4  ;;  %v442_v47 = vand.u32 2147483648, %v428_v4  ;;  %v440_v51 = vand.u32 2147483647, %v428_v4  ;;  %vm436_vm14 = vweird.f32 %v428_v4 }
 0x160   :  { %1558 = vrcp.f32 %v429_v60  ;;  %v457_v26 = vand.u32 2147483648, %v429_v60  ;;  %v455_v50 = vand.u32 2147483647, %v429_v60  ;;  %vm451_vm15 = vweird.f32 %v429_v60 }
 0x161   :  { %v443_v0 = vor.u32 1.1754944e-38, %v442_v47  ;;  %vm441_vm2 = vcmp.eq.f32.partialorder %v440_v51, 8.507059e+37 }
 0x162   :  { %v458_v5 = vor.u32 1.1754944e-38, %v457_v26  ;;  %vm456_vm3 = vcmp.eq.f32.partialorder %v455_v50, 8.507059e+37 }
 0x163   :  { %v1555_v14 = vpop.eup %1554 }
 0x164   :  { %v430_v15 = vadd.f32 1.0, %v1555_v14 }
 0x165   :  { %v1557_v18 = vpop.eup %1556 }
 0x166   :  { %v1559_v23 = vpop.eup %1558  ;;  %v432_v27 = vmul.f32 %v1557_v18, %v428_v4  ;;  %1560 = vrcp.f32 %v430_v15  ;;  %vm437_vm12 = vweird.f32 %v1557_v18  ;;  %v472_v47 = vand.u32 2147483648, %v430_v15 }
 0x167   :  { %v447_v29 = vmul.f32 %v1559_v23, %v429_v60  ;;  %1562 = vtanh.f32 %v418_v22  ;;  %vm452_vm13 = vweird.f32 %v1559_v23  ;;  %vm438_vm0 = vmor %vm436_vm14, %vm437_vm12  ;;  %vm466_vm5 = vweird.f32 %v430_v15 }
 0x168   :  { %v433_v30 = vsub.f32 1.0, %v432_v27  ;;  %vm453_vm1 = vmor %vm451_vm15, %vm452_vm13 }
 0x169   :  { %v448_v40 = vsub.f32 1.0, %v447_v29 }
 0x16a   :  { %v434_v48 = vmul.f32 %v1557_v18, %v433_v30 }
 0x16b   :  { %v449_v62 = vmul.f32 %v1559_v23, %v448_v40 }
 0x16c   :  { %v1561_v61 = vpop.eup %1560  ;;  %v435_v31 = vadd.f32 %v1557_v18, %v434_v48  ;;  %v473_v48 = vor.u32 1.1754944e-38, %v472_v47 }
 0x16d   :  { %v462_v35 = vmul.f32 %v1561_v61, %v430_v15  ;;  %v450_v59 = vadd.f32 %v1559_v23, %v449_v62  ;;  %v1563_v55 = vpop.eup %1562  ;;  %vm467_vm4 = vweird.f32 %v1561_v61 }
 0x16e   :  { %v439_v49 = vsel %vm438_vm0, %v1557_v18, %v435_v31  ;;  %v470_v18 = vand.u32 2147483647, %v430_v15  ;;  %vm468_vm6 = vmor %vm466_vm5, %vm467_vm4 }
 0x16f   :  { %v463_v13 = vsub.f32 1.0, %v462_v35  ;;  %v444_v14 = vsel %vm441_vm2, %v443_v0, %v439_v49  ;;  %v454_v22 = vsel %vm453_vm1, %v1559_v23, %v450_v59 }
 0x170   :  { %v459_v27 = vsel %vm456_vm3, %v458_v5, %v454_v22  ;;  %v478_v29 = vmul.f32 %v1563_v55, %v444_v14  ;;  %vm471_vm7 = vcmp.eq.f32.partialorder %v470_v18, 8.507059e+37  ;;  %v1449_v5 = vld [vmem:[%s2347_s0 + $0x28] sm:$0xff] }
 0x171   :  { %v477_v30 = vmul.f32 %v459_v27, %v2056_v63  ;;  %v464_v40 = vmul.f32 %v1561_v61, %v463_v13  ;;  %v494_v13 = vunpack.c.l.bf16 %v1449_v5 }
 0x173   :  { %v2106_v4 = vadd.f32 %v478_v29, %v477_v30  ;;  %v465_v60 = vadd.f32 %v1561_v61, %v464_v40 }
 0x175   :  { %1564 = vtanh.f32 %v2106_v4  ;;  %v469_v26 = vsel %vm468_vm6, %v1561_v61, %v465_v60 }
 0x176   :  { %v474_v51 = vsel %vm471_vm7, %v473_v48, %v469_v26 }
 0x17b   :  { %v1565_v23 = vpop.eup %1564 }
 0x17c   :  { %v481_v62 = vmul.f32 %v1565_v23, %v474_v51  ;;  %v495_v51 = vunpack.c.h.bf16 %v1449_v5 }
 0x17e   :  { %v488_v50 = vpack.c.bf16 %v481_v62, %v481_v62  ;;  %v1513_v63 = vpack.c.bf16 %v481_v62, %v2059_v10  ;;  %v1448_v10 = vld [vmem:[%s2347_s0 + $0x20] sm:$0xff] }
 0x17f   :  { %v492_v15 = vunpack.c.l.bf16 %v1448_v10  ;;  %v493_v61 = vunpack.c.h.bf16 %v1448_v10 }
 0x180   :  { %504 = vmatmul.bf16.vlgmr.msra.gmra.mxu0 %v488_v50  ;;  %1514 = vst [vmem:[%s2349_s3] sm:$0xff] %v1513_v63   ;;  %517 = vmatmul.bf16.vlgmr.msra.gmra.mxu1 %v488_v50 }
 0x181   :  { %530 = vmatmul.bf16.vlgmr.msra.gmra.mxu2 %v488_v50  ;;  %543 = vmatmul.bf16.vlgmr.msra.gmra.mxu3 %v488_v50 }
 0x182   :  { %762 = vmatpush.bf16.msra.mxu0 %v1692_v3  ;;  %775 = vmatpush.bf16.msra.mxu1 %v1703_v7 }
 0x183   :  { %788 = vmatpush.bf16.msra.mxu2 %v1705_v8  ;;  %801 = vmatpush.bf16.msra.mxu3 %v1743_v21 }
 0x186   :  { %763 = vmatpush.bf16.msra.mxu0 %v1717_v12  ;;  %776 = vmatpush.bf16.msra.mxu1 %v1730_v16 }
 0x187   :  { %789 = vmatpush.bf16.msra.mxu2 %v1732_v17  ;;  %802 = vmatpush.bf16.msra.mxu3 %v1782_v34 }
 0x18a   :  { %764 = vmatpush.bf16.msra.mxu0 %v1765_v28  ;;  %777 = vmatpush.bf16.msra.mxu1 %v1778_v32 }
 0x18b   :  { %790 = vmatpush.bf16.msra.mxu2 %v1780_v33  ;;  %803 = vmatpush.bf16.msra.mxu3 %v1806_v42 }
 0x18e   :  { %765 = vmatpush.bf16.msra.mxu0 %v1804_v41  ;;  %778 = vmatpush.bf16.msra.mxu1 %v1816_v45 }
 0x18f   :  { %791 = vmatpush.bf16.msra.mxu2 %v1818_v46  ;;  %804 = vmatpush.bf16.msra.mxu3 %v1842_v54 }
 0x192   :  { %766 = vmatpush.bf16.msra.mxu0 %v1840_v53  ;;  %779 = vmatpush.bf16.msra.mxu1 %v1852_v57 }
 0x193   :  { %792 = vmatpush.bf16.msra.mxu2 %v1854_v58  ;;  %805 = vmatpush.bf16.msra.mxu3 %v1878_v2 }
 0x196   :  { %767 = vmatpush.bf16.msra.mxu0 %v1876_v1  ;;  %780 = vmatpush.bf16.msra.mxu1 %v1888_v6 }
 0x197   :  { %793 = vmatpush.bf16.msra.mxu2 %v1890_v9  ;;  %806 = vmatpush.bf16.msra.mxu3 %v1914_v20 }
 0x19a   :  { %768 = vmatpush.bf16.msra.mxu0 %v1912_v19  ;;  %781 = vmatpush.bf16.msra.mxu1 %v1924_v24 }
 0x19b   :  { %794 = vmatpush.bf16.msra.mxu2 %v1926_v25  ;;  %807 = vmatpush.bf16.msra.mxu3 %v1950_v37 }
 0x19e   :  { %769 = vmatpush.bf16.msra.mxu0 %v1948_v36  ;;  %782 = vmatpush.bf16.msra.mxu1 %v1954_v38 }
 0x19f   :  { %795 = vmatpush.bf16.msra.mxu2 %v1956_v39  ;;  %808 = vmatpush.bf16.msra.mxu3 %v1968_v44 }
 0x1fd   :  { %v505_v31 = vpop.f32.mrf.mxu0  ;;  %v518_v35 = vpop.f32.mrf.mxu1 }
 0x1fe   :  { %v506_v0 = vadd.f32 %v505_v31, %v492_v15  ;;  %v519_v59 = vadd.f32 %v518_v35, %v493_v61 }
 0x200   :  { %v548_v49 = vadd.f32 %v506_v0, %v2041_v52  ;;  %v549_v55 = vadd.f32 %v519_v59, %v2043_v56 }
 0x202   :  { %v1450_v14 = vmul.f32 -1.442695, %v548_v49  ;;  %v1451_v22 = vmul.f32 -1.442695, %v549_v55 }
 0x204   :  { %1566 = vpow2.f32 %v1450_v14  ;;  %v531_v27 = vpop.f32.mrf.mxu2  ;;  %v544_v29 = vpop.f32.mrf.mxu3 }
 0x205   :  { %1568 = vpow2.f32 %v1451_v22  ;;  %v532_v30 = vadd.f32 %v531_v27, %v494_v13  ;;  %v507_v40 = vpop.f32.mrf.mxu0  ;;  %v520_v60 = vpop.f32.mrf.mxu1  ;;  %v545_v10 = vadd.f32 %v544_v29, %v495_v51 }
 0x207   :  { %v550_v47 = vadd.f32 %v532_v30, %v2050_v11  ;;  %v551_v35 = vadd.f32 %v545_v10, %v2053_v43 }
 0x209   :  { %v1452_v18 = vmul.f32 -1.442695, %v550_v47 }
 0x20a   :  { %v1567_v26 = vpop.eup %1566 }
 0x20b   :  { %v1569_v48 = vpop.eup %1568  ;;  %v561_v23 = vadd.f32 1.0, %v1567_v26  ;;  %1570 = vpow2.f32 %v1452_v18 }
 0x20c   :  { %v562_v62 = vadd.f32 1.0, %v1569_v48  ;;  %v533_v50 = vpop.f32.mrf.mxu2  ;;  %v546_v63 = vpop.f32.mrf.mxu3 }
 0x20d   :  { %1572 = vrcp.f32 %v561_v23  ;;  %v575_v14 = vand.u32 2147483648, %v561_v23  ;;  %v573_v27 = vand.u32 2147483647, %v561_v23  ;;  %vm569_vm10 = vweird.f32 %v561_v23 }
 0x20e   :  { %1574 = vrcp.f32 %v562_v62  ;;  %v590_v5 = vand.u32 2147483648, %v562_v62  ;;  %v588_v29 = vand.u32 2147483647, %v562_v62  ;;  %vm584_vm11 = vweird.f32 %v562_v62 }
 0x20f   :  { %v576_v18 = vor.u32 1.1754944e-38, %v575_v14  ;;  %vm574_vm14 = vcmp.eq.f32.partialorder %v573_v27, 8.507059e+37 }
 0x210   :  { %v591_v48 = vor.u32 1.1754944e-38, %v590_v5  ;;  %vm589_vm15 = vcmp.eq.f32.partialorder %v588_v29, 8.507059e+37 }
 0x211   :  { %v1571_v15 = vpop.eup %1570 }
 0x212   :  { %v563_v61 = vadd.f32 1.0, %v1571_v15 }
 0x213   :  { %v1573_v31 = vpop.eup %1572 }
 0x214   :  { %v1575_v0 = vpop.eup %1574  ;;  %v565_v59 = vmul.f32 %v1573_v31, %v561_v23  ;;  %1576 = vrcp.f32 %v563_v61  ;;  %vm570_vm8 = vweird.f32 %v1573_v31  ;;  %vm599_vm1 = vweird.f32 %v563_v61 }
 0x215   :  { %v580_v49 = vmul.f32 %v1575_v0, %v562_v62  ;;  %1578 = vtanh.f32 %v551_v35  ;;  %vm585_vm9 = vweird.f32 %v1575_v0  ;;  %vm571_vm12 = vmor %vm569_vm10, %vm570_vm8 }
 0x216   :  { %v566_v55 = vsub.f32 1.0, %v565_v59  ;;  %vm586_vm13 = vmor %vm584_vm11, %vm585_vm9 }
 0x217   :  { %v581_v13 = vsub.f32 1.0, %v580_v49 }
 0x218   :  { %v567_v22 = vmul.f32 %v1573_v31, %v566_v55 }
 0x219   :  { %v582_v30 = vmul.f32 %v1575_v0, %v581_v13  ;;  %v605_v13 = vand.u32 2147483648, %v563_v61 }
 0x21a   :  { %v1577_v40 = vpop.eup %1576  ;;  %v568_v60 = vadd.f32 %v1573_v31, %v567_v22 }
 0x21b   :  { %v595_v47 = vmul.f32 %v1577_v40, %v563_v61  ;;  %v583_v26 = vadd.f32 %v1575_v0, %v582_v30  ;;  %v1579_v50 = vpop.eup %1578  ;;  %vm600_vm0 = vweird.f32 %v1577_v40  ;;  %v606_v5 = vor.u32 1.1754944e-38, %v605_v13 }
 0x21c   :  { %v572_v51 = vsel %vm571_vm12, %v1573_v31, %v568_v60  ;;  %v603_v31 = vand.u32 2147483647, %v563_v61  ;;  %vm601_vm2 = vmor %vm599_vm1, %vm600_vm0  ;;  %v1453_v61 = vld [vmem:[%s2347_s0 + $0x30] sm:$0xff] }
 0x21d   :  { %v596_v63 = vsub.f32 1.0, %v595_v47  ;;  %v577_v10 = vsel %vm574_vm14, %v576_v18, %v572_v51  ;;  %v587_v15 = vsel %vm586_vm13, %v1575_v0, %v583_v26  ;;  %v625_v30 = vunpack.c.l.bf16 %v1453_v61  ;;  %v1454_v26 = vld [vmem:[%s2347_s0 + $0x38] sm:$0xff] }
 0x21e   :  { %v592_v35 = vsel %vm589_vm15, %v591_v48, %v587_v15  ;;  %v611_v59 = vmul.f32 %v1579_v50, %v577_v10  ;;  %vm604_vm3 = vcmp.eq.f32.partialorder %v603_v31, 8.507059e+37  ;;  %v626_v29 = vunpack.c.h.bf16 %v1453_v61 }
 0x21f   :  { %v610_v49 = vmul.f32 %v592_v35, %v2106_v4  ;;  %v597_v55 = vmul.f32 %v1577_v40, %v596_v63  ;;  %v627_v50 = vunpack.c.l.bf16 %v1454_v26 }
 0x221   :  { %v2156_v23 = vadd.f32 %v611_v59, %v610_v49  ;;  %v598_v62 = vadd.f32 %v1577_v40, %v597_v55 }
 0x223   :  { %1580 = vtanh.f32 %v2156_v23  ;;  %v602_v14 = vsel %vm601_vm2, %v1577_v40, %v598_v62 }
 0x224   :  { %v607_v22 = vsel %vm604_vm3, %v606_v5, %v602_v14 }
 0x229   :  { %v1581_v0 = vpop.eup %1580 }
 0x22a   :  { %v2159_v27 = vmul.f32 %v1581_v0, %v607_v22  ;;  %v628_v0 = vunpack.c.h.bf16 %v1454_v26 }
 0x22c   :  { %v621_v4 = vpack.c.bf16 %v2159_v27, %v2159_v27 }
 0x22e   :  { %637 = vmatmul.bf16.vlgmr.msrb.gmra.mxu0 %v621_v4  ;;  %650 = vmatmul.bf16.vlgmr.msrb.gmra.mxu1 %v621_v4 }
 0x22f   :  { %663 = vmatmul.bf16.vlgmr.msrb.gmra.mxu2 %v621_v4  ;;  %676 = vmatmul.bf16.vlgmr.msrb.gmra.mxu3 %v621_v4 }
 0x230   :  { %895 = vmatpush.bf16.msrb.mxu0 %v1692_v3  ;;  %908 = vmatpush.bf16.msrb.mxu1 %v1703_v7 }
 0x231   :  { %921 = vmatpush.bf16.msrb.mxu2 %v1705_v8  ;;  %934 = vmatpush.bf16.msrb.mxu3 %v1743_v21 }
 0x234   :  { %896 = vmatpush.bf16.msrb.mxu0 %v1717_v12  ;;  %909 = vmatpush.bf16.msrb.mxu1 %v1730_v16 }
 0x235   :  { %922 = vmatpush.bf16.msrb.mxu2 %v1732_v17  ;;  %935 = vmatpush.bf16.msrb.mxu3 %v1782_v34 }
 0x238   :  { %897 = vmatpush.bf16.msrb.mxu0 %v1765_v28  ;;  %910 = vmatpush.bf16.msrb.mxu1 %v1778_v32 }
 0x239   :  { %923 = vmatpush.bf16.msrb.mxu2 %v1780_v33  ;;  %936 = vmatpush.bf16.msrb.mxu3 %v1806_v42 }
 0x23c   :  { %898 = vmatpush.bf16.msrb.mxu0 %v1804_v41  ;;  %911 = vmatpush.bf16.msrb.mxu1 %v1816_v45 }
 0x23d   :  { %924 = vmatpush.bf16.msrb.mxu2 %v1818_v46  ;;  %937 = vmatpush.bf16.msrb.mxu3 %v1842_v54 }
 0x240   :  { %899 = vmatpush.bf16.msrb.mxu0 %v1840_v53  ;;  %912 = vmatpush.bf16.msrb.mxu1 %v1852_v57 }
 0x241   :  { %925 = vmatpush.bf16.msrb.mxu2 %v1854_v58  ;;  %938 = vmatpush.bf16.msrb.mxu3 %v1878_v2 }
 0x244   :  { %900 = vmatpush.bf16.msrb.mxu0 %v1876_v1  ;;  %913 = vmatpush.bf16.msrb.mxu1 %v1888_v6 }
 0x245   :  { %926 = vmatpush.bf16.msrb.mxu2 %v1890_v9  ;;  %939 = vmatpush.bf16.msrb.mxu3 %v1914_v20 }
 0x248   :  { %901 = vmatpush.bf16.msrb.mxu0 %v1912_v19  ;;  %914 = vmatpush.bf16.msrb.mxu1 %v1924_v24 }
 0x249   :  { %927 = vmatpush.bf16.msrb.mxu2 %v1926_v25  ;;  %940 = vmatpush.bf16.msrb.mxu3 %v1950_v37 }
 0x24c   :  { %902 = vmatpush.bf16.msrb.mxu0 %v1948_v36  ;;  %915 = vmatpush.bf16.msrb.mxu1 %v1954_v38 }
 0x24d   :  { %928 = vmatpush.bf16.msrb.mxu2 %v1956_v39  ;;  %941 = vmatpush.bf16.msrb.mxu3 %v1968_v44 }
 0x2ab   :  { %v638_v40 = vpop.f32.mrf.mxu0  ;;  %v651_v60 = vpop.f32.mrf.mxu1 }
 0x2ac   :  { %v639_v47 = vadd.f32 %v638_v40, %v625_v30  ;;  %v652_v18 = vadd.f32 %v651_v60, %v626_v29 }
 0x2ae   :  { %v681_v48 = vadd.f32 %v639_v47, %v2041_v52  ;;  %v682_v51 = vadd.f32 %v652_v18, %v2043_v56 }
 0x2b0   :  { %v1455_v63 = vmul.f32 -1.442695, %v681_v48  ;;  %v1456_v10 = vmul.f32 -1.442695, %v682_v51 }
 0x2b2   :  { %1582 = vpow2.f32 %v1455_v63  ;;  %v664_v15 = vpop.f32.mrf.mxu2  ;;  %v677_v35 = vpop.f32.mrf.mxu3 }
 0x2b3   :  { %1584 = vpow2.f32 %v1456_v10  ;;  %v665_v59 = vadd.f32 %v664_v15, %v627_v50  ;;  %v640_v49 = vpop.f32.mrf.mxu0  ;;  %v653_v55 = vpop.f32.mrf.mxu1  ;;  %v678_v30 = vadd.f32 %v677_v35, %v628_v0 }
 0x2b5   :  { %v683_v62 = vadd.f32 %v665_v59, %v2050_v11  ;;  %v684_v47 = vadd.f32 %v678_v30, %v2053_v43 }
 0x2b7   :  { %v1457_v13 = vmul.f32 -1.442695, %v683_v62 }
 0x2b8   :  { %v1583_v31 = vpop.eup %1582 }
 0x2b9   :  { %v1585_v14 = vpop.eup %1584  ;;  %v694_v5 = vadd.f32 1.0, %v1583_v31  ;;  %1586 = vpow2.f32 %v1457_v13 }
 0x2ba   :  { %v695_v22 = vadd.f32 1.0, %v1585_v14  ;;  %v666_v4 = vpop.f32.mrf.mxu2  ;;  %v679_v61 = vpop.f32.mrf.mxu3 }
 0x2bb   :  { %1588 = vrcp.f32 %v694_v5  ;;  %v708_v10 = vand.u32 2147483648, %v694_v5  ;;  %v706_v59 = vand.u32 2147483647, %v694_v5  ;;  %vm702_vm6 = vweird.f32 %v694_v5 }
 0x2bc   :  { %1590 = vrcp.f32 %v695_v22  ;;  %v723_v26 = vand.u32 2147483648, %v695_v22  ;;  %v721_v35 = vand.u32 2147483647, %v695_v22  ;;  %vm717_vm7 = vweird.f32 %v695_v22 }
 0x2bd   :  { %v709_v31 = vor.u32 1.1754944e-38, %v708_v10  ;;  %vm707_vm10 = vcmp.eq.f32.partialorder %v706_v59, 8.507059e+37 }
 0x2be   :  { %v724_v0 = vor.u32 1.1754944e-38, %v723_v26  ;;  %vm722_vm11 = vcmp.eq.f32.partialorder %v721_v35, 8.507059e+37 }
 0x2bf   :  { %v1587_v29 = vpop.eup %1586 }
 0x2c0   :  { %v696_v40 = vadd.f32 1.0, %v1587_v29 }
 0x2c1   :  { %v1589_v60 = vpop.eup %1588 }
 0x2c2   :  { %v1591_v18 = vpop.eup %1590  ;;  %v698_v48 = vmul.f32 %v1589_v60, %v694_v5  ;;  %1592 = vrcp.f32 %v696_v40  ;;  %vm703_vm4 = vweird.f32 %v1589_v60  ;;  %v738_v10 = vand.u32 2147483648, %v696_v40 }
 0x2c3   :  { %v713_v51 = vmul.f32 %v1591_v18, %v695_v22  ;;  %1594 = vtanh.f32 %v684_v47  ;;  %vm718_vm5 = vweird.f32 %v1591_v18  ;;  %vm704_vm8 = vmor %vm702_vm6, %vm703_vm4  ;;  %vm732_vm13 = vweird.f32 %v696_v40 }
 0x2c4   :  { %v699_v50 = vsub.f32 1.0, %v698_v48  ;;  %vm719_vm9 = vmor %vm717_vm7, %vm718_vm5 }
 0x2c5   :  { %v714_v63 = vsub.f32 1.0, %v713_v51 }
 0x2c6   :  { %v700_v15 = vmul.f32 %v1589_v60, %v699_v50 }
 0x2c7   :  { %v715_v49 = vmul.f32 %v1591_v18, %v714_v63 }
 0x2c8   :  { %v1593_v55 = vpop.eup %1592  ;;  %v701_v62 = vadd.f32 %v1589_v60, %v700_v15  ;;  %v739_v15 = vor.u32 1.1754944e-38, %v738_v10 }
 0x2c9   :  { %v728_v13 = vmul.f32 %v1593_v55, %v696_v40  ;;  %v716_v14 = vadd.f32 %v1591_v18, %v715_v49  ;;  %v1595_v61 = vpop.eup %1594  ;;  %vm733_vm12 = vweird.f32 %v1593_v55 }
 0x2ca   :  { %v705_v4 = vsel %vm704_vm8, %v1589_v60, %v701_v62  ;;  %v736_v60 = vand.u32 2147483647, %v696_v40  ;;  %vm734_vm14 = vmor %vm732_vm13, %vm733_vm12 }
 0x2cb   :  { %v729_v30 = vsub.f32 1.0, %v728_v13  ;;  %v710_v29 = vsel %vm707_vm10, %v709_v31, %v705_v4  ;;  %v720_v47 = vsel %vm719_vm9, %v1591_v18, %v716_v14 }
 0x2cc   :  { %v725_v48 = vsel %vm722_vm11, %v724_v0, %v720_v47  ;;  %v744_v51 = vmul.f32 %v1595_v61, %v710_v29  ;;  %vm737_vm15 = vcmp.eq.f32.partialorder %v736_v60, 8.507059e+37  ;;  %v1459_v0 = vld [vmem:[%s2347_s0 + $0x48] sm:$0xff] }
 0x2cd   :  { %v743_v50 = vmul.f32 %v725_v48, %v2156_v23  ;;  %v730_v63 = vmul.f32 %v1593_v55, %v729_v30  ;;  %v760_v30 = vunpack.c.l.bf16 %v1459_v0 }
 0x2cf   :  { %v2206_v5 = vadd.f32 %v744_v51, %v743_v50  ;;  %v731_v22 = vadd.f32 %v1593_v55, %v730_v63 }
 0x2d1   :  { %1596 = vtanh.f32 %v2206_v5  ;;  %v735_v26 = vsel %vm734_vm14, %v1593_v55, %v731_v22 }
 0x2d2   :  { %v740_v59 = vsel %vm737_vm15, %v739_v15, %v735_v26 }
 0x2d7   :  { %v1597_v18 = vpop.eup %1596 }
 0x2d8   :  { %v747_v49 = vmul.f32 %v1597_v18, %v740_v59  ;;  %v761_v59 = vunpack.c.h.bf16 %v1459_v0 }
 0x2da   :  { %v754_v35 = vpack.c.bf16 %v747_v49, %v747_v49  ;;  %v1518_v23 = vpack.c.bf16 %v747_v49, %v2159_v27  ;;  %v1458_v27 = vld [vmem:[%s2347_s0 + $0x40] sm:$0xff] }
 0x2db   :  { %v758_v40 = vunpack.c.l.bf16 %v1458_v27  ;;  %v759_v55 = vunpack.c.h.bf16 %v1458_v27 }
 0x2dc   :  { %770 = vmatmul.bf16.vlgmr.msra.gmra.mxu0 %v754_v35  ;;  %1530 = vst [vmem:[%s2349_s3 + $0x8] sm:$0xff] %v1518_v23   ;;  %783 = vmatmul.bf16.vlgmr.msra.gmra.mxu1 %v754_v35 }
 0x2dd   :  { %796 = vmatmul.bf16.vlgmr.msra.gmra.mxu2 %v754_v35  ;;  %809 = vmatmul.bf16.vlgmr.msra.gmra.mxu3 %v754_v35 }
 0x2de   :  { %1028 = vmatpush.bf16.msra.mxu0 %v1692_v3  ;;  %1041 = vmatpush.bf16.msra.mxu1 %v1703_v7 }
 0x2df   :  { %1054 = vmatpush.bf16.msra.mxu2 %v1705_v8  ;;  %1067 = vmatpush.bf16.msra.mxu3 %v1743_v21 }
 0x2e2   :  { %1029 = vmatpush.bf16.msra.mxu0 %v1717_v12  ;;  %1042 = vmatpush.bf16.msra.mxu1 %v1730_v16 }
 0x2e3   :  { %1055 = vmatpush.bf16.msra.mxu2 %v1732_v17  ;;  %1068 = vmatpush.bf16.msra.mxu3 %v1782_v34 }
 0x2e6   :  { %1030 = vmatpush.bf16.msra.mxu0 %v1765_v28  ;;  %1043 = vmatpush.bf16.msra.mxu1 %v1778_v32 }
 0x2e7   :  { %1056 = vmatpush.bf16.msra.mxu2 %v1780_v33  ;;  %1069 = vmatpush.bf16.msra.mxu3 %v1806_v42 }
 0x2ea   :  { %1031 = vmatpush.bf16.msra.mxu0 %v1804_v41  ;;  %1044 = vmatpush.bf16.msra.mxu1 %v1816_v45 }
 0x2eb   :  { %1057 = vmatpush.bf16.msra.mxu2 %v1818_v46  ;;  %1070 = vmatpush.bf16.msra.mxu3 %v1842_v54 }
 0x2ee   :  { %1032 = vmatpush.bf16.msra.mxu0 %v1840_v53  ;;  %1045 = vmatpush.bf16.msra.mxu1 %v1852_v57 }
 0x2ef   :  { %1058 = vmatpush.bf16.msra.mxu2 %v1854_v58  ;;  %1071 = vmatpush.bf16.msra.mxu3 %v1878_v2 }
 0x2f2   :  { %1033 = vmatpush.bf16.msra.mxu0 %v1876_v1  ;;  %1046 = vmatpush.bf16.msra.mxu1 %v1888_v6 }
 0x2f3   :  { %1059 = vmatpush.bf16.msra.mxu2 %v1890_v9  ;;  %1072 = vmatpush.bf16.msra.mxu3 %v1914_v20 }
 0x2f6   :  { %1034 = vmatpush.bf16.msra.mxu0 %v1912_v19  ;;  %1047 = vmatpush.bf16.msra.mxu1 %v1924_v24 }
 0x2f7   :  { %1060 = vmatpush.bf16.msra.mxu2 %v1926_v25  ;;  %1073 = vmatpush.bf16.msra.mxu3 %v1950_v37 }
 0x2fa   :  { %1035 = vmatpush.bf16.msra.mxu0 %v1948_v36  ;;  %1048 = vmatpush.bf16.msra.mxu1 %v1954_v38 }
 0x2fb   :  { %1061 = vmatpush.bf16.msra.mxu2 %v1956_v39  ;;  %1074 = vmatpush.bf16.msra.mxu3 %v1968_v44 }
 0x359   :  { %v771_v62 = vpop.f32.mrf.mxu0  ;;  %v784_v13 = vpop.f32.mrf.mxu1 }
 0x35a   :  { %v772_v31 = vadd.f32 %v771_v62, %v758_v40  ;;  %v785_v14 = vadd.f32 %v784_v13, %v759_v55 }
 0x35c   :  { %v814_v4 = vadd.f32 %v772_v31, %v2041_v52  ;;  %v815_v61 = vadd.f32 %v785_v14, %v2043_v56 }
 0x35e   :  { %v1460_v29 = vmul.f32 -1.442695, %v814_v4  ;;  %v1461_v47 = vmul.f32 -1.442695, %v815_v61 }
 0x360   :  { %1598 = vpow2.f32 %v1460_v29  ;;  %v797_v48 = vpop.f32.mrf.mxu2  ;;  %v810_v51 = vpop.f32.mrf.mxu3 }
 0x361   :  { %1600 = vpow2.f32 %v1461_v47  ;;  %v798_v50 = vadd.f32 %v797_v48, %v760_v30  ;;  %v773_v63 = vpop.f32.mrf.mxu0  ;;  %v786_v22 = vpop.f32.mrf.mxu1  ;;  %v811_v27 = vadd.f32 %v810_v51, %v761_v59 }
 0x363   :  { %v816_v10 = vadd.f32 %v798_v50, %v2050_v11  ;;  %v817_v13 = vadd.f32 %v811_v27, %v2053_v43 }
 0x365   :  { %v1462_v60 = vmul.f32 -1.442695, %v816_v10 }
 0x366   :  { %v1599_v26 = vpop.eup %1598 }
 0x367   :  { %v1601_v15 = vpop.eup %1600  ;;  %v827_v18 = vadd.f32 1.0, %v1599_v26  ;;  %1602 = vpow2.f32 %v1462_v60 }
 0x368   :  { %v828_v49 = vadd.f32 1.0, %v1601_v15  ;;  %v799_v35 = vpop.f32.mrf.mxu2  ;;  %v812_v23 = vpop.f32.mrf.mxu3 }
 0x369   :  { %1604 = vrcp.f32 %v827_v18  ;;  %v841_v29 = vand.u32 2147483648, %v827_v18  ;;  %v839_v48 = vand.u32 2147483647, %v827_v18  ;;  %vm835_vm2 = vweird.f32 %v827_v18 }
 0x36a   :  { %1606 = vrcp.f32 %v828_v49  ;;  %v856_v0 = vand.u32 2147483648, %v828_v49  ;;  %v854_v51 = vand.u32 2147483647, %v828_v49  ;;  %vm850_vm3 = vweird.f32 %v828_v49 }
 0x36b   :  { %v842_v60 = vor.u32 1.1754944e-38, %v841_v29  ;;  %vm840_vm6 = vcmp.eq.f32.partialorder %v839_v48, 8.507059e+37 }
 0x36c   :  { %v857_v15 = vor.u32 1.1754944e-38, %v856_v0  ;;  %vm855_vm7 = vcmp.eq.f32.partialorder %v854_v51, 8.507059e+37 }
 0x36d   :  { %v1603_v40 = vpop.eup %1602 }
 0x36e   :  { %v829_v55 = vadd.f32 1.0, %v1603_v40 }
 0x36f   :  { %v1605_v62 = vpop.eup %1604 }
 0x370   :  { %v1607_v31 = vpop.eup %1606  ;;  %v831_v14 = vmul.f32 %v1605_v62, %v827_v18  ;;  %1608 = vrcp.f32 %v829_v55  ;;  %vm836_vm0 = vweird.f32 %v1605_v62  ;;  %vm865_vm9 = vweird.f32 %v829_v55 }
 0x371   :  { %v846_v4 = vmul.f32 %v1607_v31, %v828_v49  ;;  %1610 = vtanh.f32 %v817_v13  ;;  %vm851_vm1 = vweird.f32 %v1607_v31  ;;  %vm837_vm4 = vmor %vm835_vm2, %vm836_vm0 }
 0x372   :  { %v832_v61 = vsub.f32 1.0, %v831_v14  ;;  %vm852_vm5 = vmor %vm850_vm3, %vm851_vm1 }
 0x373   :  { %v847_v30 = vsub.f32 1.0, %v846_v4 }
 0x374   :  { %v833_v47 = vmul.f32 %v1605_v62, %v832_v61 }
 0x375   :  { %v848_v50 = vmul.f32 %v1607_v31, %v847_v30  ;;  %v871_v30 = vand.u32 2147483648, %v829_v55 }
 0x376   :  { %v1609_v63 = vpop.eup %1608  ;;  %v834_v22 = vadd.f32 %v1605_v62, %v833_v47 }
 0x377   :  { %v861_v10 = vmul.f32 %v1609_v63, %v829_v55  ;;  %v849_v26 = vadd.f32 %v1607_v31, %v848_v50  ;;  %v1611_v35 = vpop.eup %1610  ;;  %vm866_vm8 = vweird.f32 %v1609_v63  ;;  %v872_v0 = vor.u32 1.1754944e-38, %v871_v30 }
 0x378   :  { %v838_v59 = vsel %vm837_vm4, %v1605_v62, %v834_v22  ;;  %v869_v62 = vand.u32 2147483647, %v829_v55  ;;  %vm867_vm10 = vmor %vm865_vm9, %vm866_vm8 }
 0x379   :  { %v862_v23 = vsub.f32 1.0, %v861_v10  ;;  %v843_v27 = vsel %vm840_vm6, %v842_v60, %v838_v59  ;;  %v853_v40 = vsel %vm852_vm5, %v1607_v31, %v849_v26 }
 0x37a   :  { %v858_v13 = vsel %vm855_vm7, %v857_v15, %v853_v40  ;;  %v877_v14 = vmul.f32 %v1611_v35, %v843_v27  ;;  %vm870_vm11 = vcmp.eq.f32.partialorder %v869_v62, 8.507059e+37 }
 0x37b   :  { %v876_v4 = vmul.f32 %v858_v13, %v2206_v5  ;;  %v863_v61 = vmul.f32 %v1609_v63, %v862_v23 }
 0x37d   :  { %v2256_v18 = vadd.f32 %v877_v14, %v876_v4  ;;  %v864_v49 = vadd.f32 %v1609_v63, %v863_v61 }
 0x37f   :  { %1612 = vtanh.f32 %v2256_v18  ;;  %v868_v29 = vsel %vm867_vm10, %v1609_v63, %v864_v49 }
 0x380   :  { %v873_v47 = vsel %vm870_vm11, %v872_v0, %v868_v29 }
 0x385   :  { %v1613_v31 = vpop.eup %1612 }
 0x386   :  { %v2259_v48 = vmul.f32 %v1613_v31, %v873_v47 }
 0x388   :  { %v887_v5 = vpack.c.bf16 %v2259_v48, %v2259_v48 }
 0x38a   :  { %903 = vmatmul.bf16.vlgmr.msrb.gmra.mxu0 %v887_v5  ;;  %916 = vmatmul.bf16.vlgmr.msrb.gmra.mxu1 %v887_v5 }
 0x38b   :  { %929 = vmatmul.bf16.vlgmr.msrb.gmra.mxu2 %v887_v5  ;;  %942 = vmatmul.bf16.vlgmr.msrb.gmra.mxu3 %v887_v5 }
 0x38c   :  { %1161 = vmatpush.bf16.msrb.mxu0 %v1692_v3  ;;  %1174 = vmatpush.bf16.msrb.mxu1 %v1703_v7  ;;  %v1463_v3 = vld [vmem:[%s2347_s0 + $0x50] sm:$0xff] }
 0x38d   :  { %1187 = vmatpush.bf16.msrb.mxu2 %v1705_v8  ;;  %1200 = vmatpush.bf16.msrb.mxu3 %v1743_v21  ;;  %v891_v7 = vunpack.c.l.bf16 %v1463_v3  ;;  %v892_v8 = vunpack.c.h.bf16 %v1463_v3 }
 0x390   :  { %1162 = vmatpush.bf16.msrb.mxu0 %v1717_v12  ;;  %1175 = vmatpush.bf16.msrb.mxu1 %v1730_v16 }
 0x391   :  { %1188 = vmatpush.bf16.msrb.mxu2 %v1732_v17  ;;  %1201 = vmatpush.bf16.msrb.mxu3 %v1782_v34 }
 0x394   :  { %1163 = vmatpush.bf16.msrb.mxu0 %v1765_v28  ;;  %1176 = vmatpush.bf16.msrb.mxu1 %v1778_v32  ;;  %v1464_v28 = vld [vmem:[%s2347_s0 + $0x58] sm:$0xff] }
 0x395   :  { %1189 = vmatpush.bf16.msrb.mxu2 %v1780_v33  ;;  %1202 = vmatpush.bf16.msrb.mxu3 %v1806_v42  ;;  %v893_v34 = vunpack.c.l.bf16 %v1464_v28 }
 0x398   :  { %1164 = vmatpush.bf16.msrb.mxu0 %v1804_v41  ;;  %1177 = vmatpush.bf16.msrb.mxu1 %v1816_v45 }
 0x399   :  { %1190 = vmatpush.bf16.msrb.mxu2 %v1818_v46  ;;  %1203 = vmatpush.bf16.msrb.mxu3 %v1842_v54 }
 0x39c   :  { %1165 = vmatpush.bf16.msrb.mxu0 %v1840_v53  ;;  %1178 = vmatpush.bf16.msrb.mxu1 %v1852_v57 }
 0x39d   :  { %1191 = vmatpush.bf16.msrb.mxu2 %v1854_v58  ;;  %1204 = vmatpush.bf16.msrb.mxu3 %v1878_v2 }
 0x3a0   :  { %1166 = vmatpush.bf16.msrb.mxu0 %v1876_v1  ;;  %1179 = vmatpush.bf16.msrb.mxu1 %v1888_v6 }
 0x3a1   :  { %1192 = vmatpush.bf16.msrb.mxu2 %v1890_v9  ;;  %1205 = vmatpush.bf16.msrb.mxu3 %v1914_v20 }
 0x3a4   :  { %1167 = vmatpush.bf16.msrb.mxu0 %v1912_v19  ;;  %1180 = vmatpush.bf16.msrb.mxu1 %v1924_v24  ;;  %v894_v19 = vunpack.c.h.bf16 %v1464_v28 }
 0x3a5   :  { %1193 = vmatpush.bf16.msrb.mxu2 %v1926_v25  ;;  %1206 = vmatpush.bf16.msrb.mxu3 %v1950_v37 }
 0x3a8   :  { %1168 = vmatpush.bf16.msrb.mxu0 %v1948_v36  ;;  %1181 = vmatpush.bf16.msrb.mxu1 %v1954_v38 }
 0x3a9   :  { %1194 = vmatpush.bf16.msrb.mxu2 %v1956_v39  ;;  %1207 = vmatpush.bf16.msrb.mxu3 %v1968_v44 }
 0x407   :  { %v904_v12 = vpop.f32.mrf.mxu0  ;;  %v917_v16 = vpop.f32.mrf.mxu1 }
 0x408   :  { %v905_v17 = vadd.f32 %v904_v12, %v891_v7  ;;  %v918_v21 = vadd.f32 %v917_v16, %v892_v8 }
 0x40a   :  { %v947_v32 = vadd.f32 %v905_v17, %v2041_v52  ;;  %v948_v33 = vadd.f32 %v918_v21, %v2043_v56 }
 0x40c   :  { %v1465_v41 = vmul.f32 -1.442695, %v947_v32  ;;  %v1466_v42 = vmul.f32 -1.442695, %v948_v33 }
 0x40e   :  { %1614 = vpow2.f32 %v1465_v41  ;;  %v930_v45 = vpop.f32.mrf.mxu2  ;;  %v943_v46 = vpop.f32.mrf.mxu3 }
 0x40f   :  { %1616 = vpow2.f32 %v1466_v42  ;;  %v931_v53 = vadd.f32 %v930_v45, %v893_v34  ;;  %v906_v54 = vpop.f32.mrf.mxu0  ;;  %v919_v57 = vpop.f32.mrf.mxu1  ;;  %v944_v36 = vadd.f32 %v943_v46, %v894_v19  ;;  %v1468_v34 = vld [vmem:[%s2347_s0 + $0x60] sm:$0xff] }
 0x410   :  { %v1024_v41 = vunpack.c.l.bf16 %v1468_v34  ;;  %v1025_v42 = vunpack.c.h.bf16 %v1468_v34 }
 0x411   :  { %v949_v58 = vadd.f32 %v931_v53, %v2050_v11  ;;  %v950_v44 = vadd.f32 %v944_v36, %v2053_v43 }
 0x413   :  { %v1467_v1 = vmul.f32 -1.442695, %v949_v58 }
 0x414   :  { %v1615_v2 = vpop.eup %1614 }
 0x415   :  { %v1617_v6 = vpop.eup %1616  ;;  %v960_v9 = vadd.f32 1.0, %v1615_v2  ;;  %1618 = vpow2.f32 %v1467_v1 }
 0x416   :  { %v961_v20 = vadd.f32 1.0, %v1617_v6  ;;  %v932_v24 = vpop.f32.mrf.mxu2  ;;  %v945_v25 = vpop.f32.mrf.mxu3 }
 0x417   :  { %1620 = vrcp.f32 %v960_v9  ;;  %v974_v10 = vand.u32 2147483648, %v960_v9  ;;  %v972_v15 = vand.u32 2147483647, %v960_v9  ;;  %vm968_vm14 = vweird.f32 %v960_v9 }
 0x418   :  { %1622 = vrcp.f32 %v961_v20  ;;  %v989_v60 = vand.u32 2147483648, %v961_v20  ;;  %v987_v35 = vand.u32 2147483647, %v961_v20  ;;  %vm983_vm15 = vweird.f32 %v961_v20 }
 0x419   :  { %v975_v13 = vor.u32 1.1754944e-38, %v974_v10  ;;  %vm973_vm2 = vcmp.eq.f32.partialorder %v972_v15, 8.507059e+37 }
 0x41a   :  { %v990_v4 = vor.u32 1.1754944e-38, %v989_v60  ;;  %vm988_vm3 = vcmp.eq.f32.partialorder %v987_v35, 8.507059e+37 }
 0x41b   :  { %v1619_v37 = vpop.eup %1618 }
 0x41c   :  { %v962_v38 = vadd.f32 1.0, %v1619_v37 }
 0x41d   :  { %v1621_v39 = vpop.eup %1620 }
 0x41e   :  { %v1623_v55 = vpop.eup %1622  ;;  %v964_v50 = vmul.f32 %v1621_v39, %v960_v9  ;;  %1624 = vrcp.f32 %v962_v38  ;;  %vm969_vm12 = vweird.f32 %v1621_v39  ;;  %v1004_v8 = vand.u32 2147483648, %v962_v38 }
 0x41f   :  { %v979_v51 = vmul.f32 %v1623_v55, %v961_v20  ;;  %1626 = vtanh.f32 %v950_v44  ;;  %vm984_vm13 = vweird.f32 %v1623_v55  ;;  %vm970_vm0 = vmor %vm968_vm14, %vm969_vm12  ;;  %vm998_vm5 = vweird.f32 %v962_v38 }
 0x420   :  { %v965_v63 = vsub.f32 1.0, %v964_v50  ;;  %vm985_vm1 = vmor %vm983_vm15, %vm984_vm13  ;;  %v1002_v12 = vand.u32 2147483647, %v962_v38  ;;  %v1005_v17 = vor.u32 1.1754944e-38, %v1004_v8 }
 0x421   :  { %v980_v22 = vsub.f32 1.0, %v979_v51 }
 0x422   :  { %v966_v26 = vmul.f32 %v1621_v39, %v965_v63  ;;  %vm1003_vm7 = vcmp.eq.f32.partialorder %v1002_v12, 8.507059e+37 }
 0x423   :  { %v981_v59 = vmul.f32 %v1623_v55, %v980_v22 }
 0x424   :  { %v1625_v23 = vpop.eup %1624  ;;  %v967_v27 = vadd.f32 %v1621_v39, %v966_v26 }
 0x425   :  { %v994_v40 = vmul.f32 %v1625_v23, %v962_v38  ;;  %v982_v14 = vadd.f32 %v1623_v55, %v981_v59  ;;  %v1627_v49 = vpop.eup %1626  ;;  %vm999_vm4 = vweird.f32 %v1625_v23 }
 0x426   :  { %v971_v61 = vsel %vm970_vm0, %v1621_v39, %v967_v27  ;;  %vm1000_vm6 = vmor %vm998_vm5, %vm999_vm4 }
 0x427   :  { %v995_v30 = vsub.f32 1.0, %v994_v40  ;;  %v976_v62 = vsel %vm973_vm2, %v975_v13, %v971_v61  ;;  %v986_v29 = vsel %vm985_vm1, %v1623_v55, %v982_v14 }
 0x428   :  { %v991_v0 = vsel %vm988_vm3, %v990_v4, %v986_v29  ;;  %v1010_v31 = vmul.f32 %v1627_v49, %v976_v62 }
 0x429   :  { %v1009_v47 = vmul.f32 %v991_v0, %v2256_v18  ;;  %v996_v5 = vmul.f32 %v1625_v23, %v995_v30 }
 0x42b   :  { %v2306_v3 = vadd.f32 %v1010_v31, %v1009_v47  ;;  %v997_v7 = vadd.f32 %v1625_v23, %v996_v5 }
 0x42d   :  { %1628 = vtanh.f32 %v2306_v3  ;;  %v1001_v16 = vsel %vm1000_vm6, %v1625_v23, %v997_v7 }
 0x42e   :  { %v1006_v28 = vsel %vm1003_vm7, %v1005_v17, %v1001_v16 }
 0x433   :  { %v1629_v21 = vpop.eup %1628 }
 0x434   :  { %v1013_v32 = vmul.f32 %v1629_v21, %v1006_v28 }
 0x436   :  { %v1020_v33 = vpack.c.bf16 %v1013_v32, %v1013_v32  ;;  %v1523_v18 = vpack.c.bf16 %v1013_v32, %v2259_v48  ;;  %v1469_v48 = vld [vmem:[%s2347_s0 + $0x68] sm:$0xff] }
 0x437   :  { %v1026_v1 = vunpack.c.l.bf16 %v1469_v48  ;;  %v1027_v55 = vunpack.c.h.bf16 %v1469_v48 }
 0x438   :  { %1036 = vmatmul.bf16.vlgmr.msra.gmra.mxu0 %v1020_v33  ;;  %1531 = vst [vmem:[%s2349_s3 + $0x10] sm:$0xff] %v1523_v18   ;;  %1049 = vmatmul.bf16.vlgmr.msra.gmra.mxu1 %v1020_v33 }
 0x439   :  { %1062 = vmatmul.bf16.vlgmr.msra.gmra.mxu2 %v1020_v33  ;;  %1075 = vmatmul.bf16.vlgmr.msra.gmra.mxu3 %v1020_v33 }
 0x4b5   :  { %v1037_v45 = vpop.f32.mrf.mxu0  ;;  %v1050_v46 = vpop.f32.mrf.mxu1 }
 0x4b6   :  { %v1038_v53 = vadd.f32 %v1037_v45, %v1024_v41  ;;  %v1051_v54 = vadd.f32 %v1050_v46, %v1025_v42 }
 0x4b8   :  { %v1080_v57 = vadd.f32 %v1038_v53, %v2041_v52  ;;  %v1081_v58 = vadd.f32 %v1051_v54, %v2043_v56 }
 0x4ba   :  { %v1470_v2 = vmul.f32 -1.442695, %v1080_v57  ;;  %v1471_v6 = vmul.f32 -1.442695, %v1081_v58  ;;  %v1473_v57 = vld [vmem:[%s2347_s0 + $0x70] sm:$0xff] }
 0x4bb   :  { %v1157_v58 = vunpack.c.l.bf16 %v1473_v57 }
 0x4bc   :  { %1630 = vpow2.f32 %v1470_v2  ;;  %v1063_v9 = vpop.f32.mrf.mxu2  ;;  %v1076_v19 = vpop.f32.mrf.mxu3 }
 0x4bd   :  { %1632 = vpow2.f32 %v1471_v6  ;;  %v1064_v20 = vadd.f32 %v1063_v9, %v1026_v1  ;;  %v1039_v24 = vpop.f32.mrf.mxu0  ;;  %v1052_v25 = vpop.f32.mrf.mxu1  ;;  %v1077_v22 = vadd.f32 %v1076_v19, %v1027_v55  ;;  %v1158_v1 = vunpack.c.h.bf16 %v1473_v57 }
 0x4bf   :  { %v1082_v36 = vadd.f32 %v1064_v20, %v2050_v11  ;;  %v1083_v15 = vadd.f32 %v1077_v22, %v2053_v43  ;;  %v1474_v20 = vld [vmem:[%s2347_s0 + $0x78] sm:$0xff] }
 0x4c1   :  { %v1472_v37 = vmul.f32 -1.442695, %v1082_v36  ;;  %v1159_v36 = vunpack.c.l.bf16 %v1474_v20 }
 0x4c2   :  { %v1631_v38 = vpop.eup %1630 }
 0x4c3   :  { %v1633_v39 = vpop.eup %1632  ;;  %v1093_v44 = vadd.f32 1.0, %v1631_v38  ;;  %1634 = vpow2.f32 %v1472_v37 }
 0x4c4   :  { %v1094_v50 = vadd.f32 1.0, %v1633_v39  ;;  %v1065_v51 = vpop.f32.mrf.mxu2  ;;  %v1078_v63 = vpop.f32.mrf.mxu3 }
 0x4c5   :  { %1636 = vrcp.f32 %v1093_v44  ;;  %v1107_v13 = vand.u32 2147483648, %v1093_v44  ;;  %v1105_v61 = vand.u32 2147483647, %v1093_v44  ;;  %vm1101_vm10 = vweird.f32 %v1093_v44 }
 0x4c6   :  { %1638 = vrcp.f32 %v1094_v50  ;;  %v1122_v14 = vand.u32 2147483648, %v1094_v50  ;;  %v1120_v30 = vand.u32 2147483647, %v1094_v50  ;;  %vm1116_vm11 = vweird.f32 %v1094_v50 }
 0x4c7   :  { %v1108_v31 = vor.u32 1.1754944e-38, %v1107_v13  ;;  %vm1106_vm14 = vcmp.eq.f32.partialorder %v1105_v61, 8.507059e+37 }
 0x4c8   :  { %v1123_v5 = vor.u32 1.1754944e-38, %v1122_v14  ;;  %vm1121_vm15 = vcmp.eq.f32.partialorder %v1120_v30, 8.507059e+37 }
 0x4c9   :  { %v1635_v10 = vpop.eup %1634 }
 0x4ca   :  { %v1095_v60 = vadd.f32 1.0, %v1635_v10 }
 0x4cb   :  { %v1637_v26 = vpop.eup %1636 }
 0x4cc   :  { %v1639_v59 = vpop.eup %1638  ;;  %v1097_v35 = vmul.f32 %v1637_v26, %v1093_v44  ;;  %1640 = vrcp.f32 %v1095_v60  ;;  %vm1102_vm8 = vweird.f32 %v1637_v26  ;;  %v1137_v41 = vand.u32 2147483648, %v1095_v60 }
 0x4cd   :  { %v1112_v23 = vmul.f32 %v1639_v59, %v1094_v50  ;;  %1642 = vtanh.f32 %v1083_v15  ;;  %vm1117_vm9 = vweird.f32 %v1639_v59  ;;  %vm1103_vm12 = vmor %vm1101_vm10, %vm1102_vm8  ;;  %vm1131_vm1 = vweird.f32 %v1095_v60 }
 0x4ce   :  { %v1098_v27 = vsub.f32 1.0, %v1097_v35  ;;  %vm1118_vm13 = vmor %vm1116_vm11, %vm1117_vm9  ;;  %v1135_v42 = vand.u32 2147483647, %v1095_v60  ;;  %v1138_v46 = vor.u32 1.1754944e-38, %v1137_v41 }
 0x4cf   :  { %v1113_v40 = vsub.f32 1.0, %v1112_v23 }
 0x4d0   :  { %v1099_v4 = vmul.f32 %v1637_v26, %v1098_v27  ;;  %vm1136_vm3 = vcmp.eq.f32.partialorder %v1135_v42, 8.507059e+37 }
 0x4d1   :  { %v1114_v49 = vmul.f32 %v1639_v59, %v1113_v40 }
 0x4d2   :  { %v1641_v62 = vpop.eup %1640  ;;  %v1100_v29 = vadd.f32 %v1637_v26, %v1099_v4 }
 0x4d3   :  { %v1127_v0 = vmul.f32 %v1641_v62, %v1095_v60  ;;  %v1115_v47 = vadd.f32 %v1639_v59, %v1114_v49  ;;  %v1643_v8 = vpop.eup %1642  ;;  %vm1132_vm0 = vweird.f32 %v1641_v62 }
 0x4d4   :  { %v1104_v7 = vsel %vm1103_vm12, %v1637_v26, %v1100_v29  ;;  %vm1133_vm2 = vmor %vm1131_vm1, %vm1132_vm0 }
 0x4d5   :  { %v1128_v12 = vsub.f32 1.0, %v1127_v0  ;;  %v1109_v16 = vsel %vm1106_vm14, %v1108_v31, %v1104_v7  ;;  %v1119_v17 = vsel %vm1118_vm13, %v1639_v59, %v1115_v47 }
 0x4d6   :  { %v1124_v21 = vsel %vm1121_vm15, %v1123_v5, %v1119_v17  ;;  %v1143_v28 = vmul.f32 %v1643_v8, %v1109_v16 }
 0x4d7   :  { %v1142_v32 = vmul.f32 %v1124_v21, %v2306_v3  ;;  %v1129_v33 = vmul.f32 %v1641_v62, %v1128_v12 }
 0x4d9   :  { %v2324_v18 = vadd.f32 %v1143_v28, %v1142_v32  ;;  %v1130_v34 = vadd.f32 %v1641_v62, %v1129_v33 }
 0x4db   :  { %1644 = vtanh.f32 %v2324_v18  ;;  %v1134_v45 = vsel %vm1133_vm2, %v1641_v62, %v1130_v34 }
 0x4dc   :  { %v1139_v54 = vsel %vm1136_vm3, %v1138_v46, %v1134_v45 }
 0x4e1   :  { %v1645_v53 = vpop.eup %1644 }
 0x4e2   :  { %v2327_v48 = vmul.f32 %v1645_v53, %v1139_v54 }
 0x4e4   :  { %v1153_v3 = vpack.c.bf16 %v2327_v48, %v2327_v48 }
 0x4e6   :  { %1169 = vmatmul.bf16.vlgmr.msrb.gmra.mxu0 %v1153_v3  ;;  %1182 = vmatmul.bf16.vlgmr.msrb.gmra.mxu1 %v1153_v3 }
 0x4e7   :  { %1195 = vmatmul.bf16.vlgmr.msrb.gmra.mxu2 %v1153_v3  ;;  %1208 = vmatmul.bf16.vlgmr.msrb.gmra.mxu3 %v1153_v3 }
 0x563   :  { %v1170_v2 = vpop.f32.mrf.mxu0  ;;  %v1183_v6 = vpop.f32.mrf.mxu1 }
 0x564   :  { %v1171_v9 = vadd.f32 %v1170_v2, %v1157_v58  ;;  %v1184_v19 = vadd.f32 %v1183_v6, %v1158_v1 }
 0x566   :  { %v1213_v24 = vadd.f32 %v1171_v9, %v2041_v52  ;;  %v1214_v25 = vadd.f32 %v1184_v19, %v2043_v56  ;;  %v1160_v52 = vunpack.c.h.bf16 %v1474_v20 }
 0x568   :  { %v1475_v37 = vmul.f32 -1.442695, %v1213_v24  ;;  %v1476_v38 = vmul.f32 -1.442695, %v1214_v25 }
 0x56a   :  { %1646 = vpow2.f32 %v1475_v37  ;;  %v1196_v39 = vpop.f32.mrf.mxu2  ;;  %v1209_v44 = vpop.f32.mrf.mxu3 }
 0x56b   :  { %1648 = vpow2.f32 %v1476_v38  ;;  %v1197_v55 = vadd.f32 %v1196_v39, %v1159_v36  ;;  %v1172_v50 = vpop.f32.mrf.mxu0  ;;  %v1185_v51 = vpop.f32.mrf.mxu1  ;;  %v1210_v35 = vadd.f32 %v1209_v44, %v1160_v52 }
 0x56d   :  { %v1215_v63 = vadd.f32 %v1197_v55, %v2050_v11  ;;  %v1216_v13 = vadd.f32 %v1210_v35, %v2053_v43 }
 0x56f   :  { %v1477_v22 = vmul.f32 -1.442695, %v1215_v63 }
 0x570   :  { %v1647_v10 = vpop.eup %1646 }
 0x571   :  { %v1649_v60 = vpop.eup %1648  ;;  %v1226_v26 = vadd.f32 1.0, %v1647_v10  ;;  %1650 = vpow2.f32 %v1477_v22 }
 0x572   :  { %v1227_v15 = vadd.f32 1.0, %v1649_v60  ;;  %v1198_v56 = vpop.f32.mrf.mxu2  ;;  %v1211_v59 = vpop.f32.mrf.mxu3 }
 0x573   :  { %1652 = vrcp.f32 %v1226_v26  ;;  %v1240_v30 = vand.u32 2147483648, %v1226_v26  ;;  %v1238_v0 = vand.u32 2147483647, %v1226_v26  ;;  %vm1234_vm6 = vweird.f32 %v1226_v26 }
 0x574   :  { %1654 = vrcp.f32 %v1227_v15  ;;  %v1255_v62 = vand.u32 2147483648, %v1227_v15  ;;  %v1253_v47 = vand.u32 2147483647, %v1227_v15  ;;  %vm1249_vm7 = vweird.f32 %v1227_v15 }
 0x575   :  { %v1241_v8 = vor.u32 1.1754944e-38, %v1240_v30  ;;  %vm1239_vm10 = vcmp.eq.f32.partialorder %v1238_v0, 8.507059e+37 }
 0x576   :  { %v1256_v16 = vor.u32 1.1754944e-38, %v1255_v62  ;;  %vm1254_vm11 = vcmp.eq.f32.partialorder %v1253_v47, 8.507059e+37 }
 0x577   :  { %v1651_v23 = vpop.eup %1650 }
 0x578   :  { %v1228_v27 = vadd.f32 1.0, %v1651_v23 }
 0x579   :  { %v1653_v40 = vpop.eup %1652 }
 0x57a   :  { %v1655_v14 = vpop.eup %1654  ;;  %v1230_v4 = vmul.f32 %v1653_v40, %v1226_v26  ;;  %1656 = vrcp.f32 %v1228_v27  ;;  %vm1235_vm4 = vweird.f32 %v1653_v40  ;;  %v1270_v54 = vand.u32 2147483648, %v1228_v27 }
 0x57b   :  { %v1245_v11 = vmul.f32 %v1655_v14, %v1227_v15  ;;  %1658 = vtanh.f32 %v1216_v13  ;;  %vm1250_vm5 = vweird.f32 %v1655_v14  ;;  %vm1236_vm8 = vmor %vm1234_vm6, %vm1235_vm4  ;;  %vm1264_vm13 = vweird.f32 %v1228_v27 }
 0x57c   :  { %v1231_v61 = vsub.f32 1.0, %v1230_v4  ;;  %vm1251_vm9 = vmor %vm1249_vm7, %vm1250_vm5  ;;  %v1268_v3 = vand.u32 2147483647, %v1228_v27  ;;  %v1271_v58 = vor.u32 1.1754944e-38, %v1270_v54 }
 0x57d   :  { %v1246_v49 = vsub.f32 1.0, %v1245_v11 }
 0x57e   :  { %v1232_v29 = vmul.f32 %v1653_v40, %v1231_v61  ;;  %vm1269_vm15 = vcmp.eq.f32.partialorder %v1268_v3, 8.507059e+37 }
 0x57f   :  { %v1247_v31 = vmul.f32 %v1655_v14, %v1246_v49 }
 0x580   :  { %v1657_v5 = vpop.eup %1656  ;;  %v1233_v7 = vadd.f32 %v1653_v40, %v1232_v29 }
 0x581   :  { %v1260_v43 = vmul.f32 %v1657_v5, %v1228_v27  ;;  %v1248_v12 = vadd.f32 %v1655_v14, %v1247_v31  ;;  %v1659_v21 = vpop.eup %1658  ;;  %vm1265_vm12 = vweird.f32 %v1657_v5 }
 0x582   :  { %v1237_v17 = vsel %vm1236_vm8, %v1653_v40, %v1233_v7  ;;  %vm1266_vm14 = vmor %vm1264_vm13, %vm1265_vm12 }
 0x583   :  { %v1261_v28 = vsub.f32 1.0, %v1260_v43  ;;  %v1242_v32 = vsel %vm1239_vm10, %v1241_v8, %v1237_v17  ;;  %v1252_v33 = vsel %vm1251_vm9, %v1655_v14, %v1248_v12 }
 0x584   :  { %v1257_v34 = vsel %vm1254_vm11, %v1256_v16, %v1252_v33  ;;  %v1276_v41 = vmul.f32 %v1659_v21, %v1242_v32 }
 0x585   :  { %v1262_v42 = vmul.f32 %v1657_v5, %v1261_v28  ;;  %v1275_v45 = vmul.f32 %v1257_v34, %v2324_v18 }
 0x587   :  { %v1277_v46 = vadd.f32 %v1276_v41, %v1275_v45  ;;  %v1263_v53 = vadd.f32 %v1657_v5, %v1262_v42 }
 0x589   :  { %1660 = vtanh.f32 %v1277_v46  ;;  %v1267_v57 = vsel %vm1266_vm14, %v1657_v5, %v1263_v53 }
 0x58a   :  { %v1272_v2 = vsel %vm1269_vm15, %v1271_v58, %v1267_v57 }
 0x58f   :  { %v1661_v1 = vpop.eup %1660 }
 0x590   :  { %v1279_v6 = vmul.f32 %v1661_v1, %v1272_v2 }
 0x592   :  { %v1528_v9 = vpack.c.bf16 %v1279_v6, %v2327_v48 }
 0x594   :  { %1532 = vst [vmem:[%s2349_s3 + $0x18] sm:$0xff] %v1528_v9  }

</bundles_post_ra>
